<compile_context>
chip_gen: v7x
topology: tpu7x:2x2x1
jax: 0.10.0
libtpu: 0.0.40
codegen_flags: <defaults>
</compile_context>

<pallas_src>
import jax
import jax.numpy as jnp
from jax.experimental import pallas as pl
from jax.experimental.pallas import tpu as pltpu

# ---------------- synthetic cfg (small, consistent with the module) ----------
NUM_PRED_CLASSES = 16    # cfg.MODEL.NUM_PRED_CLASSES
IMG_SIZE = 16            # cfg.INPUT.SIZE (crops resized to this)
IN_CH = 3                # RGB crops
CONV_CH = 32             # stand-in trunk width (VGG conv would be 64..512)
N_PAIRS = 16             # number of sampled subject-object pair crops

HW = IMG_SIZE * IMG_SIZE          # 256 spatial positions per pair crop
K_RAW = 9 * IN_CH                 # 27 (3x3 window * channels)
K_PAD = 32                        # padded contraction dim (aligned MXU / vreg)
M_ROWS = N_PAIRS * HW             # 4096 im2col rows (ALL pairs, one block)


# ---------------- fused kernel bodies -----------------------------------------
def _pooled_logits(patches_ref, pool_ref, conv_w_ref, conv_b_ref,
                   fc_w_ref, fc_b_ref):
    """Conv (one im2col matmul, bf16 -> f32 acc) + ReLU + pool-matmul + fc.

    patches_ref : (M_ROWS, K_PAD)   bf16   (all 16 pair crops)
    pool_ref    : (N_PAIRS, M_ROWS) f32    block-diagonal 1/HW pooling matrix
    returns     : (N_PAIRS, NUM_PRED_CLASSES) f32 logits
    """
    # One long weight-stationary matmul instead of 8 short push/drain chains.
    act = jnp.dot(patches_ref[...], conv_w_ref[...],
                  preferred_element_type=jnp.float32)          # (M, CONV_CH)
    act = jnp.maximum(act + conv_b_ref[...], 0.0)              # ReLU (VPU)
    # Global average pool as a matmul on the (otherwise idle) MXU.
    pooled = jnp.dot(pool_ref[...], act,
                     preferred_element_type=jnp.float32)       # (N, CONV_CH)
    # classifier._modules['6'] : Linear(in_features, num_pred_classes)
    logits = (jnp.dot(pooled, fc_w_ref[...],
                      preferred_element_type=jnp.float32)
              + fc_b_ref[...])                                 # (N, P)
    return logits


def _train_kernel(patches_ref, pool_ref, conv_w_ref, conv_b_ref,
                  fc_w_ref, fc_b_ref, labels_ref, loss_ref):
    logits = _pooled_logits(patches_ref, pool_ref, conv_w_ref, conv_b_ref,
                            fc_w_ref, fc_b_ref)
    y = labels_ref[...]
    # F.binary_cross_entropy_with_logits (stable):
    #   loss = max(x,0) - x*y + log(1 + exp(-|x|))
    bce = (jnp.maximum(logits, 0.0) - logits * y
           + jnp.log1p(jnp.exp(-jnp.abs(logits))))
    # mean over (N, C) * NUM_PRED_CLASSES  ==  total_sum / N_PAIRS
    loss_ref[...] = jnp.zeros_like(loss_ref)
    loss_ref[...] += jnp.sum(bce) * (1.0 / N_PAIRS)


def _eval_kernel(patches_ref, pool_ref, conv_w_ref, conv_b_ref,
                 fc_w_ref, fc_b_ref, soscores_ref, scores_ref):
    logits = _pooled_logits(patches_ref, pool_ref, conv_w_ref, conv_b_ref,
                            fc_w_ref, fc_b_ref)
    # eval branch: pscores = soscores.view(-1,1) * sigmoid(plogits)
    scores_ref[...] = soscores_ref[...] * jax.nn.sigmoid(logits)


# ---------------- JAX glue (fused under jit) -----------------------------------
def _im2col_3x3_same(x):
    """x: (N, H, W, C) -> (N, H*W, 9*C), 3x3 window, padding=1 (VGG-style)."""
    n, h, w, c = x.shape
    xp = jnp.pad(x, ((0, 0), (1, 1), (1, 1), (0, 0)))
    cols = [xp[:, dy:dy + h, dx:dx + w, :] for dy in range(3) for dx in range(3)]
    patches = jnp.stack(cols, axis=-2)            # (N, H, W, 9, C)
    return patches.reshape(n, h * w, 9 * c)       # (N, HW, 27)


def _prep_patches(pimages):
    """im2col + K padding (27->32) + bf16 cast + flatten to (M_ROWS, K_PAD)."""
    patches = _im2col_3x3_same(pimages)                               # (N, HW, 27)
    patches = jnp.pad(patches, ((0, 0), (0, 0), (0, K_PAD - K_RAW)))  # (N, HW, 32)
    return patches.astype(jnp.bfloat16).reshape(M_ROWS, K_PAD)


_COMMON_SPECS = [
    pl.BlockSpec((M_ROWS, K_PAD), lambda i: (0, 0)),                  # patches
    pl.BlockSpec((N_PAIRS, M_ROWS), lambda i: (0, 0)),                # pool matrix
    pl.BlockSpec((K_PAD, CONV_CH), lambda i: (0, 0)),                 # conv_w
    pl.BlockSpec((1, CONV_CH), lambda i: (0, 0)),                     # conv_b
    pl.BlockSpec((CONV_CH, NUM_PRED_CLASSES), lambda i: (0, 0)),      # fc_w
    pl.BlockSpec((1, NUM_PRED_CLASSES), lambda i: (0, 0)),            # fc_b
]


@jax.jit
def forward_train(params, pimages, plabels):
    patches = _prep_patches(pimages)
    loss = pl.pallas_call(
        _train_kernel,
        out_shape=jax.ShapeDtypeStruct((1, 1), jnp.float32),
        grid=(1,),
        in_specs=_COMMON_SPECS + [
            pl.BlockSpec((N_PAIRS, NUM_PRED_CLASSES), lambda i: (0, 0)),
        ],
        out_specs=pl.BlockSpec((1, 1), lambda i: (0, 0)),
        compiler_params=pltpu.CompilerParams(
            dimension_semantics=("arbitrary",)),
    )(patches, params["pool_mat"], params["conv_w"], params["conv_b"],
      params["fc_w"], params["fc_b"], plabels)
    return dict(predcls_loss=loss[0, 0])


@jax.jit
def forward_eval(params, pimages, soscores):
    patches = _prep_patches(pimages)
    # TODO(synk): nonzero / descending sort / top-K Relationship assembly is
    # host-side ragged logic, left out of the kernel.
    return pl.pallas_call(
        _eval_kernel,
        out_shape=jax.ShapeDtypeStruct((N_PAIRS, NUM_PRED_CLASSES), jnp.float32),
        grid=(1,),
        in_specs=_COMMON_SPECS + [
            pl.BlockSpec((N_PAIRS, 1), lambda i: (0, 0)),
        ],
        out_specs=pl.BlockSpec((N_PAIRS, NUM_PRED_CLASSES), lambda i: (0, 0)),
        compiler_params=pltpu.CompilerParams(
            dimension_semantics=("arbitrary",)),
    )(patches, params["pool_mat"], params["conv_w"], params["conv_b"],
      params["fc_w"], params["fc_b"], soscores)


# ---------------- model parameters --------------------------------------------
def init_params(key):
    k0, k1 = jax.random.split(key, 2)
    conv_w = 0.05 * jax.random.normal(k0, (K_RAW, CONV_CH), jnp.float32)
    # padded + bf16 conv weight precomputed ONCE (not per forward call)
    conv_w = jnp.pad(conv_w, ((0, K_PAD - K_RAW), (0, 0))).astype(jnp.bfloat16)
    conv_b = jnp.zeros((1, CONV_CH), jnp.float32)
    fc_w = 0.05 * jax.random.normal(k1, (CONV_CH, NUM_PRED_CLASSES), jnp.float32)
    # prior -> bias = -log((1-prior)/prior)   (exactly as in __init__)
    prior = jnp.linspace(0.01, 0.2, NUM_PRED_CLASSES, dtype=jnp.float32)
    fc_b = (-jnp.log((1.0 - prior) / prior)).reshape(1, NUM_PRED_CLASSES)
    # block-diagonal global-average-pool matrix: pool_mat[p, r] = 1/HW iff
    # im2col row r belongs to pair p.  Built once, reused every forward.
    row = jnp.arange(N_PAIRS, dtype=jnp.int32)[:, None]
    col = jnp.arange(M_ROWS, dtype=jnp.int32)[None, :]
    pool_mat = jnp.where(col // HW == row, 1.0 / HW, 0.0).astype(jnp.float32)
    return dict(conv_w=conv_w, conv_b=conv_b, fc_w=fc_w, fc_b=fc_b,
                pool_mat=pool_mat)


# ---------------- pure-JAX reference (f32) -------------------------------------
def _reference(params, pimages, plabels, soscores):
    patches = _im2col_3x3_same(pimages)                               # f32
    patches = jnp.pad(patches, ((0, 0), (0, 0), (0, K_PAD - K_RAW)))
    w = params["conv_w"].astype(jnp.float32)
    act = jnp.maximum(
        jnp.einsum("npk,kc->npc", patches, w) + params["conv_b"][None], 0.0)
    pooled = act.mean(axis=1)                                         # (N, CONV_CH)
    logits = pooled @ params["fc_w"] + params["fc_b"]
    bce = (jnp.maximum(logits, 0.0) - logits * plabels
           + jnp.log1p(jnp.exp(-jnp.abs(logits))))
    loss = jnp.mean(bce) * NUM_PRED_CLASSES
    scores = soscores * jax.nn.sigmoid(logits)
    return loss, scores


# ---------------- main --------------------------------------------------------
if __name__ == "__main__":
    key = jax.random.PRNGKey(0)
    kp, ki, kl, ks = jax.random.split(key, 4)

    params = init_params(kp)

    # synthetic pair crops (already "cropped + resized + normalized")
    pimages = jax.random.normal(ki, (N_PAIRS, IMG_SIZE, IMG_SIZE, IN_CH),
                                jnp.float32)
    # multi-hot predicate labels from match_and_sample (stand-in)
    plabels = jax.random.bernoulli(
        kl, 0.1, (N_PAIRS, NUM_PRED_CLASSES)).astype(jnp.float32)
    # subject*object detection scores (stand-in for soscores)
    soscores = jax.random.uniform(ks, (N_PAIRS, 1), jnp.float32)

    out_train = forward_train(params, pimages, plabels)
    out_eval = forward_eval(params, pimages, soscores)

    jax.block_until_ready(out_train["predcls_loss"])
    jax.block_until_ready(out_eval)

    ref_loss, ref_scores = _reference(params, pimages, plabels, soscores)

    assert out_train["predcls_loss"].shape == ()
    assert out_eval.shape == (N_PAIRS, NUM_PRED_CLASSES)
    assert bool(jnp.isfinite(out_train["predcls_loss"]))
    assert bool(jnp.all(jnp.isfinite(out_eval)))
    # bf16 conv inputs vs f32 reference -> loose tolerance
    assert bool(jnp.allclose(out_train["predcls_loss"], ref_loss,
                             rtol=5e-2, atol=5e-2))
    assert bool(jnp.allclose(out_eval, ref_scores, rtol=5e-2, atol=5e-2))
    print("KERNEL_OK")
</pallas_src>

<mosaic_0001>
module attributes {stable_mosaic.version = 11 : i64} {
  func.func @_train_kernel(%arg0: i32, %arg1: memref<4096x32xbf16, #tpu.memory_space<vmem>>, %arg2: memref<16x4096xf32, #tpu.memory_space<vmem>>, %arg3: memref<32x32xbf16, #tpu.memory_space<vmem>>, %arg4: memref<1x32xf32, #tpu.memory_space<vmem>>, %arg5: memref<32x16xf32, #tpu.memory_space<vmem>>, %arg6: memref<1x16xf32, #tpu.memory_space<vmem>>, %arg7: memref<16x16xf32, #tpu.memory_space<vmem>>, %arg8: memref<1x1xf32, #tpu.memory_space<vmem>>) attributes {dimension_semantics = [#tpu.dimension_semantics<arbitrary>], iteration_bounds = array<i64: 1>, scalar_prefetch = 0 : i64, scratch_operands = 0 : i64, tpu.core_type = #tpu.core_type<tc>, window_params = [{pipeline_mode = #tpu.pipeline_mode<synchronous>, transform_indices = @transform_0, window_bounds = array<i64: 4096, 32>}, {pipeline_mode = #tpu.pipeline_mode<synchronous>, transform_indices = @transform_1, window_bounds = array<i64: 16, 4096>}, {pipeline_mode = #tpu.pipeline_mode<synchronous>, transform_indices = @transform_2, window_bounds = array<i64: 32, 32>}, {pipeline_mode = #tpu.pipeline_mode<synchronous>, transform_indices = @transform_3, window_bounds = array<i64: 1, 32>}, {pipeline_mode = #tpu.pipeline_mode<synchronous>, transform_indices = @transform_4, window_bounds = array<i64: 32, 16>}, {pipeline_mode = #tpu.pipeline_mode<synchronous>, transform_indices = @transform_5, window_bounds = array<i64: 1, 16>}, {pipeline_mode = #tpu.pipeline_mode<synchronous>, transform_indices = @transform_6, window_bounds = array<i64: 16, 16>}, {pipeline_mode = #tpu.pipeline_mode<synchronous>, transform_indices = @transform_7, window_bounds = array<i64: 1, 1>}]} {
    %c0 = arith.constant 0 : index
    %c0_0 = arith.constant 0 : index
    %0 = vector.load %arg1[%c0, %c0_0] : memref<4096x32xbf16, #tpu.memory_space<vmem>>, vector<4096x32xbf16>
    %c0_1 = arith.constant 0 : index
    %c0_2 = arith.constant 0 : index
    %1 = vector.load %arg3[%c0_1, %c0_2] : memref<32x32xbf16, #tpu.memory_space<vmem>>, vector<32x32xbf16>
    %cst = arith.constant dense<0.000000e+00> : vector<4096x32xf32>
    %2 = tpu.matmul %0, %1, %cst {dimension_numbers = #tpu.dot_dimension_numbers<[1], [0], [0], [1], [0, 0, 1, 1], [], []>} : vector<4096x32xbf16>, vector<32x32xbf16>, vector<4096x32xf32> -> vector<4096x32xf32>
    %c0_3 = arith.constant 0 : index
    %c0_4 = arith.constant 0 : index
    %3 = vector.load %arg4[%c0_3, %c0_4] : memref<1x32xf32, #tpu.memory_space<vmem>>, vector<1x32xf32>
    %4 = vector.broadcast %3 : vector<1x32xf32> to vector<4096x32xf32>
    %5 = arith.addf %2, %4 : vector<4096x32xf32>
    %cst_5 = arith.constant 0.000000e+00 : f32
    %6 = vector.broadcast %cst_5 : f32 to vector<4096x32xf32>
    %7 = arith.maximumf %5, %6 : vector<4096x32xf32>
    %c0_6 = arith.constant 0 : index
    %c0_7 = arith.constant 0 : index
    %8 = vector.load %arg2[%c0_6, %c0_7] : memref<16x4096xf32, #tpu.memory_space<vmem>>, vector<16x4096xf32>
    %cst_8 = arith.constant dense<0.000000e+00> : vector<16x32xf32>
    %9 = tpu.matmul %8, %7, %cst_8 {dimension_numbers = #tpu.dot_dimension_numbers<[1], [0], [0], [1], [0, 0, 1, 1], [], []>} : vector<16x4096xf32>, vector<4096x32xf32>, vector<16x32xf32> -> vector<16x32xf32>
    %c0_9 = arith.constant 0 : index
    %c0_10 = arith.constant 0 : index
    %10 = vector.load %arg5[%c0_9, %c0_10] : memref<32x16xf32, #tpu.memory_space<vmem>>, vector<32x16xf32>
    %cst_11 = arith.constant dense<0.000000e+00> : vector<16x16xf32>
    %11 = tpu.matmul %9, %10, %cst_11 {dimension_numbers = #tpu.dot_dimension_numbers<[1], [0], [0], [1], [0, 0, 1, 1], [], []>} : vector<16x32xf32>, vector<32x16xf32>, vector<16x16xf32> -> vector<16x16xf32>
    %c0_12 = arith.constant 0 : index
    %c0_13 = arith.constant 0 : index
    %12 = vector.load %arg6[%c0_12, %c0_13] : memref<1x16xf32, #tpu.memory_space<vmem>>, vector<1x16xf32>
    %13 = vector.broadcast %12 : vector<1x16xf32> to vector<16x16xf32>
    %14 = arith.addf %11, %13 : vector<16x16xf32>
    %c0_14 = arith.constant 0 : index
    %c0_15 = arith.constant 0 : index
    %15 = vector.load %arg7[%c0_14, %c0_15] : memref<16x16xf32, #tpu.memory_space<vmem>>, vector<16x16xf32>
    %cst_16 = arith.constant 0.000000e+00 : f32
    %16 = vector.broadcast %cst_16 : f32 to vector<16x16xf32>
    %17 = arith.maximumf %14, %16 : vector<16x16xf32>
    %18 = arith.mulf %14, %15 : vector<16x16xf32>
    %19 = arith.subf %17, %18 : vector<16x16xf32>
    %20 = math.absf %14 : vector<16x16xf32>
    %cst_17 = arith.constant 0.000000e+00 : f32
    %21 = vector.broadcast %cst_17 : f32 to vector<16x16xf32>
    %22 = arith.subf %21, %20 : vector<16x16xf32>
    %23 = math.exp %22 : vector<16x16xf32>
    %24 = math.log1p %23 : vector<16x16xf32>
    %25 = arith.addf %19, %24 : vector<16x16xf32>
    %cst_18 = arith.constant 0.000000e+00 : f32
    %26 = vector.broadcast %cst_18 : f32 to vector<1x1xf32>
    %c0_19 = arith.constant 0 : index
    %c0_20 = arith.constant 0 : index
    %27 = vector.load %arg8[%c0_19, %c0_20] : memref<1x1xf32, #tpu.memory_space<vmem>>, vector<1x1xf32>
    tpu.vector_store %arg8[%c0_19, %c0_20], %26 {strides = array<i32>} : memref<1x1xf32, #tpu.memory_space<vmem>>, vector<1x1xf32>,
    %c0_21 = arith.constant 0 : index
    %c0_22 = arith.constant 0 : index
    %28 = vector.load %arg8[%c0_21, %c0_22] : memref<1x1xf32, #tpu.memory_space<vmem>>, vector<1x1xf32>
    %29 = vector.shape_cast %25 : vector<16x16xf32> to vector<1x16x16xf32>
    %cst_23 = arith.constant dense<0.000000e+00> : vector<1xf32>
    %30 = vector.multi_reduction <add>, %29, %cst_23 [1, 2] : vector<1x16x16xf32> to vector<1xf32>
    %31 = vector.shape_cast %30 : vector<1xf32> to vector<1x1x1xf32>
    %32 = vector.extract %31[0, 0, 0] : f32 from vector<1x1x1xf32>
    %cst_24 = arith.constant 6.250000e-02 : f32
    %33 = arith.mulf %32, %cst_24 : f32
    %34 = vector.broadcast %33 : f32 to vector<1x1xf32>
    %35 = arith.addf %28, %34 : vector<1x1xf32>
    %c0_25 = arith.constant 0 : index
    %c0_26 = arith.constant 0 : index
    %36 = vector.load %arg8[%c0_25, %c0_26] : memref<1x1xf32, #tpu.memory_space<vmem>>, vector<1x1xf32>
    tpu.vector_store %arg8[%c0_25, %c0_26], %35 {strides = array<i32>} : memref<1x1xf32, #tpu.memory_space<vmem>>, vector<1x1xf32>,
    return
  }
  func.func @transform_0(%arg0: i32) -> (i32, i32) {
    %c0_i32 = arith.constant 0 : i32
    %c0_i32_0 = arith.constant 0 : i32
    %c0_i32_1 = arith.constant 0 : i32
    return %c0_i32, %c0_i32_0 : i32, i32
  }
  func.func @transform_1(%arg0: i32) -> (i32, i32) {
    %c0_i32 = arith.constant 0 : i32
    %c0_i32_0 = arith.constant 0 : i32
    %c0_i32_1 = arith.constant 0 : i32
    return %c0_i32, %c0_i32_0 : i32, i32
  }
  func.func @transform_2(%arg0: i32) -> (i32, i32) {
    %c0_i32 = arith.constant 0 : i32
    %c0_i32_0 = arith.constant 0 : i32
    %c0_i32_1 = arith.constant 0 : i32
    return %c0_i32, %c0_i32_0 : i32, i32
  }
  func.func @transform_3(%arg0: i32) -> (i32, i32) {
    %c0_i32 = arith.constant 0 : i32
    %c0_i32_0 = arith.constant 0 : i32
    %c0_i32_1 = arith.constant 0 : i32
    return %c0_i32, %c0_i32_0 : i32, i32
  }
  func.func @transform_4(%arg0: i32) -> (i32, i32) {
    %c0_i32 = arith.constant 0 : i32
    %c0_i32_0 = arith.constant 0 : i32
    %c0_i32_1 = arith.constant 0 : i32
    return %c0_i32, %c0_i32_0 : i32, i32
  }
  func.func @transform_5(%arg0: i32) -> (i32, i32) {
    %c0_i32 = arith.constant 0 : i32
    %c0_i32_0 = arith.constant 0 : i32
    %c0_i32_1 = arith.constant 0 : i32
    return %c0_i32, %c0_i32_0 : i32, i32
  }
  func.func @transform_6(%arg0: i32) -> (i32, i32) {
    %c0_i32 = arith.constant 0 : i32
    %c0_i32_0 = arith.constant 0 : i32
    %c0_i32_1 = arith.constant 0 : i32
    return %c0_i32, %c0_i32_0 : i32, i32
  }
  func.func @transform_7(%arg0: i32) -> (i32, i32) {
    %c0_i32 = arith.constant 0 : i32
    %c0_i32_0 = arith.constant 0 : i32
    %c0_i32_1 = arith.constant 0 : i32
    return %c0_i32, %c0_i32_0 : i32, i32
  }
}

</mosaic_0001>

<bundles_post_ra>
// kernel: forward_train.1
= control target key start
LH: loop header
LB: loop body
LE: loop exit
PB: predicated region body
PF: predicated region fallthrough
CT: control target
= control target key end

     0   :  { %vm1843_vm0 = vcmask 261120   ;;  %s11721_s0 = inlined_call_operand.vmem [shape: bf16[4096,32], index: 0, kind: input, shape index: {}]   ;;  %s11722_s1 = inlined_call_operand.vmem [shape: f32[16,4096], index: 1, kind: input, shape index: {}]   ;;  %s11723_s2 = inlined_call_operand.vmem [shape: bf16[32,32], index: 2, kind: input, shape index: {}]   ;;  %s11724_s3 = inlined_call_operand.vmem [shape: f32[1,32], index: 3, kind: input, shape index: {}]   ;;  %s11725_s4 = inlined_call_operand.vmem [shape: f32[32,16], index: 4, kind: input, shape index: {}]   ;;  %s11726_s5 = inlined_call_operand.vmem [shape: f32[1,16], index: 5, kind: input, shape index: {}]   ;;  %s11727_s6 = inlined_call_operand.vmem [shape: f32[16,16], index: 6, kind: input, shape index: {}]   ;;  %s11728_s7 = inlined_call_operand.hbm [shape: f32[1,1], index: 7, kind: output, shape index: {}]  }
   0x1   :  { %v9076_v0 = vld [vmem:[%s11723_s2] sm:$0xff]   ;;  %v9077_v1 = vld [vmem:[%s11723_s2 + $0x8] sm:$0xff]   ;;  %v9080_v4 = vld [vmem:[%s11721_s0 + $0x10] sm:$0xff]  }
   0x2   :  { %8021 = vmatprep.subr.bf16.mxu0 %v9076_v0  ;;  %v9078_v2 = vld [vmem:[%s11721_s0] sm:$0xff]   ;;  %9068 = vmatprep.subr.bf16.mxu1 %v9076_v0  ;;  %v9079_v3 = vld [vmem:[%s11721_s0 + $0x8] sm:$0xff]   ;;  %v9081_v5 = vld [vmem:[%s11721_s0 + $0x18] sm:$0xff]  }
   0x3   :  { %8022 = vmatpush3.bf16.msra.mxu0 %v9076_v0  ;;  %9070 = vmatpush3.bf16.msra.mxu1 %v9076_v0  ;;  %v9082_v6 = vld [vmem:[%s11721_s0 + $0x20] sm:$0xff]   ;;  %v9092_v7 = vld [vmem:[%s11721_s0 + $0x5f0] sm:$0xff]   ;;  %v9093_v8 = vld [vmem:[%s11721_s0 + $0x5f8] sm:$0xff]  }
   0x4   :  { %8023 = vmatprep.subr.bf16.mxu0 %v9077_v1  ;;  %8025 = vmatprep.mubr.msk.bf16.mxu0 %vm1843_vm0, %v9078_v2  ;;  %v9096_v9 = vld [vmem:[%s11721_s0 + $0x600] sm:$0xff]   ;;  %v9083_v10 = vld [vmem:[%s11721_s0 + $0x28] sm:$0xff]   ;;  %v9084_v11 = vld [vmem:[%s11721_s0 + $0x30] sm:$0xff]  }
   0x5   :  { %9069 = vmatprep.subr.bf16.mxu1 %v9077_v1  ;;  %8405 = vmatprep.mubr.msk.bf16.mxu1 %vm1843_vm0, %v9092_v7  ;;  %v9097_v12 = vld [vmem:[%s11721_s0 + $0x608] sm:$0xff]   ;;  %v9100_v13 = vld [vmem:[%s11721_s0 + $0x610] sm:$0xff]   ;;  %v9085_v14 = vld [vmem:[%s11721_s0 + $0x38] sm:$0xff]  }
   0x6   :  { %v9086_v15 = vld [vmem:[%s11721_s0 + $0x40] sm:$0xff]   ;;  %v9101_v16 = vld [vmem:[%s11721_s0 + $0x618] sm:$0xff]   ;;  %v9087_v18 = vld [vmem:[%s11721_s0 + $0x48] sm:$0xff]  }
   0x7   :  { %8024 = vmatpush3.bf16.msra.mxu0 %v9077_v1  ;;  %9071 = vmatpush3.bf16.msra.mxu1 %v9077_v1  ;;  %v9104_v17 = vld [vmem:[%s11721_s0 + $0x620] sm:$0xff]   ;;  %v9088_v19 = vld [vmem:[%s11721_s0 + $0x50] sm:$0xff]   ;;  %v9105_v20 = vld [vmem:[%s11721_s0 + $0x628] sm:$0xff]  }
   0x8   :  { %v9108_v21 = vld [vmem:[%s11721_s0 + $0x630] sm:$0xff]   ;;  %v9089_v22 = vld [vmem:[%s11721_s0 + $0x58] sm:$0xff]   ;;  %v9090_v23 = vld [vmem:[%s11721_s0 + $0x60] sm:$0xff]  }
   0x9   :  { %v9109_v24 = vld [vmem:[%s11721_s0 + $0x638] sm:$0xff]   ;;  %v9112_v25 = vld [vmem:[%s11721_s0 + $0x640] sm:$0xff]   ;;  %v9091_v26 = vld [vmem:[%s11721_s0 + $0x68] sm:$0xff]  }
   0xa   :  { %8026 = vmatmul.mubr.msk.bf16.vlgmr.msra.gmra.mrb[0].mxu0 %vm1843_vm0, %v9079_v3  ;;  %8406 = vmatmul.mubr.msk.bf16.vlgmr.msra.gmra.mrb[0].mxu1 %vm1843_vm0, %v9093_v8  ;;  %v9094_v27 = vld [vmem:[%s11721_s0 + $0x70] sm:$0xff]   ;;  %v9113_v28 = vld [vmem:[%s11721_s0 + $0x648] sm:$0xff]   ;;  %v9095_v30 = vld [vmem:[%s11721_s0 + $0x78] sm:$0xff]  }
   0xb   :  { %8029 = vmatprep.mubr.msk.bf16.mxu0 %vm1843_vm0, %v9080_v4  ;;  %8409 = vmatprep.mubr.msk.bf16.mxu1 %vm1843_vm0, %v9096_v9  ;;  %v9116_v29 = vld [vmem:[%s11721_s0 + $0x650] sm:$0xff]   ;;  %v9098_v31 = vld [vmem:[%s11721_s0 + $0x80] sm:$0xff]   ;;  %v9117_v32 = vld [vmem:[%s11721_s0 + $0x658] sm:$0xff]  }
   0xc   :  { %v9120_v33 = vld [vmem:[%s11721_s0 + $0x660] sm:$0xff]   ;;  %v9099_v34 = vld [vmem:[%s11721_s0 + $0x88] sm:$0xff]   ;;  %v9102_v35 = vld [vmem:[%s11721_s0 + $0x90] sm:$0xff]  }
   0xd   :  { %v9121_v36 = vld [vmem:[%s11721_s0 + $0x668] sm:$0xff]   ;;  %v9124_v37 = vld [vmem:[%s11721_s0 + $0x670] sm:$0xff]   ;;  %v9103_v38 = vld [vmem:[%s11721_s0 + $0x98] sm:$0xff]  }
   0xe   :  { %v9106_v39 = vld [vmem:[%s11721_s0 + $0xa0] sm:$0xff]   ;;  %v9125_v40 = vld [vmem:[%s11721_s0 + $0x678] sm:$0xff]   ;;  %v9107_v42 = vld [vmem:[%s11721_s0 + $0xa8] sm:$0xff]  }
   0xf   :  { %v9128_v41 = vld [vmem:[%s11721_s0 + $0x680] sm:$0xff]   ;;  %v9110_v43 = vld [vmem:[%s11721_s0 + $0xb0] sm:$0xff]   ;;  %v9129_v44 = vld [vmem:[%s11721_s0 + $0x688] sm:$0xff]  }
  0x10   :  { %v9132_v45 = vld [vmem:[%s11721_s0 + $0x690] sm:$0xff]   ;;  %v9111_v46 = vld [vmem:[%s11721_s0 + $0xb8] sm:$0xff]   ;;  %v9114_v47 = vld [vmem:[%s11721_s0 + $0xc0] sm:$0xff]  }
  0x11   :  { %v9133_v48 = vld [vmem:[%s11721_s0 + $0x698] sm:$0xff]   ;;  %v9136_v49 = vld [vmem:[%s11721_s0 + $0x6a0] sm:$0xff]   ;;  %v9115_v50 = vld [vmem:[%s11721_s0 + $0xc8] sm:$0xff]  }
  0x12   :  { %8030 = vmatmul.mubr.msk.bf16.gmra.mrb[4].mxu0 %vm1843_vm0, %v9081_v5  ;;  %8410 = vmatmul.mubr.msk.bf16.gmra.mrb[4].mxu1 %vm1843_vm0, %v9097_v12  ;;  %v9118_v51 = vld [vmem:[%s11721_s0 + $0xd0] sm:$0xff]   ;;  %v9137_v52 = vld [vmem:[%s11721_s0 + $0x6a8] sm:$0xff]   ;;  %v9119_v54 = vld [vmem:[%s11721_s0 + $0xd8] sm:$0xff]  }
  0x13   :  { %8033 = vmatprep.mubr.msk.bf16.mxu0 %vm1843_vm0, %v9082_v6  ;;  %8413 = vmatprep.mubr.msk.bf16.mxu1 %vm1843_vm0, %v9100_v13  ;;  %v9140_v53 = vld [vmem:[%s11721_s0 + $0x6b0] sm:$0xff]   ;;  %v9122_v55 = vld [vmem:[%s11721_s0 + $0xe0] sm:$0xff]   ;;  %v9141_v56 = vld [vmem:[%s11721_s0 + $0x6b8] sm:$0xff]  }
  0x14   :  { %v9144_v57 = vld [vmem:[%s11721_s0 + $0x6c0] sm:$0xff]   ;;  %v9123_v58 = vld [vmem:[%s11721_s0 + $0xe8] sm:$0xff]   ;;  %v9126_v59 = vld [vmem:[%s11721_s0 + $0xf0] sm:$0xff]  }
  0x15   :  { %v9145_v60 = vld [vmem:[%s11721_s0 + $0x6c8] sm:$0xff]   ;;  %v9148_v61 = vld [vmem:[%s11721_s0 + $0x6d0] sm:$0xff]   ;;  %v9127_v62 = vld [vmem:[%s11721_s0 + $0xf8] sm:$0xff]  }
  0x16   :  { %v9130_v63 = vld [vmem:[%s11721_s0 + $0x100] sm:$0xff]   ;;  %v9149_v0 = vld [vmem:[%s11721_s0 + $0x6d8] sm:$0xff]   ;;  %v9131_v2 = vld [vmem:[%s11721_s0 + $0x108] sm:$0xff]  }
  0x17   :  { %v9152_v1 = vld [vmem:[%s11721_s0 + $0x6e0] sm:$0xff]   ;;  %v9134_v3 = vld [vmem:[%s11721_s0 + $0x110] sm:$0xff]   ;;  %v9153_v4 = vld [vmem:[%s11721_s0 + $0x6e8] sm:$0xff]  }
  0x18   :  { %v9156_v5 = vld [vmem:[%s11721_s0 + $0x6f0] sm:$0xff]   ;;  %v9135_v6 = vld [vmem:[%s11721_s0 + $0x118] sm:$0xff]   ;;  %v9138_v7 = vld [vmem:[%s11721_s0 + $0x120] sm:$0xff]  }
  0x19   :  { %v9157_v8 = vld [vmem:[%s11721_s0 + $0x6f8] sm:$0xff]   ;;  %v9160_v9 = vld [vmem:[%s11721_s0 + $0x700] sm:$0xff]   ;;  %v9161_v12 = vld [vmem:[%s11721_s0 + $0x708] sm:$0xff]  }
  0x1a   :  { %8034 = vmatmul.mubr.msk.bf16.gmra.mrb[8].mxu0 %vm1843_vm0, %v9083_v10  ;;  %8414 = vmatmul.mubr.msk.bf16.gmra.mrb[8].mxu1 %vm1843_vm0, %v9101_v16  ;;  %v9139_v10 = vld [vmem:[%s11721_s0 + $0x128] sm:$0xff]   ;;  %v9164_v13 = vld [vmem:[%s11721_s0 + $0x710] sm:$0xff]   ;;  %v9165_v16 = vld [vmem:[%s11721_s0 + $0x718] sm:$0xff]  }
  0x1b   :  { %8037 = vmatprep.mubr.msk.bf16.mxu0 %vm1843_vm0, %v9084_v11  ;;  %8417 = vmatprep.mubr.msk.bf16.mxu1 %vm1843_vm0, %v9104_v17  ;;  %v9142_v11 = vld [vmem:[%s11721_s0 + $0x130] sm:$0xff]   ;;  %v9168_v17 = vld [vmem:[%s11721_s0 + $0x720] sm:$0xff]  }
  0x22   :  { %8038 = vmatmul.mubr.msk.bf16.gmra.mrb[12].mxu0 %vm1843_vm0, %v9085_v14  ;;  %8418 = vmatmul.mubr.msk.bf16.gmra.mrb[12].mxu1 %vm1843_vm0, %v9105_v20  ;;  %v9143_v14 = vld [vmem:[%s11721_s0 + $0x138] sm:$0xff]   ;;  %v9169_v20 = vld [vmem:[%s11721_s0 + $0x728] sm:$0xff]  }
  0x23   :  { %8041 = vmatprep.mubr.msk.bf16.mxu0 %vm1843_vm0, %v9086_v15  ;;  %8421 = vmatprep.mubr.msk.bf16.mxu1 %vm1843_vm0, %v9108_v21  ;;  %v9146_v15 = vld [vmem:[%s11721_s0 + $0x140] sm:$0xff]   ;;  %v9172_v21 = vld [vmem:[%s11721_s0 + $0x730] sm:$0xff]  }
  0x2a   :  { %8042 = vmatmul.mubr.msk.bf16.gmra.mrb[16].mxu0 %vm1843_vm0, %v9087_v18  ;;  %8422 = vmatmul.mubr.msk.bf16.gmra.mrb[16].mxu1 %vm1843_vm0, %v9109_v24  ;;  %v9147_v18 = vld [vmem:[%s11721_s0 + $0x148] sm:$0xff]   ;;  %v9173_v24 = vld [vmem:[%s11721_s0 + $0x738] sm:$0xff]  }
  0x2b   :  { %8045 = vmatprep.mubr.msk.bf16.mxu0 %vm1843_vm0, %v9088_v19  ;;  %8425 = vmatprep.mubr.msk.bf16.mxu1 %vm1843_vm0, %v9112_v25  ;;  %v9150_v19 = vld [vmem:[%s11721_s0 + $0x150] sm:$0xff]   ;;  %v9176_v25 = vld [vmem:[%s11721_s0 + $0x740] sm:$0xff]  }
  0x32   :  { %8046 = vmatmul.mubr.msk.bf16.gmra.mrb[20].mxu0 %vm1843_vm0, %v9089_v22  ;;  %8426 = vmatmul.mubr.msk.bf16.gmra.mrb[20].mxu1 %vm1843_vm0, %v9113_v28  ;;  %v9151_v22 = vld [vmem:[%s11721_s0 + $0x158] sm:$0xff]   ;;  %v9177_v28 = vld [vmem:[%s11721_s0 + $0x748] sm:$0xff]  }
  0x33   :  { %8049 = vmatprep.mubr.msk.bf16.mxu0 %vm1843_vm0, %v9090_v23  ;;  %8429 = vmatprep.mubr.msk.bf16.mxu1 %vm1843_vm0, %v9116_v29  ;;  %v9154_v23 = vld [vmem:[%s11721_s0 + $0x160] sm:$0xff]   ;;  %v9180_v29 = vld [vmem:[%s11721_s0 + $0x750] sm:$0xff]  }
  0x3a   :  { %8050 = vmatmul.mubr.msk.bf16.gmra.mrb[24].mxu0 %vm1843_vm0, %v9091_v26  ;;  %8430 = vmatmul.mubr.msk.bf16.gmra.mrb[24].mxu1 %vm1843_vm0, %v9117_v32  ;;  %v9155_v26 = vld [vmem:[%s11721_s0 + $0x168] sm:$0xff]   ;;  %v9181_v32 = vld [vmem:[%s11721_s0 + $0x758] sm:$0xff]  }
  0x3b   :  { %8053 = vmatprep.mubr.msk.bf16.mxu0 %vm1843_vm0, %v9094_v27  ;;  %8433 = vmatprep.mubr.msk.bf16.mxu1 %vm1843_vm0, %v9120_v33  ;;  %v9158_v27 = vld [vmem:[%s11721_s0 + $0x170] sm:$0xff]   ;;  %v9184_v33 = vld [vmem:[%s11721_s0 + $0x760] sm:$0xff]  }
  0x42   :  { %8054 = vmatmul.mubr.msk.bf16.gmra.mrb[28].mxu0 %vm1843_vm0, %v9095_v30  ;;  %8434 = vmatmul.mubr.msk.bf16.gmra.mrb[28].mxu1 %vm1843_vm0, %v9121_v36  ;;  %v9159_v30 = vld [vmem:[%s11721_s0 + $0x178] sm:$0xff]   ;;  %v9185_v36 = vld [vmem:[%s11721_s0 + $0x768] sm:$0xff]  }
  0x43   :  { %8057 = vmatprep.mubr.msk.bf16.mxu0 %vm1843_vm0, %v9098_v31  ;;  %8437 = vmatprep.mubr.msk.bf16.mxu1 %vm1843_vm0, %v9124_v37  ;;  %v9162_v31 = vld [vmem:[%s11721_s0 + $0x180] sm:$0xff]   ;;  %v9188_v37 = vld [vmem:[%s11721_s0 + $0x770] sm:$0xff]  }
  0x4a   :  { %8058 = vmatmul.mubr.msk.bf16.gmra.mrb[32].mxu0 %vm1843_vm0, %v9099_v34  ;;  %8438 = vmatmul.mubr.msk.bf16.gmra.mrb[32].mxu1 %vm1843_vm0, %v9125_v40  ;;  %v9163_v34 = vld [vmem:[%s11721_s0 + $0x188] sm:$0xff]   ;;  %v9189_v40 = vld [vmem:[%s11721_s0 + $0x778] sm:$0xff]  }
  0x4b   :  { %8061 = vmatprep.mubr.msk.bf16.mxu0 %vm1843_vm0, %v9102_v35  ;;  %8441 = vmatprep.mubr.msk.bf16.mxu1 %vm1843_vm0, %v9128_v41  ;;  %v9166_v35 = vld [vmem:[%s11721_s0 + $0x190] sm:$0xff]   ;;  %v9192_v41 = vld [vmem:[%s11721_s0 + $0x780] sm:$0xff]  }
  0x52   :  { %8062 = vmatmul.mubr.msk.bf16.gmra.mrb[36].mxu0 %vm1843_vm0, %v9103_v38  ;;  %8442 = vmatmul.mubr.msk.bf16.gmra.mrb[36].mxu1 %vm1843_vm0, %v9129_v44  ;;  %v9167_v38 = vld [vmem:[%s11721_s0 + $0x198] sm:$0xff]   ;;  %v9193_v44 = vld [vmem:[%s11721_s0 + $0x788] sm:$0xff]  }
  0x53   :  { %8065 = vmatprep.mubr.msk.bf16.mxu0 %vm1843_vm0, %v9106_v39  ;;  %8445 = vmatprep.mubr.msk.bf16.mxu1 %vm1843_vm0, %v9132_v45  ;;  %v9170_v39 = vld [vmem:[%s11721_s0 + $0x1a0] sm:$0xff]   ;;  %v9196_v45 = vld [vmem:[%s11721_s0 + $0x790] sm:$0xff]  }
  0x5a   :  { %8066 = vmatmul.mubr.msk.bf16.gmra.mrb[40].mxu0 %vm1843_vm0, %v9107_v42  ;;  %8446 = vmatmul.mubr.msk.bf16.gmra.mrb[40].mxu1 %vm1843_vm0, %v9133_v48  ;;  %v9171_v42 = vld [vmem:[%s11721_s0 + $0x1a8] sm:$0xff]   ;;  %v9175_v48 = vld [vmem:[%s11721_s0 + $0x1b8] sm:$0xff]  }
  0x5b   :  { %8069 = vmatprep.mubr.msk.bf16.mxu0 %vm1843_vm0, %v9110_v43  ;;  %8449 = vmatprep.mubr.msk.bf16.mxu1 %vm1843_vm0, %v9136_v49  ;;  %v9174_v43 = vld [vmem:[%s11721_s0 + $0x1b0] sm:$0xff]  }
  0x62   :  { %8070 = vmatmul.mubr.msk.bf16.gmra.mrb[44].mxu0 %vm1843_vm0, %v9111_v46  ;;  %8450 = vmatmul.mubr.msk.bf16.gmra.mrb[44].mxu1 %vm1843_vm0, %v9137_v52  ;;  %v9849_v46 = vld [vmem:[%s11724_s3] ss:$0 sm:$0xff] }
  0x63   :  { %8073 = vmatprep.mubr.msk.bf16.mxu0 %vm1843_vm0, %v9114_v47  ;;  %8453 = vmatprep.mubr.msk.bf16.mxu1 %vm1843_vm0, %v9140_v53 }
  0x6a   :  { %8074 = vmatmul.mubr.msk.bf16.gmra.mrb[48].mxu0 %vm1843_vm0, %v9115_v50  ;;  %8454 = vmatmul.mubr.msk.bf16.gmra.mrb[48].mxu1 %vm1843_vm0, %v9141_v56 }
  0x6b   :  { %8077 = vmatprep.mubr.msk.bf16.mxu0 %vm1843_vm0, %v9118_v51  ;;  %8457 = vmatprep.mubr.msk.bf16.mxu1 %vm1843_vm0, %v9144_v57  ;;  %v9178_v51 = vld [vmem:[%s11721_s0 + $0x1c0] sm:$0xff]  }
  0x6c   :  { %v9200_v57 = vld [vmem:[%s11721_s0 + $0x7a0] sm:$0xff]  }
  0x72   :  { %8078 = vmatmul.mubr.msk.bf16.gmra.mrb[52].mxu0 %vm1843_vm0, %v9119_v54  ;;  %8458 = vmatmul.mubr.msk.bf16.gmra.mrb[52].mxu1 %vm1843_vm0, %v9145_v60  ;;  %v9197_v54 = vld [vmem:[%s11721_s0 + $0x798] sm:$0xff]  }
  0x73   :  { %8081 = vmatprep.mubr.msk.bf16.mxu0 %vm1843_vm0, %v9122_v55  ;;  %8461 = vmatprep.mubr.msk.bf16.mxu1 %vm1843_vm0, %v9148_v61 }
  0x7a   :  { %8082 = vmatmul.mubr.msk.bf16.gmra.mrb[56].mxu0 %vm1843_vm0, %v9123_v58  ;;  %8462 = vmatmul.mubr.msk.bf16.gmra.mrb[56].mxu1 %vm1843_vm0, %v9149_v0 }
  0x7b   :  { %8085 = vmatprep.mubr.msk.bf16.mxu0 %vm1843_vm0, %v9126_v59  ;;  %8465 = vmatprep.mubr.msk.bf16.mxu1 %vm1843_vm0, %v9152_v1 }
  0x82   :  { %8086 = vmatmul.mubr.msk.bf16.gmra.mrb[60].mxu0 %vm1843_vm0, %v9127_v62  ;;  %8466 = vmatmul.mubr.msk.bf16.gmra.mrb[60].mxu1 %vm1843_vm0, %v9153_v4 }
  0x83   :  { %8089 = vmatprep.mubr.msk.bf16.mxu0 %vm1843_vm0, %v9130_v63  ;;  %8469 = vmatprep.mubr.msk.bf16.mxu1 %vm1843_vm0, %v9156_v5 }
  0x8a   :  { %8090 = vmatmul.mubr.msk.bf16.gmra.mrb[64].mxu0 %vm1843_vm0, %v9131_v2  ;;  %8470 = vmatmul.mubr.msk.bf16.gmra.mrb[64].mxu1 %vm1843_vm0, %v9157_v8 }
  0x8b   :  { %8093 = vmatprep.mubr.msk.bf16.mxu0 %vm1843_vm0, %v9134_v3  ;;  %8473 = vmatprep.mubr.msk.bf16.mxu1 %vm1843_vm0, %v9160_v9 }
  0x92   :  { %8094 = vmatmul.mubr.msk.bf16.gmra.mrb[68].mxu0 %vm1843_vm0, %v9135_v6  ;;  %8474 = vmatmul.mubr.msk.bf16.gmra.mrb[68].mxu1 %vm1843_vm0, %v9161_v12 }
  0x93   :  { %8097 = vmatprep.mubr.msk.bf16.mxu0 %vm1843_vm0, %v9138_v7  ;;  %8477 = vmatprep.mubr.msk.bf16.mxu1 %vm1843_vm0, %v9164_v13 }
  0x9a   :  { %8098 = vmatmul.mubr.msk.bf16.gmra.mrb[72].mxu0 %vm1843_vm0, %v9139_v10  ;;  %8478 = vmatmul.mubr.msk.bf16.gmra.mrb[72].mxu1 %vm1843_vm0, %v9165_v16 }
  0x9b   :  { %8101 = vmatprep.mubr.msk.bf16.mxu0 %vm1843_vm0, %v9142_v11  ;;  %8481 = vmatprep.mubr.msk.bf16.mxu1 %vm1843_vm0, %v9168_v17 }
  0xa2   :  { %8102 = vmatmul.mubr.msk.bf16.gmra.mrb[76].mxu0 %vm1843_vm0, %v9143_v14  ;;  %8482 = vmatmul.mubr.msk.bf16.gmra.mrb[76].mxu1 %vm1843_vm0, %v9169_v20 }
  0xa3   :  { %8105 = vmatprep.mubr.msk.bf16.mxu0 %vm1843_vm0, %v9146_v15  ;;  %8485 = vmatprep.mubr.msk.bf16.mxu1 %vm1843_vm0, %v9172_v21 }
  0xaa   :  { %8106 = vmatmul.mubr.msk.bf16.gmra.mrb[80].mxu0 %vm1843_vm0, %v9147_v18  ;;  %8486 = vmatmul.mubr.msk.bf16.gmra.mrb[80].mxu1 %vm1843_vm0, %v9173_v24 }
  0xab   :  { %8109 = vmatprep.mubr.msk.bf16.mxu0 %vm1843_vm0, %v9150_v19  ;;  %8489 = vmatprep.mubr.msk.bf16.mxu1 %vm1843_vm0, %v9176_v25 }
  0xb2   :  { %8110 = vmatmul.mubr.msk.bf16.gmra.mrb[84].mxu0 %vm1843_vm0, %v9151_v22  ;;  %8490 = vmatmul.mubr.msk.bf16.gmra.mrb[84].mxu1 %vm1843_vm0, %v9177_v28 }
  0xb3   :  { %8113 = vmatprep.mubr.msk.bf16.mxu0 %vm1843_vm0, %v9154_v23  ;;  %8493 = vmatprep.mubr.msk.bf16.mxu1 %vm1843_vm0, %v9180_v29 }
  0xba   :  { %8114 = vmatmul.mubr.msk.bf16.gmra.mrb[88].mxu0 %vm1843_vm0, %v9155_v26  ;;  %8494 = vmatmul.mubr.msk.bf16.gmra.mrb[88].mxu1 %vm1843_vm0, %v9181_v32 }
  0xbb   :  { %8117 = vmatprep.mubr.msk.bf16.mxu0 %vm1843_vm0, %v9158_v27  ;;  %8497 = vmatprep.mubr.msk.bf16.mxu1 %vm1843_vm0, %v9184_v33 }
  0xc2   :  { %8118 = vmatmul.mubr.msk.bf16.gmra.mrb[92].mxu0 %vm1843_vm0, %v9159_v30  ;;  %8498 = vmatmul.mubr.msk.bf16.gmra.mrb[92].mxu1 %vm1843_vm0, %v9185_v36 }
  0xc3   :  { %8121 = vmatprep.mubr.msk.bf16.mxu0 %vm1843_vm0, %v9162_v31  ;;  %8501 = vmatprep.mubr.msk.bf16.mxu1 %vm1843_vm0, %v9188_v37 }
  0xca   :  { %8122 = vmatmul.mubr.msk.bf16.gmra.mrb[96].mxu0 %vm1843_vm0, %v9163_v34  ;;  %8502 = vmatmul.mubr.msk.bf16.gmra.mrb[96].mxu1 %vm1843_vm0, %v9189_v40 }
  0xcb   :  { %8125 = vmatprep.mubr.msk.bf16.mxu0 %vm1843_vm0, %v9166_v35  ;;  %8505 = vmatprep.mubr.msk.bf16.mxu1 %vm1843_vm0, %v9192_v41 }
  0xd2   :  { %8126 = vmatmul.mubr.msk.bf16.gmra.mrb[100].mxu0 %vm1843_vm0, %v9167_v38  ;;  %8506 = vmatmul.mubr.msk.bf16.gmra.mrb[100].mxu1 %vm1843_vm0, %v9193_v44 }
  0xd3   :  { %8129 = vmatprep.mubr.msk.bf16.mxu0 %vm1843_vm0, %v9170_v39  ;;  %8509 = vmatprep.mubr.msk.bf16.mxu1 %vm1843_vm0, %v9196_v45 }
  0xda   :  { %8130 = vmatmul.mubr.msk.bf16.gmra.mrb[104].mxu0 %vm1843_vm0, %v9171_v42 }
  0xdb   :  { %8133 = vmatprep.mubr.msk.bf16.mxu0 %vm1843_vm0, %v9174_v43 }
  0xdd   :  { %v8027_v47 = vpop.f32.mrb[0].mxu0 }
  0xde   :  { %v2655_v49 = vadd.f32 %v8027_v47, %v9849_v46  ;;  %v2646_v50 = vpop.f32.mrb[1].mxu0 }
  0xdf   :  { %v2647_v52 = vadd.f32 %v9849_v46, %v2646_v50  ;;  %v8028_v53 = vpop.f32.mrb[2].mxu0 }
  0xe0   :  { %v2658_v55 = vadd.f32 %v8028_v53, %v9849_v46  ;;  %v2649_v56 = vpop.f32.mrb[3].mxu0  ;;  %v4695_v59 = vmax.f32 %v2655_v49, 0.0 }
  0xe1   :  { %v2650_v58 = vadd.f32 %v9849_v46, %v2649_v56 }
  0xe2   :  { %v4696_v60 = vmax.f32 %v2658_v55, 0.0  ;;  %8134 = vmatmul.mubr.msk.bf16.gmra.mrb[108].mxu0 %vm1843_vm0, %v9175_v48 }
  0xe3   :  { %12 = vsyncpa [#allocation3], 0  ;;  %v4693_v61 = vmax.f32 %v2647_v52, 0.0  ;;  %v4694_v62 = vmax.f32 %v2650_v58, 0.0  ;;  %8137 = vmatprep.mubr.msk.bf16.mxu0 %vm1843_vm0, %v9178_v51  ;;  %8510 = vmatmul.mubr.msk.bf16.gmra.mrb[104].mxu1 %vm1843_vm0, %v9197_v54  ;;  %v9179_v4 = vld [vmem:[%s11721_s0 + $0x1c8] sm:$0xff]   ;;  %v9182_v7 = vld [vmem:[%s11721_s0 + $0x1d0] sm:$0xff]  }
  0xe4   :  { %v9874_v63 = vpack.c.bf16 %v4696_v60, %v4695_v59  ;;  %8513 = vmatprep.mubr.msk.bf16.mxu1 %vm1843_vm0, %v9200_v57  ;;  %v9201_v8 = vld [vmem:[%s11721_s0 + $0x7a8] sm:$0xff]   ;;  %v9204_v11 = vld [vmem:[%s11721_s0 + $0x7b0] sm:$0xff]   ;;  %v9183_v22 = vld [vmem:[%s11721_s0 + $0x1d8] sm:$0xff]   ;;  %vm6600_vm3 = vcmask 130048   ;;  %vm6597_vm4 = vcmask 0   ;;  %s9371_s12 = smov [#allocation2]  }
  0xe5   :  { %v9877_v0 = vpack.c.bf16 %v4694_v62, %v4693_v61  ;;  %v8031_v1 = vpop.f32.mrb[4].mxu0  ;;  %v9186_v25 = vld [vmem:[%s11721_s0 + $0x1e0] sm:$0xff]   ;;  %v9205_v26 = vld [vmem:[%s11721_s0 + $0x7b8] sm:$0xff]   ;;  %v9187_v40 = vld [vmem:[%s11721_s0 + $0x1e8] sm:$0xff]   ;;  %s6623_s13 = sshll.u32 %s9371_s12, 4  ;;  %s6624_s13 = int_to_ptr.vmem [resolvable:$true] %s6623_s13 }
  0xe6   :  { %v2671_v2 = vadd.f32 %v8031_v1, %v9849_v46  ;;  %v2662_v3 = vpop.f32.mrb[5].mxu0  ;;  %v9208_v29 = vld [vmem:[%s11721_s0 + $0x7c0] sm:$0xff]   ;;  %v9190_v43 = vld [vmem:[%s11721_s0 + $0x1f0] sm:$0xff]   ;;  %v9209_v44 = vld [vmem:[%s11721_s0 + $0x7c8] sm:$0xff]   ;;  %s9350_s14 = scalar_lea.vmem %s6624_s13, 32  ;;  %p9351_p1 = scmp.lt.s32.totalorder %s6624_s13, %s6624_s13 }
  0xe7   :  { %v2663_v5 = vadd.f32 %v9849_v46, %v2662_v3  ;;  %v8032_v6 = vpop.f32.mrb[6].mxu0  ;;  %v9212_v48 = vld [vmem:[%s11721_s0 + $0x7d0] sm:$0xff]   ;;  %v9191_v59 = vld [vmem:[%s11721_s0 + $0x1f8] sm:$0xff]   ;;  %v9194_v62 = vld [vmem:[%s11721_s0 + $0x200] sm:$0xff]  }
  0xe8   :  { %v2674_v9 = vadd.f32 %v8032_v6, %v9849_v46  ;;  %v2665_v10 = vpop.f32.mrb[7].mxu0  ;;  %v4699_v13 = vmax.f32 %v2671_v2, 0.0  ;;  %v9213_v1 = vld [vmem:[%s11721_s0 + $0x7d8] sm:$0xff]  }
  0xe9   :  { %v2666_v12 = vadd.f32 %v9849_v46, %v2665_v10  ;;  %v4697_v15 = vmax.f32 %v2663_v5, 0.0 }
  0xea   :  { %v4700_v14 = vmax.f32 %v2674_v9, 0.0  ;;  %8138 = vmatmul.mubr.msk.bf16.gmra.mrb[112].mxu0 %vm1843_vm0, %v9179_v4  ;;  %v9216_v4 = vld [vmem:[%s11721_s0 + $0x7e0] sm:$0xff]  }
  0xeb   :  { %v4698_v16 = vmax.f32 %v2666_v12, 0.0  ;;  %8141 = vmatprep.mubr.msk.bf16.mxu0 %vm1843_vm0, %v9182_v7  ;;  %8514 = vmatmul.mubr.msk.bf16.gmra.mrb[108].mxu1 %vm1843_vm0, %v9201_v8 }
  0xec   :  { %v9898_v17 = vpack.c.bf16 %v4700_v14, %v4699_v13  ;;  %8517 = vmatprep.mubr.msk.bf16.mxu1 %vm1843_vm0, %v9204_v11 }
  0xed   :  { %v9901_v18 = vpack.c.bf16 %v4698_v16, %v4697_v15  ;;  %v8035_v19 = vpop.f32.mrb[8].mxu0  ;;  %v9195_v15 = vld [vmem:[%s11721_s0 + $0x208] sm:$0xff]  }
  0xee   :  { %v2687_v20 = vadd.f32 %v8035_v19, %v9849_v46  ;;  %v2678_v21 = vpop.f32.mrb[9].mxu0 }
  0xef   :  { %v2679_v23 = vadd.f32 %v9849_v46, %v2678_v21  ;;  %v8036_v24 = vpop.f32.mrb[10].mxu0  ;;  %v9217_v21 = vld [vmem:[%s11721_s0 + $0x7e8] sm:$0xff]  }
  0xf0   :  { %v2690_v27 = vadd.f32 %v8036_v24, %v9849_v46  ;;  %v2681_v28 = vpop.f32.mrb[11].mxu0  ;;  %v4703_v31 = vmax.f32 %v2687_v20, 0.0  ;;  %v9198_v20 = vld [vmem:[%s11721_s0 + $0x210] sm:$0xff]  }
  0xf1   :  { %v2682_v30 = vadd.f32 %v9849_v46, %v2681_v28  ;;  %v4701_v33 = vmax.f32 %v2679_v23, 0.0  ;;  %v9220_v24 = vld [vmem:[%s11721_s0 + $0x7f0] sm:$0xff]  }
  0xf2   :  { %v4704_v32 = vmax.f32 %v2690_v27, 0.0  ;;  %8142 = vmatmul.mubr.msk.bf16.gmra.mrb[116].mxu0 %vm1843_vm0, %v9183_v22 }
  0xf3   :  { %v4702_v34 = vmax.f32 %v2682_v30, 0.0  ;;  %8145 = vmatprep.mubr.msk.bf16.mxu0 %vm1843_vm0, %v9186_v25  ;;  %8518 = vmatmul.mubr.msk.bf16.gmra.mrb[112].mxu1 %vm1843_vm0, %v9205_v26 }
  0xf4   :  { %v9922_v35 = vpack.c.bf16 %v4704_v32, %v4703_v31  ;;  %8521 = vmatprep.mubr.msk.bf16.mxu1 %vm1843_vm0, %v9208_v29 }
  0xf5   :  { %v9925_v36 = vpack.c.bf16 %v4702_v34, %v4701_v33  ;;  %v8039_v37 = vpop.f32.mrb[12].mxu0  ;;  %v9199_v34 = vld [vmem:[%s11721_s0 + $0x218] sm:$0xff]  }
  0xf6   :  { %v2703_v38 = vadd.f32 %v8039_v37, %v9849_v46  ;;  %v2694_v39 = vpop.f32.mrb[13].mxu0 }
  0xf7   :  { %v2695_v41 = vadd.f32 %v9849_v46, %v2694_v39  ;;  %v8040_v42 = vpop.f32.mrb[14].mxu0  ;;  %v9221_v39 = vld [vmem:[%s11721_s0 + $0x7f8] sm:$0xff]  }
  0xf8   :  { %v2706_v45 = vadd.f32 %v8040_v42, %v9849_v46  ;;  %v2697_v47 = vpop.f32.mrb[15].mxu0  ;;  %v4707_v50 = vmax.f32 %v2703_v38, 0.0 }
  0xf9   :  { %v2698_v49 = vadd.f32 %v9849_v46, %v2697_v47  ;;  %v4705_v52 = vmax.f32 %v2695_v41, 0.0 }
  0xfa   :  { %v4708_v51 = vmax.f32 %v2706_v45, 0.0  ;;  %8146 = vmatmul.mubr.msk.bf16.gmra.mrb[120].mxu0 %vm1843_vm0, %v9187_v40 }
  0xfb   :  { %v4706_v53 = vmax.f32 %v2698_v49, 0.0  ;;  %8149 = vmatprep.mubr.msk.bf16.mxu0 %vm1843_vm0, %v9190_v43  ;;  %8522 = vmatmul.mubr.msk.bf16.gmra.mrb[116].mxu1 %vm1843_vm0, %v9209_v44  ;;  %v5206_v43 = vld [vmem:[%s11722_s1 + $0x8] sm:$0xff] }
  0xfc   :  { %v9946_v54 = vpack.c.bf16 %v4708_v51, %v4707_v50  ;;  %8525 = vmatprep.mubr.msk.bf16.mxu1 %vm1843_vm0, %v9212_v48 }
  0xfd   :  { %v9949_v55 = vpack.c.bf16 %v4706_v53, %v4705_v52  ;;  %v8043_v56 = vpop.f32.mrb[16].mxu0  ;;  %v9203_v53 = vld [vmem:[%s11721_s0 + $0x228] sm:$0xff]  }
  0xfe   :  { %v2719_v57 = vadd.f32 %v8043_v56, %v9849_v46  ;;  %v2710_v58 = vpop.f32.mrb[17].mxu0 }
  0xff   :  { %v2711_v60 = vadd.f32 %v9849_v46, %v2710_v58  ;;  %v8044_v61 = vpop.f32.mrb[18].mxu0  ;;  %v9206_v58 = vld [vmem:[%s11721_s0 + $0x230] sm:$0xff]  }
 0x100   :  { %v2722_v2 = vadd.f32 %v8044_v61, %v9849_v46  ;;  %v2713_v3 = vpop.f32.mrb[19].mxu0  ;;  %v4711_v6 = vmax.f32 %v2719_v57, 0.0 }
 0x101   :  { %v2714_v5 = vadd.f32 %v9849_v46, %v2713_v3  ;;  %v4709_v8 = vmax.f32 %v2711_v60, 0.0 }
 0x102   :  { %v4712_v7 = vmax.f32 %v2722_v2, 0.0  ;;  %8150 = vmatmul.mubr.msk.bf16.gmra.mrb[124].mxu0 %vm1843_vm0, %v9191_v59 }
 0x103   :  { %v4710_v9 = vmax.f32 %v2714_v5, 0.0  ;;  %8153 = vmatprep.mubr.msk.bf16.mxu0 %vm1843_vm0, %v9194_v62  ;;  %8526 = vmatmul.mubr.msk.bf16.gmra.mrb[120].mxu1 %vm1843_vm0, %v9213_v1 }
 0x104   :  { %v8552_v10 = vpack.c.bf16 %v4712_v7, %v4711_v6  ;;  %8529 = vmatprep.mubr.msk.bf16.mxu1 %vm1843_vm0, %v9216_v4 }
 0x105   :  { %v8047_v11 = vpop.f32.mrb[20].mxu0  ;;  %v8548_v12 = vpack.c.bf16 %v4710_v9, %v4709_v8 }
 0x106   :  { %v2735_v13 = vadd.f32 %v8047_v11, %v9849_v46  ;;  %v2726_v14 = vpop.f32.mrb[21].mxu0 }
 0x107   :  { %v2727_v16 = vadd.f32 %v9849_v46, %v2726_v14  ;;  %v8048_v19 = vpop.f32.mrb[22].mxu0  ;;  %8549 = vmatprep.subr.bf16.mxu1 %v8548_v12 }
 0x108   :  { %v2738_v22 = vadd.f32 %v8048_v19, %v9849_v46  ;;  %v2729_v23 = vpop.f32.mrb[23].mxu0  ;;  %8551 = vmatpush3.bf16.msra.mxu1 %v9877_v0  ;;  %v4715_v26 = vmax.f32 %v2735_v13, 0.0 }
 0x109   :  { %v2730_v25 = vadd.f32 %v9849_v46, %v2729_v23  ;;  %8553 = vmatprep.subr.bf16.mxu1 %v8552_v10  ;;  %v4713_v28 = vmax.f32 %v2727_v16, 0.0  ;;  %v9210_v10 = vld [vmem:[%s11721_s0 + $0x240] sm:$0xff]  }
 0x10a   :  { %v4716_v27 = vmax.f32 %v2738_v22, 0.0  ;;  %8154 = vmatmul.mubr.msk.bf16.gmra.mrb[128].mxu0 %vm1843_vm0, %v9195_v15  ;;  %v5238_v22 = vld [vmem:[%s11722_s1 + $0x108] sm:$0xff] }
 0x10b   :  { %v4714_v29 = vmax.f32 %v2730_v25, 0.0  ;;  %8157 = vmatprep.mubr.msk.bf16.mxu0 %vm1843_vm0, %v9198_v20  ;;  %8530 = vmatmul.mubr.msk.bf16.gmra.mrb[124].mxu1 %vm1843_vm0, %v9217_v21  ;;  %v5205_v20 = vld [vmem:[%s11722_s1] sm:$0xff]  ;;  %v9211_v25 = vld [vmem:[%s11721_s0 + $0x248] sm:$0xff]  }
 0x10c   :  { %8555 = vmatpush3.bf16.msra.mxu1 %v9874_v63  ;;  %v8560_v0 = vpack.c.bf16 %v4716_v27, %v4715_v26  ;;  %8533 = vmatprep.mubr.msk.bf16.mxu1 %vm1843_vm0, %v9220_v24  ;;  %v9202_v63 = vld [vmem:[%s11721_s0 + $0x220] sm:$0xff]   ;;  %v9214_v27 = vld [vmem:[%s11721_s0 + $0x250] sm:$0xff]  }
 0x10d   :  { %v8051_v30 = vpop.f32.mrb[24].mxu0  ;;  %v8556_v31 = vpack.c.bf16 %v4714_v29, %v4713_v28 }
 0x10e   :  { %v2751_v32 = vadd.f32 %v8051_v30, %v9849_v46  ;;  %v2742_v33 = vpop.f32.mrb[25].mxu0 }
 0x10f   :  { %v2743_v37 = vadd.f32 %v9849_v46, %v2742_v33  ;;  %v8052_v38 = vpop.f32.mrb[26].mxu0  ;;  %8557 = vmatprep.subr.bf16.mxu1 %v8556_v31  ;;  %v5208_v31 = vld [vmem:[%s11722_s1 + $0x18] sm:$0xff] }
 0x110   :  { %v2754_v40 = vadd.f32 %v8052_v38, %v9849_v46  ;;  %v2745_v41 = vpop.f32.mrb[27].mxu0  ;;  %8559 = vmatpush3.bf16.msra.mxu1 %v9901_v18  ;;  %v4719_v44 = vmax.f32 %v2751_v32, 0.0 }
 0x111   :  { %v2746_v42 = vadd.f32 %v9849_v46, %v2745_v41  ;;  %8561 = vmatprep.subr.bf16.mxu1 %v8560_v0  ;;  %v4717_v47 = vmax.f32 %v2743_v37, 0.0  ;;  %v5237_v0 = vld [vmem:[%s11722_s1 + $0x100] sm:$0xff] }
 0x112   :  { %v4720_v45 = vmax.f32 %v2754_v40, 0.0  ;;  %8158 = vmatmul.mubr.msk.bf16.gmra.mrb[132].mxu0 %vm1843_vm0, %v9199_v34 }
 0x113   :  { %v4718_v48 = vmax.f32 %v2746_v42, 0.0  ;;  %8161 = vmatprep.mubr.msk.bf16.mxu0 %vm1843_vm0, %v9202_v63  ;;  %8534 = vmatmul.mubr.msk.bf16.gmra.mrb[128].mxu1 %vm1843_vm0, %v9221_v39  ;;  %v9215_v42 = vld [vmem:[%s11721_s0 + $0x258] sm:$0xff]  }
 0x114   :  { %8563 = vmatpush3.bf16.msra.mxu1 %v9898_v17  ;;  %v8568_v18 = vpack.c.bf16 %v4720_v45, %v4719_v44  ;;  %5333 = vmatprep.mubr.f32.mxu1 %v5206_v43  ;;  %v9218_v45 = vld [vmem:[%s11721_s0 + $0x260] sm:$0xff]  }
 0x115   :  { %v8055_v49 = vpop.f32.mrb[28].mxu0  ;;  %v8564_v50 = vpack.c.bf16 %v4718_v48, %v4717_v47 }
 0x116   :  { %v2767_v51 = vadd.f32 %v8055_v49, %v9849_v46  ;;  %v2758_v52 = vpop.f32.mrb[29].mxu0 }
 0x117   :  { %v2759_v56 = vadd.f32 %v9849_v46, %v2758_v52  ;;  %v8056_v57 = vpop.f32.mrb[30].mxu0  ;;  %8565 = vmatprep.subr.bf16.mxu1 %v8564_v50 }
 0x118   :  { %v2770_v17 = vadd.f32 %v8056_v57, %v9849_v46  ;;  %v2761_v59 = vpop.f32.mrb[31].mxu0  ;;  %8567 = vmatpush3.bf16.msra.mxu1 %v9925_v36  ;;  %v4723_v61 = vmax.f32 %v2767_v51, 0.0  ;;  %v9207_v36 = vld [vmem:[%s11721_s0 + $0x238] sm:$0xff]  }
 0x119   :  { %v2762_v60 = vadd.f32 %v9849_v46, %v2761_v59  ;;  %8569 = vmatprep.subr.bf16.mxu1 %v8568_v18  ;;  %v4721_v1 = vmax.f32 %v2759_v56, 0.0  ;;  %v9219_v59 = vld [vmem:[%s11721_s0 + $0x268] sm:$0xff]  }
 0x11a   :  { %v4724_v62 = vmax.f32 %v2770_v17, 0.0  ;;  %8162 = vmatmul.mubr.msk.bf16.gmra.mrb[136].mxu0 %vm1843_vm0, %v9203_v53 }
 0x11b   :  { %v4722_v2 = vmax.f32 %v2762_v60, 0.0  ;;  %8165 = vmatprep.mubr.msk.bf16.mxu0 %vm1843_vm0, %v9206_v58 }
 0x11c   :  { %8571 = vmatpush3.bf16.msra.mxu1 %v9922_v35  ;;  %v8576_v3 = vpack.c.bf16 %v4724_v62, %v4723_v61  ;;  %v9222_v62 = vld [vmem:[%s11721_s0 + $0x270] sm:$0xff]  }
 0x11d   :  { %v8059_v4 = vpop.f32.mrb[32].mxu0  ;;  %v8572_v5 = vpack.c.bf16 %v4722_v2, %v4721_v1 }
 0x11e   :  { %v2783_v6 = vadd.f32 %v8059_v4, %v9849_v46  ;;  %v2774_v7 = vpop.f32.mrb[33].mxu0 }
 0x11f   :  { %v2775_v8 = vadd.f32 %v9849_v46, %v2774_v7  ;;  %v8060_v9 = vpop.f32.mrb[34].mxu0  ;;  %8573 = vmatprep.subr.bf16.mxu1 %v8572_v5 }
 0x120   :  { %v2786_v35 = vadd.f32 %v8060_v9, %v9849_v46  ;;  %v2777_v11 = vpop.f32.mrb[35].mxu0  ;;  %8575 = vmatpush3.bf16.msra.mxu1 %v9949_v55  ;;  %v4727_v13 = vmax.f32 %v2783_v6, 0.0 }
 0x121   :  { %v2778_v12 = vadd.f32 %v9849_v46, %v2777_v11  ;;  %8577 = vmatprep.subr.bf16.mxu1 %v8576_v3  ;;  %v4725_v15 = vmax.f32 %v2775_v8, 0.0  ;;  %v9223_v11 = vld [vmem:[%s11721_s0 + $0x278] sm:$0xff]  }
 0x122   :  { %v4728_v14 = vmax.f32 %v2786_v35, 0.0  ;;  %8166 = vmatmul.mubr.msk.bf16.gmra.mrb[140].mxu0 %vm1843_vm0, %v9207_v36 }
 0x123   :  { %v4726_v16 = vmax.f32 %v2778_v12, 0.0  ;;  %8169 = vmatprep.mubr.msk.bf16.mxu0 %vm1843_vm0, %v9210_v10 }
 0x124   :  { %v10041_v19 = vpack.c.bf16 %v4728_v14, %v4727_v13  ;;  %8579 = vmatpush3.bf16.msra.mxu1 %v9946_v54  ;;  %v9224_v14 = vld [vmem:[%s11721_s0 + $0x280] sm:$0xff]  }
 0x125   :  { %v10047_v55 = vpack.c.bf16 %v4726_v16, %v4725_v15  ;;  %v8063_v21 = vpop.f32.mrb[36].mxu0 }
 0x126   :  { %v2799_v23 = vadd.f32 %v8063_v21, %v9849_v46  ;;  %v2790_v24 = vpop.f32.mrb[37].mxu0 }
 0x127   :  { %v2791_v54 = vadd.f32 %v9849_v46, %v2790_v24  ;;  %v8064_v26 = vpop.f32.mrb[38].mxu0  ;;  %5334 = vmatmul.mubr.f32.vlgmr.msra.gmra.mrb[132].mxu1 %v5205_v20 }
 0x128   :  { %v2802_v28 = vadd.f32 %v8064_v26, %v9849_v46  ;;  %v2793_v29 = vpop.f32.mrb[39].mxu0  ;;  %5338 = vmatprep.mubr.f32.mxu1 %v5238_v22  ;;  %v4731_v32 = vmax.f32 %v2799_v23, 0.0 }
 0x129   :  { %v2794_v30 = vadd.f32 %v9849_v46, %v2793_v29  ;;  %v4729_v34 = vmax.f32 %v2791_v54, 0.0  ;;  %v9225_v29 = vld [vmem:[%s11721_s0 + $0x288] sm:$0xff]  }
 0x12a   :  { %v4732_v33 = vmax.f32 %v2802_v28, 0.0  ;;  %8170 = vmatmul.mubr.msk.bf16.gmra.mrb[144].mxu0 %vm1843_vm0, %v9211_v25 }
 0x12b   :  { %v4730_v37 = vmax.f32 %v2794_v30, 0.0  ;;  %8173 = vmatprep.mubr.msk.bf16.mxu0 %vm1843_vm0, %v9214_v27  ;;  %5339 = vmatmul.mubr.f32.gmra.mrb[134].mxu1 %v5237_v0 }
 0x12c   :  { %v10070_v38 = vpack.c.bf16 %v4732_v33, %v4731_v32  ;;  %5408 = vmatprep.mubr.f32.mxu1 %v5208_v31  ;;  %v9226_v31 = vld [vmem:[%s11721_s0 + $0x290] sm:$0xff]  }
 0x12d   :  { %v10072_v63 = vpack.c.bf16 %v4730_v37, %v4729_v34  ;;  %v8067_v39 = vpop.f32.mrb[40].mxu0 }
 0x12e   :  { %v2815_v40 = vadd.f32 %v8067_v39, %v9849_v46  ;;  %v2806_v41 = vpop.f32.mrb[41].mxu0 }
 0x12f   :  { %v2807_v43 = vadd.f32 %v9849_v46, %v2806_v41  ;;  %v8068_v44 = vpop.f32.mrb[42].mxu0 }
 0x130   :  { %v2818_v47 = vadd.f32 %v8068_v44, %v9849_v46  ;;  %v2809_v48 = vpop.f32.mrb[43].mxu0  ;;  %v4735_v49 = vmax.f32 %v2815_v40, 0.0 }
 0x131   :  { %v2810_v18 = vadd.f32 %v9849_v46, %v2809_v48  ;;  %v4733_v51 = vmax.f32 %v2807_v43, 0.0 }
 0x132   :  { %v4736_v50 = vmax.f32 %v2818_v47, 0.0  ;;  %8174 = vmatmul.mubr.msk.bf16.gmra.mrb[148].mxu0 %vm1843_vm0, %v9215_v42 }
 0x133   :  { %v4734_v52 = vmax.f32 %v2810_v18, 0.0  ;;  %8177 = vmatprep.mubr.msk.bf16.mxu0 %vm1843_vm0, %v9218_v45 }
 0x134   :  { %v10086_v53 = vpack.c.bf16 %v4736_v50, %v4735_v49  ;;  %v9228_v49 = vld [vmem:[%s11721_s0 + $0x2a0] sm:$0xff]  }
 0x135   :  { %v10088_v56 = vpack.c.bf16 %v4734_v52, %v4733_v51  ;;  %v8071_v57 = vpop.f32.mrb[44].mxu0 }
 0x136   :  { %v2831_v58 = vadd.f32 %v8071_v57, %v9849_v46  ;;  %v2822_v17 = vpop.f32.mrb[45].mxu0 }
 0x137   :  { %v2823_v60 = vadd.f32 %v9849_v46, %v2822_v17  ;;  %v8072_v61 = vpop.f32.mrb[46].mxu0 }
 0x138   :  { %v2834_v1 = vadd.f32 %v8072_v61, %v9849_v46  ;;  %v2825_v2 = vpop.f32.mrb[47].mxu0  ;;  %v4739_v4 = vmax.f32 %v2831_v58, 0.0 }
 0x139   :  { %v2826_v3 = vadd.f32 %v9849_v46, %v2825_v2  ;;  %v4737_v6 = vmax.f32 %v2823_v60, 0.0 }
 0x13a   :  { %v4740_v5 = vmax.f32 %v2834_v1, 0.0  ;;  %8178 = vmatmul.mubr.msk.bf16.gmra.mrb[152].mxu0 %vm1843_vm0, %v9219_v59 }
 0x13b   :  { %v4738_v7 = vmax.f32 %v2826_v3, 0.0  ;;  %8181 = vmatprep.mubr.msk.bf16.mxu0 %vm1843_vm0, %v9222_v62 }
 0x13c   :  { %v10102_v36 = vpack.c.bf16 %v4740_v5, %v4739_v4  ;;  %v9230_v4 = vld [vmem:[%s11721_s0 + $0x2b0] sm:$0xff]  }
 0x13d   :  { %v10104_v8 = vpack.c.bf16 %v4738_v7, %v4737_v6  ;;  %v8075_v9 = vpop.f32.mrb[48].mxu0 }
 0x13e   :  { %v2847_v10 = vadd.f32 %v8075_v9, %v9849_v46  ;;  %v2838_v35 = vpop.f32.mrb[49].mxu0 }
 0x13f   :  { %v2839_v12 = vadd.f32 %v9849_v46, %v2838_v35  ;;  %v8076_v13 = vpop.f32.mrb[50].mxu0 }
 0x140   :  { %v2850_v15 = vadd.f32 %v8076_v13, %v9849_v46  ;;  %v2841_v16 = vpop.f32.mrb[51].mxu0  ;;  %v4743_v21 = vmax.f32 %v2847_v10, 0.0 }
 0x141   :  { %v2842_v20 = vadd.f32 %v9849_v46, %v2841_v16  ;;  %v4741_v23 = vmax.f32 %v2839_v12, 0.0 }
 0x142   :  { %v4744_v22 = vmax.f32 %v2850_v15, 0.0  ;;  %8182 = vmatmul.mubr.msk.bf16.gmra.mrb[156].mxu0 %vm1843_vm0, %v9223_v11 }
 0x143   :  { %v4742_v24 = vmax.f32 %v2842_v20, 0.0  ;;  %8185 = vmatprep.mubr.msk.bf16.mxu0 %vm1843_vm0, %v9224_v14 }
 0x144   :  { %v8584_v25 = vpack.c.bf16 %v4744_v22, %v4743_v21  ;;  %v9232_v21 = vld [vmem:[%s11721_s0 + $0x2c0] sm:$0xff]  }
 0x145   :  { %v8079_v54 = vpop.f32.mrb[52].mxu0  ;;  %v8580_v26 = vpack.c.bf16 %v4742_v24, %v4741_v23 }
 0x146   :  { %v2863_v27 = vadd.f32 %v8079_v54, %v9849_v46  ;;  %v2854_v28 = vpop.f32.mrb[53].mxu0 }
 0x147   :  { %v2855_v0 = vadd.f32 %v9849_v46, %v2854_v28  ;;  %v8080_v30 = vpop.f32.mrb[54].mxu0  ;;  %8581 = vmatprep.subr.bf16.mxu1 %v8580_v26  ;;  %v5207_v28 = vld [vmem:[%s11722_s1 + $0x10] sm:$0xff] }
 0x148   :  { %v2866_v32 = vadd.f32 %v8080_v30, %v9849_v46  ;;  %v2857_v33 = vpop.f32.mrb[55].mxu0  ;;  %8583 = vmatpush3.bf16.msra.mxu1 %v10047_v55  ;;  %v4747_v37 = vmax.f32 %v2863_v27, 0.0  ;;  %v9227_v55 = vld [vmem:[%s11721_s0 + $0x298] sm:$0xff]  }
 0x149   :  { %v2858_v34 = vadd.f32 %v9849_v46, %v2857_v33  ;;  %8585 = vmatprep.subr.bf16.mxu1 %v8584_v25  ;;  %v4745_v40 = vmax.f32 %v2855_v0, 0.0  ;;  %v5240_v0 = vld [vmem:[%s11722_s1 + $0x118] sm:$0xff] }
 0x14a   :  { %v4748_v39 = vmax.f32 %v2866_v32, 0.0  ;;  %8186 = vmatmul.mubr.msk.bf16.gmra.mrb[160].mxu0 %vm1843_vm0, %v9225_v29  ;;  %v9233_v32 = vld [vmem:[%s11721_s0 + $0x2c8] sm:$0xff]  }
 0x14b   :  { %v4746_v41 = vmax.f32 %v2858_v34, 0.0  ;;  %8189 = vmatprep.mubr.msk.bf16.mxu0 %vm1843_vm0, %v9226_v31  ;;  %v9234_v34 = vld [vmem:[%s11721_s0 + $0x2d0] sm:$0xff]  }
 0x14c   :  { %8587 = vmatpush3.bf16.msra.mxu1 %v10041_v19  ;;  %v8592_v42 = vpack.c.bf16 %v4748_v39, %v4747_v37 }
 0x14d   :  { %v8083_v43 = vpop.f32.mrb[56].mxu0  ;;  %v8588_v44 = vpack.c.bf16 %v4746_v41, %v4745_v40  ;;  %v5239_v40 = vld [vmem:[%s11722_s1 + $0x110] sm:$0xff] }
 0x14e   :  { %v2879_v45 = vadd.f32 %v8083_v43, %v9849_v46  ;;  %v2870_v47 = vpop.f32.mrb[57].mxu0 }
 0x14f   :  { %v2871_v48 = vadd.f32 %v9849_v46, %v2870_v47  ;;  %v8084_v18 = vpop.f32.mrb[58].mxu0  ;;  %8589 = vmatprep.subr.bf16.mxu1 %v8588_v44 }
 0x150   :  { %v2882_v19 = vadd.f32 %v8084_v18, %v9849_v46  ;;  %v2873_v50 = vpop.f32.mrb[59].mxu0  ;;  %8591 = vmatpush3.bf16.msra.mxu1 %v10072_v63  ;;  %v4751_v52 = vmax.f32 %v2879_v45, 0.0  ;;  %v9229_v63 = vld [vmem:[%s11721_s0 + $0x2a8] sm:$0xff]  }
 0x151   :  { %v2874_v51 = vadd.f32 %v9849_v46, %v2873_v50  ;;  %8593 = vmatprep.subr.bf16.mxu1 %v8592_v42  ;;  %v4749_v58 = vmax.f32 %v2871_v48, 0.0  ;;  %v5210_v42 = vld [vmem:[%s11722_s1 + $0x28] sm:$0xff]  ;;  %v9235_v50 = vld [vmem:[%s11721_s0 + $0x2d8] sm:$0xff]  }
 0x152   :  { %v4752_v57 = vmax.f32 %v2882_v19, 0.0  ;;  %8190 = vmatmul.mubr.msk.bf16.gmra.mrb[164].mxu0 %vm1843_vm0, %v9227_v55 }
 0x153   :  { %v4750_v17 = vmax.f32 %v2874_v51, 0.0  ;;  %8193 = vmatprep.mubr.msk.bf16.mxu0 %vm1843_vm0, %v9228_v49 }
 0x154   :  { %8595 = vmatpush3.bf16.msra.mxu1 %v10070_v38  ;;  %v8600_v59 = vpack.c.bf16 %v4752_v57, %v4751_v52  ;;  %v9236_v57 = vld [vmem:[%s11721_s0 + $0x2e0] sm:$0xff]  }
 0x155   :  { %v8087_v60 = vpop.f32.mrb[60].mxu0  ;;  %v8596_v61 = vpack.c.bf16 %v4750_v17, %v4749_v58 }
 0x156   :  { %v2895_v62 = vadd.f32 %v8087_v60, %v9849_v46  ;;  %v2886_v1 = vpop.f32.mrb[61].mxu0 }
 0x157   :  { %v2887_v2 = vadd.f32 %v9849_v46, %v2886_v1  ;;  %v8088_v3 = vpop.f32.mrb[62].mxu0  ;;  %8597 = vmatprep.subr.bf16.mxu1 %v8596_v61 }
 0x158   :  { %v2898_v38 = vadd.f32 %v8088_v3, %v9849_v46  ;;  %v2889_v5 = vpop.f32.mrb[63].mxu0  ;;  %8599 = vmatpush3.bf16.msra.mxu1 %v10088_v56  ;;  %v4755_v7 = vmax.f32 %v2895_v62, 0.0  ;;  %v9231_v56 = vld [vmem:[%s11721_s0 + $0x2b8] sm:$0xff]  }
 0x159   :  { %v2890_v6 = vadd.f32 %v9849_v46, %v2889_v5  ;;  %8601 = vmatprep.subr.bf16.mxu1 %v8600_v59  ;;  %v4753_v10 = vmax.f32 %v2887_v2, 0.0  ;;  %v9237_v5 = vld [vmem:[%s11721_s0 + $0x2e8] sm:$0xff]  }
 0x15a   :  { %v4756_v9 = vmax.f32 %v2898_v38, 0.0  ;;  %8194 = vmatmul.mubr.msk.bf16.gmra.mrb[168].mxu0 %vm1843_vm0, %v9229_v63 }
 0x15b   :  { %v4754_v35 = vmax.f32 %v2890_v6, 0.0  ;;  %8197 = vmatprep.mubr.msk.bf16.mxu0 %vm1843_vm0, %v9230_v4 }
 0x15c   :  { %8603 = vmatpush3.bf16.msra.mxu1 %v10086_v53  ;;  %v8608_v11 = vpack.c.bf16 %v4756_v9, %v4755_v7  ;;  %v9238_v9 = vld [vmem:[%s11721_s0 + $0x2f0] sm:$0xff]  }
 0x15d   :  { %v8091_v12 = vpop.f32.mrb[64].mxu0  ;;  %v8604_v13 = vpack.c.bf16 %v4754_v35, %v4753_v10 }
 0x15e   :  { %v2911_v14 = vadd.f32 %v8091_v12, %v9849_v46  ;;  %v2902_v15 = vpop.f32.mrb[65].mxu0 }
 0x15f   :  { %v2903_v16 = vadd.f32 %v9849_v46, %v2902_v15  ;;  %v8092_v20 = vpop.f32.mrb[66].mxu0  ;;  %8605 = vmatprep.subr.bf16.mxu1 %v8604_v13 }
 0x160   :  { %v2914_v53 = vadd.f32 %v8092_v20, %v9849_v46  ;;  %v2905_v22 = vpop.f32.mrb[67].mxu0  ;;  %8607 = vmatpush3.bf16.msra.mxu1 %v10104_v8  ;;  %v4759_v24 = vmax.f32 %v2911_v14, 0.0 }
 0x161   :  { %v2906_v23 = vadd.f32 %v9849_v46, %v2905_v22  ;;  %8609 = vmatprep.subr.bf16.mxu1 %v8608_v11  ;;  %v4757_v54 = vmax.f32 %v2903_v16, 0.0  ;;  %v9239_v22 = vld [vmem:[%s11721_s0 + $0x2f8] sm:$0xff]  }
 0x162   :  { %v4760_v25 = vmax.f32 %v2914_v53, 0.0  ;;  %8198 = vmatmul.mubr.msk.bf16.gmra.mrb[172].mxu0 %vm1843_vm0, %v9231_v56 }
 0x163   :  { %v4758_v26 = vmax.f32 %v2906_v23, 0.0  ;;  %8201 = vmatprep.mubr.msk.bf16.mxu0 %vm1843_vm0, %v9232_v21 }
 0x164   :  { %v10173_v27 = vpack.c.bf16 %v4760_v25, %v4759_v24  ;;  %8611 = vmatpush3.bf16.msra.mxu1 %v10102_v36  ;;  %v9240_v25 = vld [vmem:[%s11721_s0 + $0x300] sm:$0xff]  }
 0x165   :  { %v10179_v8 = vpack.c.bf16 %v4758_v26, %v4757_v54  ;;  %v8095_v29 = vpop.f32.mrb[68].mxu0 }
 0x166   :  { %v2927_v30 = vadd.f32 %v8095_v29, %v9849_v46  ;;  %v2918_v31 = vpop.f32.mrb[69].mxu0 }
 0x167   :  { %v2919_v36 = vadd.f32 %v9849_v46, %v2918_v31  ;;  %v8096_v33 = vpop.f32.mrb[70].mxu0  ;;  %5409 = vmatmul.mubr.f32.vlgmr.msra.gmra.mrb[136].mxu1 %v5207_v28 }
 0x168   :  { %v2930_v37 = vadd.f32 %v8096_v33, %v9849_v46  ;;  %v2921_v39 = vpop.f32.mrb[71].mxu0  ;;  %5413 = vmatprep.mubr.f32.mxu1 %v5240_v0  ;;  %v4763_v43 = vmax.f32 %v2927_v30, 0.0 }
 0x169   :  { %v2922_v41 = vadd.f32 %v9849_v46, %v2921_v39  ;;  %v4761_v45 = vmax.f32 %v2919_v36, 0.0  ;;  %v9241_v39 = vld [vmem:[%s11721_s0 + $0x308] sm:$0xff]  }
 0x16a   :  { %v4764_v44 = vmax.f32 %v2930_v37, 0.0  ;;  %8202 = vmatmul.mubr.msk.bf16.gmra.mrb[176].mxu0 %vm1843_vm0, %v9233_v32 }
 0x16b   :  { %v4762_v47 = vmax.f32 %v2922_v41, 0.0  ;;  %8205 = vmatprep.mubr.msk.bf16.mxu0 %vm1843_vm0, %v9234_v34  ;;  %5414 = vmatmul.mubr.f32.gmra.mrb[138].mxu1 %v5239_v40 }
 0x16c   :  { %v10202_v55 = vpack.c.bf16 %v4764_v44, %v4763_v43  ;;  %5483 = vmatprep.mubr.f32.mxu1 %v5210_v42  ;;  %v9242_v42 = vld [vmem:[%s11721_s0 + $0x310] sm:$0xff]  }
 0x16d   :  { %v10204_v48 = vpack.c.bf16 %v4762_v47, %v4761_v45  ;;  %v8099_v18 = vpop.f32.mrb[72].mxu0 }
 0x16e   :  { %v2943_v49 = vadd.f32 %v8099_v18, %v9849_v46  ;;  %v2934_v19 = vpop.f32.mrb[73].mxu0 }
 0x16f   :  { %v2935_v51 = vadd.f32 %v9849_v46, %v2934_v19  ;;  %v8100_v52 = vpop.f32.mrb[74].mxu0 }
 0x170   :  { %v2946_v58 = vadd.f32 %v8100_v52, %v9849_v46  ;;  %v2937_v17 = vpop.f32.mrb[75].mxu0  ;;  %v4767_v60 = vmax.f32 %v2943_v49, 0.0 }
 0x171   :  { %v2938_v59 = vadd.f32 %v9849_v46, %v2937_v17  ;;  %v4765_v62 = vmax.f32 %v2935_v51, 0.0 }
 0x172   :  { %v4768_v61 = vmax.f32 %v2946_v58, 0.0  ;;  %8206 = vmatmul.mubr.msk.bf16.gmra.mrb[180].mxu0 %vm1843_vm0, %v9235_v50 }
 0x173   :  { %v4766_v1 = vmax.f32 %v2938_v59, 0.0  ;;  %8209 = vmatprep.mubr.msk.bf16.mxu0 %vm1843_vm0, %v9236_v57 }
 0x174   :  { %v10218_v63 = vpack.c.bf16 %v4768_v61, %v4767_v60  ;;  %v9244_v60 = vld [vmem:[%s11721_s0 + $0x320] sm:$0xff]  }
 0x175   :  { %v10220_v2 = vpack.c.bf16 %v4766_v1, %v4765_v62  ;;  %v8103_v3 = vpop.f32.mrb[76].mxu0 }
 0x176   :  { %v2959_v4 = vadd.f32 %v8103_v3, %v9849_v46  ;;  %v2950_v38 = vpop.f32.mrb[77].mxu0 }
 0x177   :  { %v2951_v6 = vadd.f32 %v9849_v46, %v2950_v38  ;;  %v8104_v7 = vpop.f32.mrb[78].mxu0 }
 0x178   :  { %v2962_v10 = vadd.f32 %v8104_v7, %v9849_v46  ;;  %v2953_v35 = vpop.f32.mrb[79].mxu0  ;;  %v4771_v12 = vmax.f32 %v2959_v4, 0.0 }
 0x179   :  { %v2954_v11 = vadd.f32 %v9849_v46, %v2953_v35  ;;  %v4769_v14 = vmax.f32 %v2951_v6, 0.0 }
 0x17a   :  { %v4772_v13 = vmax.f32 %v2962_v10, 0.0  ;;  %8210 = vmatmul.mubr.msk.bf16.gmra.mrb[184].mxu0 %vm1843_vm0, %v9237_v5 }
 0x17b   :  { %v4770_v15 = vmax.f32 %v2954_v11, 0.0  ;;  %8213 = vmatprep.mubr.msk.bf16.mxu0 %vm1843_vm0, %v9238_v9 }
 0x17c   :  { %v10234_v56 = vpack.c.bf16 %v4772_v13, %v4771_v12  ;;  %v9246_v12 = vld [vmem:[%s11721_s0 + $0x330] sm:$0xff]  }
 0x17d   :  { %v10236_v16 = vpack.c.bf16 %v4770_v15, %v4769_v14  ;;  %v8107_v20 = vpop.f32.mrb[80].mxu0 }
 0x17e   :  { %v2975_v21 = vadd.f32 %v8107_v20, %v9849_v46  ;;  %v2966_v53 = vpop.f32.mrb[81].mxu0 }
 0x17f   :  { %v2967_v23 = vadd.f32 %v9849_v46, %v2966_v53  ;;  %v8108_v24 = vpop.f32.mrb[82].mxu0 }
 0x180   :  { %v2978_v54 = vadd.f32 %v8108_v24, %v9849_v46  ;;  %v2969_v26 = vpop.f32.mrb[83].mxu0  ;;  %v4775_v29 = vmax.f32 %v2975_v21, 0.0 }
 0x181   :  { %v2970_v28 = vadd.f32 %v9849_v46, %v2969_v26  ;;  %v4773_v30 = vmax.f32 %v2967_v23, 0.0 }
 0x182   :  { %v4776_v0 = vmax.f32 %v2978_v54, 0.0  ;;  %8214 = vmatmul.mubr.msk.bf16.gmra.mrb[188].mxu0 %vm1843_vm0, %v9239_v22 }
 0x183   :  { %v4774_v31 = vmax.f32 %v2970_v28, 0.0  ;;  %8217 = vmatprep.mubr.msk.bf16.mxu0 %vm1843_vm0, %v9240_v25 }
 0x184   :  { %v8616_v32 = vpack.c.bf16 %v4776_v0, %v4775_v29  ;;  %v9248_v29 = vld [vmem:[%s11721_s0 + $0x340] sm:$0xff]  }
 0x185   :  { %v8111_v36 = vpop.f32.mrb[84].mxu0  ;;  %v8612_v33 = vpack.c.bf16 %v4774_v31, %v4773_v30 }
 0x186   :  { %v2991_v34 = vadd.f32 %v8111_v36, %v9849_v46  ;;  %v2982_v37 = vpop.f32.mrb[85].mxu0 }
 0x187   :  { %v2983_v40 = vadd.f32 %v9849_v46, %v2982_v37  ;;  %v8112_v41 = vpop.f32.mrb[86].mxu0  ;;  %8613 = vmatprep.subr.bf16.mxu1 %v8612_v33  ;;  %v5209_v37 = vld [vmem:[%s11722_s1 + $0x20] sm:$0xff] }
 0x188   :  { %v2994_v43 = vadd.f32 %v8112_v41, %v9849_v46  ;;  %v2985_v44 = vpop.f32.mrb[87].mxu0  ;;  %8615 = vmatpush3.bf16.msra.mxu1 %v10179_v8  ;;  %v4779_v47 = vmax.f32 %v2991_v34, 0.0  ;;  %v9243_v8 = vld [vmem:[%s11721_s0 + $0x318] sm:$0xff]  }
 0x189   :  { %v2986_v45 = vadd.f32 %v9849_v46, %v2985_v44  ;;  %8617 = vmatprep.subr.bf16.mxu1 %v8616_v32  ;;  %v4777_v49 = vmax.f32 %v2983_v40, 0.0  ;;  %v5242_v40 = vld [vmem:[%s11722_s1 + $0x128] sm:$0xff] }
 0x18a   :  { %v4780_v18 = vmax.f32 %v2994_v43, 0.0  ;;  %8218 = vmatmul.mubr.msk.bf16.gmra.mrb[192].mxu0 %vm1843_vm0, %v9241_v39  ;;  %v9249_v43 = vld [vmem:[%s11721_s0 + $0x348] sm:$0xff]  }
 0x18b   :  { %v4778_v19 = vmax.f32 %v2986_v45, 0.0  ;;  %8221 = vmatprep.mubr.msk.bf16.mxu0 %vm1843_vm0, %v9242_v42  ;;  %v9250_v45 = vld [vmem:[%s11721_s0 + $0x350] sm:$0xff]  }
 0x18c   :  { %8619 = vmatpush3.bf16.msra.mxu1 %v10173_v27  ;;  %v8624_v50 = vpack.c.bf16 %v4780_v18, %v4779_v47  ;;  %v10275_v27 = vld [vmem:[%s11724_s3] ss:$0 sm:$0xff] }
 0x18d   :  { %v8115_v51 = vpop.f32.mrb[88].mxu0  ;;  %v8620_v52 = vpack.c.bf16 %v4778_v19, %v4777_v49  ;;  %v5241_v49 = vld [vmem:[%s11722_s1 + $0x120] sm:$0xff] }
 0x18e   :  { %v3007_v57 = vadd.f32 %v8115_v51, %v9849_v46  ;;  %v2998_v58 = vpop.f32.mrb[89].mxu0 }
 0x18f   :  { %v2999_v17 = vadd.f32 %v9849_v46, %v2998_v58  ;;  %v8116_v59 = vpop.f32.mrb[90].mxu0  ;;  %8621 = vmatprep.subr.bf16.mxu1 %v8620_v52 }
 0x190   :  { %v3010_v61 = vadd.f32 %v10275_v27, %v8116_v59  ;;  %v3001_v62 = vpop.f32.mrb[91].mxu0  ;;  %8623 = vmatpush3.bf16.msra.mxu1 %v10204_v48  ;;  %v4783_v46 = vmax.f32 %v3007_v57, 0.0  ;;  %v9245_v48 = vld [vmem:[%s11721_s0 + $0x328] sm:$0xff]  }
 0x191   :  { %v3002_v1 = vadd.f32 %v10275_v27, %v3001_v62  ;;  %8625 = vmatprep.subr.bf16.mxu1 %v8624_v50  ;;  %v4781_v4 = vmax.f32 %v2999_v17, 0.0  ;;  %v5212_v50 = vld [vmem:[%s11722_s1 + $0x38] sm:$0xff] }
 0x192   :  { %v4784_v3 = vmax.f32 %v3010_v61, 0.0  ;;  %8222 = vmatmul.mubr.msk.bf16.gmra.mrb[196].mxu0 %vm1843_vm0, %v9243_v8  ;;  %v9251_v62 = vld [vmem:[%s11721_s0 + $0x358] sm:$0xff]  }
 0x193   :  { %v4782_v38 = vmax.f32 %v3002_v1, 0.0  ;;  %8225 = vmatprep.mubr.msk.bf16.mxu0 %vm1843_vm0, %v9244_v60 }
 0x194   :  { %8627 = vmatpush3.bf16.msra.mxu1 %v10202_v55  ;;  %v8632_v5 = vpack.c.bf16 %v4784_v3, %v4783_v46  ;;  %v9252_v3 = vld [vmem:[%s11721_s0 + $0x360] sm:$0xff]  }
 0x195   :  { %v8119_v6 = vpop.f32.mrb[92].mxu0  ;;  %v8628_v7 = vpack.c.bf16 %v4782_v38, %v4781_v4 }
 0x196   :  { %v3023_v9 = vadd.f32 %v10275_v27, %v8119_v6  ;;  %v3014_v10 = vpop.f32.mrb[93].mxu0 }
 0x197   :  { %v3015_v35 = vadd.f32 %v10275_v27, %v3014_v10  ;;  %v8120_v11 = vpop.f32.mrb[94].mxu0  ;;  %8629 = vmatprep.subr.bf16.mxu1 %v8628_v7 }
 0x198   :  { %v3026_v55 = vadd.f32 %v10275_v27, %v8120_v11  ;;  %v3017_v13 = vpop.f32.mrb[95].mxu0  ;;  %8631 = vmatpush3.bf16.msra.mxu1 %v10220_v2  ;;  %v4787_v15 = vmax.f32 %v3023_v9, 0.0  ;;  %v9247_v2 = vld [vmem:[%s11721_s0 + $0x338] sm:$0xff]  }
 0x199   :  { %v3018_v14 = vadd.f32 %v10275_v27, %v3017_v13  ;;  %8633 = vmatprep.subr.bf16.mxu1 %v8632_v5  ;;  %v4785_v21 = vmax.f32 %v3015_v35, 0.0  ;;  %v9253_v13 = vld [vmem:[%s11721_s0 + $0x368] sm:$0xff]  }
 0x19a   :  { %v4788_v20 = vmax.f32 %v3026_v55, 0.0  ;;  %8226 = vmatmul.mubr.msk.bf16.gmra.mrb[200].mxu0 %vm1843_vm0, %v9245_v48 }
 0x19b   :  { %v4786_v53 = vmax.f32 %v3018_v14, 0.0  ;;  %8229 = vmatprep.mubr.msk.bf16.mxu0 %vm1843_vm0, %v9246_v12 }
 0x19c   :  { %8635 = vmatpush3.bf16.msra.mxu1 %v10218_v63  ;;  %v8640_v22 = vpack.c.bf16 %v4788_v20, %v4787_v15  ;;  %v9254_v20 = vld [vmem:[%s11721_s0 + $0x370] sm:$0xff]  }
 0x19d   :  { %v8123_v23 = vpop.f32.mrb[96].mxu0  ;;  %v8636_v24 = vpack.c.bf16 %v4786_v53, %v4785_v21 }
 0x19e   :  { %v3039_v25 = vadd.f32 %v10275_v27, %v8123_v23  ;;  %v3030_v54 = vpop.f32.mrb[97].mxu0 }
 0x19f   :  { %v3031_v26 = vadd.f32 %v10275_v27, %v3030_v54  ;;  %v8124_v28 = vpop.f32.mrb[98].mxu0  ;;  %8637 = vmatprep.subr.bf16.mxu1 %v8636_v24 }
 0x1a0   :  { %v3042_v63 = vadd.f32 %v10275_v27, %v8124_v28  ;;  %v3033_v0 = vpop.f32.mrb[99].mxu0  ;;  %8639 = vmatpush3.bf16.msra.mxu1 %v10236_v16  ;;  %v4791_v31 = vmax.f32 %v3039_v25, 0.0 }
 0x1a1   :  { %v3034_v30 = vadd.f32 %v10275_v27, %v3033_v0  ;;  %8641 = vmatprep.subr.bf16.mxu1 %v8640_v22  ;;  %v4789_v36 = vmax.f32 %v3031_v26, 0.0  ;;  %v9255_v0 = vld [vmem:[%s11721_s0 + $0x378] sm:$0xff]  }
 0x1a2   :  { %v4792_v32 = vmax.f32 %v3042_v63, 0.0  ;;  %8230 = vmatmul.mubr.msk.bf16.gmra.mrb[204].mxu0 %vm1843_vm0, %v9247_v2 }
 0x1a3   :  { %v4790_v33 = vmax.f32 %v3034_v30, 0.0  ;;  %8233 = vmatprep.mubr.msk.bf16.mxu0 %vm1843_vm0, %v9248_v29 }
 0x1a4   :  { %v10310_v34 = vpack.c.bf16 %v4792_v32, %v4791_v31  ;;  %8643 = vmatpush3.bf16.msra.mxu1 %v10234_v56  ;;  %v9256_v32 = vld [vmem:[%s11721_s0 + $0x380] sm:$0xff]  }
 0x1a5   :  { %v10316_v16 = vpack.c.bf16 %v4790_v33, %v4789_v36  ;;  %v8127_v39 = vpop.f32.mrb[100].mxu0 }
 0x1a6   :  { %v3055_v41 = vadd.f32 %v10275_v27, %v8127_v39  ;;  %v3046_v42 = vpop.f32.mrb[101].mxu0 }
 0x1a7   :  { %v3047_v56 = vadd.f32 %v10275_v27, %v3046_v42  ;;  %v8128_v44 = vpop.f32.mrb[102].mxu0  ;;  %5484 = vmatmul.mubr.f32.vlgmr.msra.gmra.mrb[140].mxu1 %v5209_v37 }
 0x1a8   :  { %v3058_v47 = vadd.f32 %v10275_v27, %v8128_v44  ;;  %v3049_v18 = vpop.f32.mrb[103].mxu0  ;;  %5488 = vmatprep.mubr.f32.mxu1 %v5242_v40  ;;  %v4795_v51 = vmax.f32 %v3055_v41, 0.0 }
 0x1a9   :  { %v3050_v19 = vadd.f32 %v10275_v27, %v3049_v18  ;;  %v4793_v57 = vmax.f32 %v3047_v56, 0.0  ;;  %v9257_v18 = vld [vmem:[%s11721_s0 + $0x388] sm:$0xff]  }
 0x1aa   :  { %v4796_v52 = vmax.f32 %v3058_v47, 0.0  ;;  %8234 = vmatmul.mubr.msk.bf16.gmra.mrb[208].mxu0 %vm1843_vm0, %v9249_v43 }
 0x1ab   :  { %v4794_v58 = vmax.f32 %v3050_v19, 0.0  ;;  %8237 = vmatprep.mubr.msk.bf16.mxu0 %vm1843_vm0, %v9250_v45  ;;  %5489 = vmatmul.mubr.f32.gmra.mrb[142].mxu1 %v5241_v49 }
 0x1ac   :  { %v10339_v8 = vpack.c.bf16 %v4796_v52, %v4795_v51  ;;  %5558 = vmatprep.mubr.f32.mxu1 %v5212_v50  ;;  %v9258_v50 = vld [vmem:[%s11721_s0 + $0x390] sm:$0xff]  }
 0x1ad   :  { %v10341_v17 = vpack.c.bf16 %v4794_v58, %v4793_v57  ;;  %v8131_v59 = vpop.f32.mrb[104].mxu0 }
 0x1ae   :  { %v3071_v60 = vadd.f32 %v10275_v27, %v8131_v59  ;;  %v3062_v61 = vpop.f32.mrb[105].mxu0 }
 0x1af   :  { %v3063_v1 = vadd.f32 %v10275_v27, %v3062_v61  ;;  %v8132_v46 = vpop.f32.mrb[106].mxu0 }
 0x1b0   :  { %v3074_v4 = vadd.f32 %v10275_v27, %v8132_v46  ;;  %v3065_v38 = vpop.f32.mrb[107].mxu0  ;;  %v4799_v6 = vmax.f32 %v3071_v60, 0.0 }
 0x1b1   :  { %v3066_v5 = vadd.f32 %v10275_v27, %v3065_v38  ;;  %v4797_v9 = vmax.f32 %v3063_v1, 0.0 }
 0x1b2   :  { %v4800_v7 = vmax.f32 %v3074_v4, 0.0  ;;  %8238 = vmatmul.mubr.msk.bf16.gmra.mrb[212].mxu0 %vm1843_vm0, %v9251_v62 }
 0x1b3   :  { %v4798_v10 = vmax.f32 %v3066_v5, 0.0  ;;  %8241 = vmatprep.mubr.msk.bf16.mxu0 %vm1843_vm0, %v9252_v3 }
 0x1b4   :  { %v10355_v48 = vpack.c.bf16 %v4800_v7, %v4799_v6  ;;  %v9260_v6 = vld [vmem:[%s11721_s0 + $0x3a0] sm:$0xff]  }
 0x1b5   :  { %v10357_v35 = vpack.c.bf16 %v4798_v10, %v4797_v9  ;;  %v8135_v11 = vpop.f32.mrb[108].mxu0  ;;  %v8407_v9 = vpop.f32.mrb[0].mxu1 }
 0x1b6   :  { %v3087_v12 = vadd.f32 %v10275_v27, %v8135_v11  ;;  %v3078_v55 = vpop.f32.mrb[109].mxu0  ;;  %v4166_v11 = vpop.f32.mrb[1].mxu1 }
 0x1b7   :  { %v3079_v14 = vadd.f32 %v10275_v27, %v3078_v55  ;;  %v8136_v15 = vpop.f32.mrb[110].mxu0 }
 0x1b8   :  { %v3090_v21 = vadd.f32 %v10275_v27, %v8136_v15  ;;  %v3081_v53 = vpop.f32.mrb[111].mxu0  ;;  %v4803_v23 = vmax.f32 %v3087_v12, 0.0 }
 0x1b9   :  { %v3082_v22 = vadd.f32 %v10275_v27, %v3081_v53  ;;  %v4801_v25 = vmax.f32 %v3079_v14, 0.0  ;;  %v4167_v53 = vadd.f32 %v10275_v27, %v4166_v11 }
 0x1ba   :  { %v4804_v24 = vmax.f32 %v3090_v21, 0.0  ;;  %8242 = vmatmul.mubr.msk.bf16.gmra.mrb[216].mxu0 %vm1843_vm0, %v9253_v13  ;;  %v8408_v13 = vpop.f32.mrb[2].mxu1 }
 0x1bb   :  { %v4802_v54 = vmax.f32 %v3082_v22, 0.0  ;;  %8245 = vmatprep.mubr.msk.bf16.mxu0 %vm1843_vm0, %v9254_v20  ;;  %v4169_v20 = vpop.f32.mrb[3].mxu1  ;;  %v4178_v22 = vadd.f32 %v10275_v27, %v8408_v13 }
 0x1bc   :  { %v10371_v2 = vpack.c.bf16 %v4804_v24, %v4803_v23 }
 0x1bd   :  { %v10373_v26 = vpack.c.bf16 %v4802_v54, %v4801_v25  ;;  %v8139_v28 = vpop.f32.mrb[112].mxu0  ;;  %v4170_v25 = vadd.f32 %v10275_v27, %v4169_v20  ;;  %v5211_v20 = vld [vmem:[%s11722_s1 + $0x30] sm:$0xff] }
 0x1be   :  { %v3103_v29 = vadd.f32 %v10275_v27, %v8139_v28  ;;  %v3094_v63 = vpop.f32.mrb[113].mxu0 }
 0x1bf   :  { %v3095_v30 = vadd.f32 %v10275_v27, %v3094_v63  ;;  %v8140_v31 = vpop.f32.mrb[114].mxu0 }
 0x1c0   :  { %v3106_v36 = vadd.f32 %v10275_v27, %v8140_v31  ;;  %v3097_v33 = vpop.f32.mrb[115].mxu0  ;;  %v4807_v39 = vmax.f32 %v3103_v29, 0.0  ;;  %v9261_v29 = vld [vmem:[%s11721_s0 + $0x3a8] sm:$0xff]  }
 0x1c1   :  { %v3098_v37 = vadd.f32 %v10275_v27, %v3097_v33  ;;  %v4805_v41 = vmax.f32 %v3095_v30, 0.0 }
 0x1c2   :  { %v4808_v40 = vmax.f32 %v3106_v36, 0.0  ;;  %8246 = vmatmul.mubr.msk.bf16.gmra.mrb[220].mxu0 %vm1843_vm0, %v9255_v0  ;;  %v5076_v0 = vmax.f32 %v4178_v22, 0.0  ;;  %v5074_v36 = vmax.f32 %v4170_v25, 0.0 }
 0x1c3   :  { %v4806_v42 = vmax.f32 %v3098_v37, 0.0  ;;  %8249 = vmatprep.mubr.msk.bf16.mxu0 %vm1843_vm0, %v9256_v32  ;;  %v9262_v32 = vld [vmem:[%s11721_s0 + $0x3b0] sm:$0xff]  }
 0x1c4   :  { %v8648_v43 = vpack.c.bf16 %v4808_v40, %v4807_v39  ;;  %v8411_v40 = vpop.f32.mrb[4].mxu1 }
 0x1c5   :  { %v8143_v56 = vpop.f32.mrb[116].mxu0  ;;  %v8644_v44 = vpack.c.bf16 %v4806_v42, %v4805_v41 }
 0x1c6   :  { %v3119_v45 = vadd.f32 %v10275_v27, %v8143_v56  ;;  %v3110_v47 = vpop.f32.mrb[117].mxu0 }
 0x1c7   :  { %v3111_v49 = vadd.f32 %v10275_v27, %v3110_v47  ;;  %v8144_v19 = vpop.f32.mrb[118].mxu0  ;;  %8645 = vmatprep.subr.bf16.mxu1 %v8644_v44 }
 0x1c8   :  { %v3122_v51 = vadd.f32 %v10275_v27, %v8144_v19  ;;  %v3113_v52 = vpop.f32.mrb[119].mxu0  ;;  %8647 = vmatpush3.bf16.msra.mxu1 %v10316_v16  ;;  %v4811_v58 = vmax.f32 %v3119_v45, 0.0  ;;  %v9259_v16 = vld [vmem:[%s11721_s0 + $0x398] sm:$0xff]   ;;  %v4191_v19 = vadd.f32 %v10275_v27, %v8411_v40 }
 0x1c9   :  { %v3114_v57 = vadd.f32 %v10275_v27, %v3113_v52  ;;  %8649 = vmatprep.subr.bf16.mxu1 %v8648_v43  ;;  %v4809_v60 = vmax.f32 %v3111_v49, 0.0  ;;  %v4182_v43 = vpop.f32.mrb[5].mxu1 }
 0x1ca   :  { %v4812_v59 = vmax.f32 %v3122_v51, 0.0  ;;  %8250 = vmatmul.mubr.msk.bf16.gmra.mrb[224].mxu0 %vm1843_vm0, %v9257_v18  ;;  %v8412_v45 = vpop.f32.mrb[6].mxu1 }
 0x1cb   :  { %v4810_v61 = vmax.f32 %v3114_v57, 0.0  ;;  %8253 = vmatprep.mubr.msk.bf16.mxu0 %vm1843_vm0, %v9258_v50  ;;  %v4185_v49 = vpop.f32.mrb[7].mxu1  ;;  %v4183_v50 = vadd.f32 %v10275_v27, %v4182_v43  ;;  %v4194_v51 = vadd.f32 %v10275_v27, %v8412_v45 }
 0x1cc   :  { %8651 = vmatpush3.bf16.msra.mxu1 %v10310_v34  ;;  %v8656_v62 = vpack.c.bf16 %v4812_v59, %v4811_v58  ;;  %v4186_v58 = vadd.f32 %v10275_v27, %v4185_v49 }
 0x1cd   :  { %v8147_v1 = vpop.f32.mrb[120].mxu0  ;;  %v8652_v46 = vpack.c.bf16 %v4810_v61, %v4809_v60  ;;  %v9263_v61 = vld [vmem:[%s11721_s0 + $0x3b8] sm:$0xff]  }
 0x1ce   :  { %v3135_v3 = vadd.f32 %v10275_v27, %v8147_v1  ;;  %v3126_v4 = vpop.f32.mrb[121].mxu0  ;;  %v5077_v1 = vmax.f32 %v4183_v50, 0.0 }
 0x1cf   :  { %v3127_v38 = vadd.f32 %v10275_v27, %v3126_v4  ;;  %v8148_v5 = vpop.f32.mrb[122].mxu0  ;;  %8653 = vmatprep.subr.bf16.mxu1 %v8652_v46  ;;  %v9264_v4 = vld [vmem:[%s11721_s0 + $0x3c0] sm:$0xff]  }
 0x1d0   :  { %v3138_v34 = vadd.f32 %v10275_v27, %v8148_v5  ;;  %v3129_v7 = vpop.f32.mrb[123].mxu0  ;;  %8655 = vmatpush3.bf16.msra.mxu1 %v10341_v17  ;;  %v4815_v12 = vmax.f32 %v3135_v3, 0.0  ;;  %v4175_v17 = vadd.f32 %v10275_v27, %v8407_v9 }
 0x1d1   :  { %v3130_v10 = vadd.f32 %v10275_v27, %v3129_v7  ;;  %8657 = vmatprep.subr.bf16.mxu1 %v8656_v62  ;;  %v4813_v14 = vmax.f32 %v3127_v38, 0.0  ;;  %v5079_v62 = vmax.f32 %v4191_v19, 0.0 }
 0x1d2   :  { %v4816_v55 = vmax.f32 %v3138_v34, 0.0  ;;  %8254 = vmatmul.mubr.msk.bf16.gmra.mrb[228].mxu0 %vm1843_vm0, %v9259_v16  ;;  %v5075_v63 = vmax.f32 %v4175_v17, 0.0  ;;  %v5078_v16 = vmax.f32 %v4186_v58, 0.0  ;;  %v8415_v34 = vpop.f32.mrb[8].mxu1 }
 0x1d3   :  { %v4814_v15 = vmax.f32 %v3130_v10, 0.0  ;;  %8257 = vmatprep.mubr.msk.bf16.mxu0 %vm1843_vm0, %v9260_v6  ;;  %v4198_v10 = vpop.f32.mrb[9].mxu1 }
 0x1d4   :  { %8659 = vmatpush3.bf16.msra.mxu1 %v10339_v8  ;;  %v8664_v21 = vpack.c.bf16 %v4816_v55, %v4815_v12  ;;  %v5073_v8 = vmax.f32 %v4167_v53, 0.0  ;;  %v10429_v39 = vpack.c.bf16 %v5076_v0, %v5075_v63  ;;  %v10454_v9 = vpack.c.bf16 %v5078_v16, %v5077_v1  ;;  %v8416_v55 = vpop.f32.mrb[10].mxu1 }
 0x1d5   :  { %v8151_v23 = vpop.f32.mrb[124].mxu0  ;;  %v8660_v24 = vpack.c.bf16 %v4814_v15, %v4813_v14  ;;  %v4201_v15 = vpop.f32.mrb[11].mxu1  ;;  %v4199_v17 = vadd.f32 %v10275_v27, %v4198_v10  ;;  %v4210_v53 = vadd.f32 %v10275_v27, %v8416_v55 }
 0x1d6   :  { %v3151_v54 = vadd.f32 %v10275_v27, %v8151_v23  ;;  %v3142_v28 = vpop.f32.mrb[125].mxu0  ;;  %v10432_v42 = vpack.c.bf16 %v5074_v36, %v5073_v8  ;;  %v4202_v25 = vadd.f32 %v10275_v27, %v4201_v15 }
 0x1d7   :  { %v3143_v30 = vadd.f32 %v10275_v27, %v3142_v28  ;;  %v8152_v31 = vpop.f32.mrb[126].mxu0  ;;  %8661 = vmatprep.subr.bf16.mxu1 %v8660_v24  ;;  %v5244_v24 = vld [vmem:[%s11722_s1 + $0x138] sm:$0xff]  ;;  %v9265_v28 = vld [vmem:[%s11721_s0 + $0x3c8] sm:$0xff]   ;;  %v5081_v63 = vmax.f32 %v4199_v17, 0.0  ;;  %v5084_v8 = vmax.f32 %v4210_v53, 0.0 }
 0x1d8   :  { %v3154_v33 = vadd.f32 %v10275_v27, %v8152_v31  ;;  %v3145_v37 = vpop.f32.mrb[127].mxu0  ;;  %8663 = vmatpush3.bf16.msra.mxu1 %v10357_v35  ;;  %v4819_v56 = vmax.f32 %v3151_v54, 0.0  ;;  %v9266_v31 = vld [vmem:[%s11721_s0 + $0x3d0] sm:$0xff]  }
 0x1d9   :  { %v3146_v41 = vadd.f32 %v10275_v27, %v3145_v37  ;;  %8665 = vmatprep.subr.bf16.mxu1 %v8664_v21  ;;  %v4817_v47 = vmax.f32 %v3143_v30, 0.0  ;;  %v4207_v21 = vadd.f32 %v10275_v27, %v8415_v34  ;;  %v5243_v37 = vld [vmem:[%s11722_s1 + $0x130] sm:$0xff] }
 0x1da   :  { %v4820_v44 = vmax.f32 %v3154_v33, 0.0  ;;  %8258 = vmatmul.mubr.msk.bf16.gmra.mrb[232].mxu0 %vm1843_vm0, %v9261_v29 }
 0x1db   :  { %v4818_v18 = vmax.f32 %v3146_v41, 0.0  ;;  %8261 = vmatprep.mubr.msk.bf16.mxu0 %vm1843_vm0, %v9262_v32  ;;  %v5083_v29 = vmax.f32 %v4207_v21, 0.0  ;;  %v5082_v32 = vmax.f32 %v4202_v25, 0.0  ;;  %v8419_v41 = vpop.f32.mrb[12].mxu1 }
 0x1dc   :  { %v8672_v35 = vpack.c.bf16 %v4820_v44, %v4819_v56  ;;  %8667 = vmatpush3.bf16.msra.mxu1 %v10355_v48  ;;  %v5080_v48 = vmax.f32 %v4194_v51, 0.0  ;;  %v5214_v56 = vld [vmem:[%s11722_s1 + $0x48] sm:$0xff]  ;;  %v4214_v45 = vpop.f32.mrb[13].mxu1 }
 0x1dd   :  { %v8668_v52 = vpack.c.bf16 %v4818_v18, %v4817_v47  ;;  %v8155_v57 = vpop.f32.mrb[128].mxu0  ;;  %v10485_v40 = vpack.c.bf16 %v5084_v8, %v5083_v29  ;;  %v10491_v44 = vpack.c.bf16 %v5082_v32, %v5081_v63  ;;  %v8420_v49 = vpop.f32.mrb[14].mxu1 }
 0x1de   :  { %v3167_v59 = vadd.f32 %v10275_v27, %v8155_v57  ;;  %v3158_v60 = vpop.f32.mrb[129].mxu0  ;;  %v10451_v6 = vpack.c.bf16 %v5080_v48, %v5079_v62  ;;  %v4217_v50 = vpop.f32.mrb[15].mxu1  ;;  %v4215_v57 = vadd.f32 %v10275_v27, %v4214_v45  ;;  %v4226_v58 = vadd.f32 %v10275_v27, %v8420_v49  ;;  %v9267_v48 = vld [vmem:[%s11721_s0 + $0x3d8] sm:$0xff]  }
 0x1df   :  { %v3159_v46 = vadd.f32 %v10275_v27, %v3158_v60  ;;  %v8156_v3 = vpop.f32.mrb[130].mxu0  ;;  %8669 = vmatprep.subr.bf16.mxu1 %v8668_v52  ;;  %v4223_v52 = vadd.f32 %v10275_v27, %v8419_v41  ;;  %v9270_v41 = vld [vmem:[%s11721_s0 + $0x3f0] sm:$0xff]  }
 0x1e0   :  { %v3170_v38 = vadd.f32 %v10275_v27, %v8156_v3  ;;  %v3161_v5 = vpop.f32.mrb[131].mxu0  ;;  %8671 = vmatpush3.bf16.msra.mxu1 %v10373_v26  ;;  %v4823_v11 = vmax.f32 %v3167_v59, 0.0  ;;  %v5085_v3 = vmax.f32 %v4215_v57, 0.0 }
 0x1e1   :  { %v3162_v7 = vadd.f32 %v10275_v27, %v3161_v5  ;;  %8673 = vmatprep.subr.bf16.mxu1 %v8672_v35  ;;  %v4821_v13 = vmax.f32 %v3159_v46, 0.0  ;;  %v5087_v46 = vmax.f32 %v4223_v52, 0.0  ;;  %v9268_v5 = vld [vmem:[%s11721_s0 + $0x3e0] sm:$0xff]  }
 0x1e2   :  { %v4824_v12 = vmax.f32 %v3170_v38, 0.0  ;;  %8262 = vmatmul.mubr.msk.bf16.gmra.mrb[236].mxu0 %vm1843_vm0, %v9263_v61  ;;  %v4218_v61 = vadd.f32 %v10275_v27, %v4217_v50 }
 0x1e3   :  { %v4822_v14 = vmax.f32 %v3162_v7, 0.0  ;;  %8265 = vmatprep.mubr.msk.bf16.mxu0 %vm1843_vm0, %v9264_v4  ;;  %v5088_v4 = vmax.f32 %v4226_v58, 0.0 }
 0x1e4   :  { %v10458_v26 = vpack.c.bf16 %v4824_v12, %v4823_v11  ;;  %8675 = vmatpush3.bf16.msra.mxu1 %v10371_v2  ;;  %v5086_v34 = vmax.f32 %v4218_v61, 0.0  ;;  %v8423_v12 = vpop.f32.mrb[16].mxu1 }
 0x1e5   :  { %v10467_v22 = vpack.c.bf16 %v4822_v14, %v4821_v13  ;;  %v8159_v23 = vpop.f32.mrb[132].mxu0  ;;  %v10512_v11 = vpack.c.bf16 %v5088_v4, %v5087_v46  ;;  %v4230_v14 = vpop.f32.mrb[17].mxu1  ;;  %v4239_v25 = vadd.f32 %v10275_v27, %v8423_v12 }
 0x1e6   :  { %v3183_v2 = vadd.f32 %v10275_v27, %v8159_v23  ;;  %v3174_v54 = vpop.f32.mrb[133].mxu0  ;;  %v10515_v13 = vpack.c.bf16 %v5086_v34, %v5085_v3  ;;  %v8424_v21 = vpop.f32.mrb[18].mxu1  ;;  %v9271_v34 = vld [vmem:[%s11721_s0 + $0x3f8] sm:$0xff]  }
 0x1e7   :  { %v3175_v0 = vadd.f32 %v10275_v27, %v3174_v54  ;;  %v8160_v30 = vpop.f32.mrb[134].mxu0  ;;  %5559 = vmatmul.mubr.f32.vlgmr.msra.gmra.mrb[144].mxu1 %v5211_v20  ;;  %v4233_v23 = vpop.f32.mrb[19].mxu1  ;;  %v4242_v54 = vadd.f32 %v10275_v27, %v8424_v21 }
 0x1e8   :  { %v3186_v36 = vadd.f32 %v10275_v27, %v8160_v30  ;;  %v3177_v33 = vpop.f32.mrb[135].mxu0  ;;  %5563 = vmatprep.mubr.f32.mxu1 %v5244_v24  ;;  %v4827_v47 = vmax.f32 %v3183_v2, 0.0  ;;  %v4231_v2 = vadd.f32 %v10275_v27, %v4230_v14  ;;  %v4234_v63 = vadd.f32 %v10275_v27, %v4233_v23  ;;  %v9269_v30 = vld [vmem:[%s11721_s0 + $0x3e8] sm:$0xff]  }
 0x1e9   :  { %v3178_v43 = vadd.f32 %v10275_v27, %v3177_v33  ;;  %v4825_v35 = vmax.f32 %v3175_v0, 0.0 }
 0x1ea   :  { %v4828_v18 = vmax.f32 %v3186_v36, 0.0  ;;  %8266 = vmatmul.mubr.msk.bf16.gmra.mrb[240].mxu0 %vm1843_vm0, %v9265_v28  ;;  %v5089_v32 = vmax.f32 %v4231_v2, 0.0  ;;  %v5092_v36 = vmax.f32 %v4242_v54, 0.0 }
 0x1eb   :  { %v4826_v19 = vmax.f32 %v3178_v43, 0.0  ;;  %8269 = vmatprep.mubr.msk.bf16.mxu0 %vm1843_vm0, %v9266_v31  ;;  %5564 = vmatmul.mubr.f32.gmra.mrb[146].mxu1 %v5243_v37  ;;  %v5091_v31 = vmax.f32 %v4239_v25, 0.0  ;;  %v5090_v43 = vmax.f32 %v4234_v63, 0.0 }
 0x1ec   :  { %v10495_v51 = vpack.c.bf16 %v4828_v18, %v4827_v47  ;;  %5633 = vmatprep.mubr.f32.mxu1 %v5214_v56  ;;  %v8427_v18 = vpop.f32.mrb[20].mxu1 }
 0x1ed   :  { %v10500_v59 = vpack.c.bf16 %v4826_v19, %v4825_v35  ;;  %v8163_v60 = vpop.f32.mrb[136].mxu0  ;;  %v10536_v47 = vpack.c.bf16 %v5092_v36, %v5091_v31  ;;  %v10539_v35 = vpack.c.bf16 %v5090_v43, %v5089_v32  ;;  %v4246_v19 = vpop.f32.mrb[21].mxu1 }
 0x1ee   :  { %v3199_v62 = vadd.f32 %v10275_v27, %v8163_v60  ;;  %v3190_v1 = vpop.f32.mrb[137].mxu0  ;;  %v8428_v57 = vpop.f32.mrb[22].mxu1 }
 0x1ef   :  { %v3191_v16 = vadd.f32 %v10275_v27, %v3190_v1  ;;  %v8164_v38 = vpop.f32.mrb[138].mxu0  ;;  %v4249_v61 = vpop.f32.mrb[23].mxu1  ;;  %v4255_v1 = vadd.f32 %v10275_v27, %v8427_v18  ;;  %v4258_v46 = vadd.f32 %v10275_v27, %v8428_v57 }
 0x1f0   :  { %v3202_v7 = vadd.f32 %v10275_v27, %v8164_v38  ;;  %v3193_v10 = vpop.f32.mrb[139].mxu0  ;;  %v4831_v15 = vmax.f32 %v3199_v62, 0.0  ;;  %v8431_v23 = vpop.f32.mrb[24].mxu1 }
 0x1f1   :  { %v3194_v55 = vadd.f32 %v10275_v27, %v3193_v10  ;;  %v4829_v17 = vmax.f32 %v3191_v16, 0.0  ;;  %v4250_v16 = vadd.f32 %v10275_v27, %v4249_v61  ;;  %v5096_v12 = vmax.f32 %v4258_v46, 0.0  ;;  %v4262_v54 = vpop.f32.mrb[25].mxu1 }
 0x1f2   :  { %v4832_v20 = vmax.f32 %v3202_v7, 0.0  ;;  %8270 = vmatmul.mubr.msk.bf16.gmra.mrb[244].mxu0 %vm1843_vm0, %v9267_v48  ;;  %v4247_v48 = vadd.f32 %v10275_v27, %v4246_v19  ;;  %v5095_v7 = vmax.f32 %v4255_v1, 0.0  ;;  %v4271_v36 = vadd.f32 %v10275_v27, %v8431_v23 }
 0x1f3   :  { %v4830_v53 = vmax.f32 %v3194_v55, 0.0  ;;  %8273 = vmatprep.mubr.msk.bf16.mxu0 %vm1843_vm0, %v9268_v5 }
 0x1f4   :  { %v10519_v24 = vpack.c.bf16 %v4832_v20, %v4831_v15  ;;  %v5093_v10 = vmax.f32 %v4247_v48, 0.0  ;;  %v9272_v15 = vld [vmem:[%s11721_s0 + $0x400] sm:$0xff]   ;;  %v5094_v20 = vmax.f32 %v4250_v16, 0.0  ;;  %v5099_v19 = vmax.f32 %v4271_v36, 0.0 }
 0x1f5   :  { %v10524_v28 = vpack.c.bf16 %v4830_v53, %v4829_v17  ;;  %v8167_v29 = vpop.f32.mrb[140].mxu0  ;;  %v10560_v53 = vpack.c.bf16 %v5096_v12, %v5095_v7 }
 0x1f6   :  { %v3215_v8 = vadd.f32 %v10275_v27, %v8167_v29  ;;  %v3206_v0 = vpop.f32.mrb[141].mxu0  ;;  %v10563_v2 = vpack.c.bf16 %v5094_v20, %v5093_v10 }
 0x1f7   :  { %v3207_v33 = vadd.f32 %v10275_v27, %v3206_v0  ;;  %v8168_v37 = vpop.f32.mrb[142].mxu0 }
 0x1f8   :  { %v3218_v56 = vadd.f32 %v10275_v27, %v8168_v37  ;;  %v3209_v45 = vpop.f32.mrb[143].mxu0  ;;  %v4835_v50 = vmax.f32 %v3215_v8, 0.0  ;;  %v8432_v8 = vpop.f32.mrb[26].mxu1 }
 0x1f9   :  { %v3210_v49 = vadd.f32 %v10275_v27, %v3209_v45  ;;  %v4833_v58 = vmax.f32 %v3207_v33, 0.0  ;;  %v4265_v31 = vpop.f32.mrb[27].mxu1  ;;  %v4263_v33 = vadd.f32 %v10275_v27, %v4262_v54  ;;  %v4274_v37 = vadd.f32 %v10275_v27, %v8432_v8 }
 0x1fa   :  { %v4836_v52 = vmax.f32 %v3218_v56, 0.0  ;;  %8274 = vmatmul.mubr.msk.bf16.gmra.mrb[248].mxu0 %vm1843_vm0, %v9269_v30  ;;  %v4266_v56 = vadd.f32 %v10275_v27, %v4265_v31 }
 0x1fb   :  { %v4834_v60 = vmax.f32 %v3210_v49, 0.0  ;;  %8277 = vmatprep.mubr.msk.bf16.mxu0 %vm1843_vm0, %v9270_v41  ;;  %v9273_v49 = vld [vmem:[%s11721_s0 + $0x408] sm:$0xff]  }
 0x1fc   :  { %v10543_v62 = vpack.c.bf16 %v4836_v52, %v4835_v50  ;;  %v5097_v50 = vmax.f32 %v4263_v33, 0.0  ;;  %v5100_v52 = vmax.f32 %v4274_v37, 0.0  ;;  %v5098_v61 = vmax.f32 %v4266_v56, 0.0 }
 0x1fd   :  { %v10548_v3 = vpack.c.bf16 %v4834_v60, %v4833_v58  ;;  %v8171_v4 = vpop.f32.mrb[144].mxu0  ;;  %v9274_v60 = vld [vmem:[%s11721_s0 + $0x410] sm:$0xff]  }
 0x1fe   :  { %v3231_v38 = vadd.f32 %v10275_v27, %v8171_v4  ;;  %v3222_v5 = vpop.f32.mrb[145].mxu0  ;;  %v10581_v46 = vpack.c.bf16 %v5100_v52, %v5099_v19  ;;  %v8435_v4 = vpop.f32.mrb[28].mxu1 }
 0x1ff   :  { %v3223_v55 = vadd.f32 %v10275_v27, %v3222_v5  ;;  %v8172_v14 = vpop.f32.mrb[146].mxu0  ;;  %v4278_v5 = vpop.f32.mrb[29].mxu1 }
 0x200   :  { %v3234_v21 = vadd.f32 %v10275_v27, %v8172_v14  ;;  %v3225_v17 = vpop.f32.mrb[147].mxu0  ;;  %v4839_v29 = vmax.f32 %v3231_v38, 0.0  ;;  %v10584_v38 = vpack.c.bf16 %v5098_v61, %v5097_v50  ;;  %v8436_v10 = vpop.f32.mrb[30].mxu1  ;;  %v4279_v20 = vadd.f32 %v10275_v27, %v4278_v5 }
 0x201   :  { %v3226_v25 = vadd.f32 %v10275_v27, %v3225_v17  ;;  %v4837_v0 = vmax.f32 %v3223_v55, 0.0  ;;  %v4281_v14 = vpop.f32.mrb[31].mxu1 }
 0x202   :  { %v4840_v63 = vmax.f32 %v3234_v21, 0.0  ;;  %8278 = vmatmul.mubr.msk.bf16.gmra.mrb[252].mxu0 %vm1843_vm0, %v9271_v34  ;;  %v4290_v21 = vadd.f32 %v10275_v27, %v8436_v10 }
 0x203   :  { %v4838_v30 = vmax.f32 %v3226_v25, 0.0  ;;  %8281 = vmatprep.mubr.msk.bf16.mxu0 %vm1843_vm0, %v9272_v15  ;;  %v4287_v15 = vadd.f32 %v10275_v27, %v8435_v4  ;;  %v4282_v25 = vadd.f32 %v10275_v27, %v4281_v14 }
 0x204   :  { %v8680_v32 = vpack.c.bf16 %v4840_v63, %v4839_v29  ;;  %v9275_v63 = vld [vmem:[%s11721_s0 + $0x418] sm:$0xff]  }
 0x205   :  { %v8676_v41 = vpack.c.bf16 %v4838_v30, %v4837_v0  ;;  %v8175_v43 = vpop.f32.mrb[148].mxu0  ;;  %v5103_v8 = vmax.f32 %v4287_v15, 0.0  ;;  %v5101_v0 = vmax.f32 %v4279_v20, 0.0  ;;  %v5102_v36 = vmax.f32 %v4282_v25, 0.0 }
 0x206   :  { %v3247_v45 = vadd.f32 %v10275_v27, %v8175_v43  ;;  %v3238_v18 = vpop.f32.mrb[149].mxu0  ;;  %v8439_v43 = vpop.f32.mrb[32].mxu1 }
 0x207   :  { %v3239_v57 = vadd.f32 %v10275_v27, %v3238_v18  ;;  %v8176_v58 = vpop.f32.mrb[150].mxu0  ;;  %8677 = vmatprep.subr.bf16.mxu1 %v8676_v41  ;;  %v4294_v18 = vpop.f32.mrb[33].mxu1 }
 0x208   :  { %v3250_v1 = vadd.f32 %v10275_v27, %v8176_v58  ;;  %v3241_v48 = vpop.f32.mrb[151].mxu0  ;;  %8679 = vmatpush3.bf16.msra.mxu1 %v10467_v22  ;;  %v4843_v34 = vmax.f32 %v3247_v45, 0.0  ;;  %v10606_v45 = vpack.c.bf16 %v5102_v36, %v5101_v0  ;;  %v8440_v50 = vpop.f32.mrb[34].mxu1  ;;  %v4295_v61 = vadd.f32 %v10275_v27, %v4294_v18 }
 0x209   :  { %v3242_v16 = vadd.f32 %v10275_v27, %v3241_v48  ;;  %8681 = vmatprep.subr.bf16.mxu1 %v8680_v32  ;;  %v4841_v12 = vmax.f32 %v3239_v57, 0.0  ;;  %v9276_v32 = vld [vmem:[%s11721_s0 + $0x420] sm:$0xff]   ;;  %v4297_v58 = vpop.f32.mrb[35].mxu1 }
 0x20a   :  { %v4844_v7 = vmax.f32 %v3250_v1, 0.0  ;;  %8282 = vmatmul.mubr.msk.bf16.gmra.mrb[0].mxu0 %vm1843_vm0, %v9273_v49  ;;  %v4306_v1 = vadd.f32 %v10275_v27, %v8440_v50 }
 0x20b   :  { %v4842_v55 = vmax.f32 %v3242_v16, 0.0  ;;  %8285 = vmatprep.mubr.msk.bf16.mxu0 %vm1843_vm0, %v9274_v60  ;;  %v4303_v60 = vadd.f32 %v10275_v27, %v8439_v43  ;;  %v4298_v16 = vadd.f32 %v10275_v27, %v4297_v58 }
 0x20c   :  { %v8688_v22 = vpack.c.bf16 %v4844_v7, %v4843_v34  ;;  %8683 = vmatpush3.bf16.msra.mxu1 %v10458_v26  ;;  %v5104_v26 = vmax.f32 %v4290_v21, 0.0  ;;  %v9277_v7 = vld [vmem:[%s11721_s0 + $0x428] sm:$0xff]  }
 0x20d   :  { %v8684_v17 = vpack.c.bf16 %v4842_v55, %v4841_v12  ;;  %v8179_v23 = vpop.f32.mrb[152].mxu0  ;;  %v5107_v10 = vmax.f32 %v4303_v60, 0.0  ;;  %v5105_v12 = vmax.f32 %v4295_v61, 0.0  ;;  %v5106_v15 = vmax.f32 %v4298_v16, 0.0 }
 0x20e   :  { %v3263_v54 = vadd.f32 %v10275_v27, %v8179_v23  ;;  %v3254_v29 = vpop.f32.mrb[153].mxu0  ;;  %v10603_v41 = vpack.c.bf16 %v5104_v26, %v5103_v8  ;;  %v8443_v23 = vpop.f32.mrb[36].mxu1 }
 0x20f   :  { %v3255_v30 = vadd.f32 %v10275_v27, %v3254_v29  ;;  %v8180_v31 = vpop.f32.mrb[154].mxu0  ;;  %8685 = vmatprep.subr.bf16.mxu1 %v8684_v17  ;;  %v4310_v29 = vpop.f32.mrb[37].mxu1 }
 0x210   :  { %v3266_v33 = vadd.f32 %v10275_v27, %v8180_v31  ;;  %v3257_v37 = vpop.f32.mrb[155].mxu0  ;;  %8687 = vmatpush3.bf16.msra.mxu1 %v10500_v59  ;;  %v4847_v49 = vmax.f32 %v3263_v54, 0.0  ;;  %v10628_v54 = vpack.c.bf16 %v5106_v15, %v5105_v12  ;;  %v8444_v0 = vpop.f32.mrb[38].mxu1  ;;  %v4311_v36 = vadd.f32 %v10275_v27, %v4310_v29  ;;  %v5246_v29 = vld [vmem:[%s11722_s1 + $0x148] sm:$0xff] }
 0x211   :  { %v3258_v56 = vadd.f32 %v10275_v27, %v3257_v37  ;;  %8689 = vmatprep.subr.bf16.mxu1 %v8688_v22  ;;  %v4845_v52 = vmax.f32 %v3255_v30, 0.0  ;;  %v9278_v22 = vld [vmem:[%s11721_s0 + $0x430] sm:$0xff]   ;;  %v4313_v31 = vpop.f32.mrb[39].mxu1 }
 0x212   :  { %v4848_v19 = vmax.f32 %v3266_v33, 0.0  ;;  %8286 = vmatmul.mubr.msk.bf16.gmra.mrb[4].mxu0 %vm1843_vm0, %v9275_v63  ;;  %v4322_v33 = vadd.f32 %v10275_v27, %v8444_v0  ;;  %v9281_v0 = vld [vmem:[%s11721_s0 + $0x448] sm:$0xff]  }
 0x213   :  { %v4846_v57 = vmax.f32 %v3258_v56, 0.0  ;;  %8289 = vmatprep.mubr.msk.bf16.mxu0 %vm1843_vm0, %v9276_v32  ;;  %v4319_v32 = vadd.f32 %v10275_v27, %v8443_v23  ;;  %v4314_v56 = vadd.f32 %v10275_v27, %v4313_v31 }
 0x214   :  { %v8696_v59 = vpack.c.bf16 %v4848_v19, %v4847_v49  ;;  %8691 = vmatpush3.bf16.msra.mxu1 %v10495_v51  ;;  %v5108_v51 = vmax.f32 %v4306_v1, 0.0  ;;  %v9279_v19 = vld [vmem:[%s11721_s0 + $0x438] sm:$0xff]  }
 0x215   :  { %v8692_v48 = vpack.c.bf16 %v4846_v57, %v4845_v52  ;;  %v8183_v4 = vpop.f32.mrb[156].mxu0  ;;  %v5111_v50 = vmax.f32 %v4319_v32, 0.0  ;;  %v5109_v52 = vmax.f32 %v4311_v36, 0.0  ;;  %v10644_v57 = vld [vmem:[%s11724_s3] ss:$0 sm:$0xff]  ;;  %v5110_v60 = vmax.f32 %v4314_v56, 0.0 }
 0x216   :  { %v3279_v5 = vadd.f32 %v10275_v27, %v8183_v4  ;;  %v3270_v34 = vpop.f32.mrb[157].mxu0  ;;  %v10625_v17 = vpack.c.bf16 %v5108_v51, %v5107_v10  ;;  %v8447_v4 = vpop.f32.mrb[40].mxu1  ;;  %v9282_v36 = vld [vmem:[%s11721_s0 + $0x450] sm:$0xff]   ;;  %v5245_v56 = vld [vmem:[%s11722_s1 + $0x140] sm:$0xff] }
 0x217   :  { %v3271_v55 = vadd.f32 %v10275_v27, %v3270_v34  ;;  %v8184_v14 = vpop.f32.mrb[158].mxu0  ;;  %8693 = vmatprep.subr.bf16.mxu1 %v8692_v48  ;;  %v4326_v34 = vpop.f32.mrb[41].mxu1  ;;  %v4335_v15 = vadd.f32 %v10644_v57, %v8447_v4 }
 0x218   :  { %v3282_v20 = vadd.f32 %v10275_v27, %v8184_v14  ;;  %v3273_v21 = vpop.f32.mrb[159].mxu0  ;;  %8695 = vmatpush3.bf16.msra.mxu1 %v10524_v28  ;;  %v4851_v63 = vmax.f32 %v3279_v5, 0.0  ;;  %v10655_v5 = vpack.c.bf16 %v5110_v60, %v5109_v52  ;;  %v8448_v12 = vpop.f32.mrb[42].mxu1 }
 0x219   :  { %v3274_v25 = vadd.f32 %v10275_v27, %v3273_v21  ;;  %8697 = vmatprep.subr.bf16.mxu1 %v8696_v59  ;;  %v4849_v26 = vmax.f32 %v3271_v55, 0.0  ;;  %v4329_v14 = vpop.f32.mrb[43].mxu1  ;;  %v4338_v21 = vadd.f32 %v10644_v57, %v8448_v12 }
 0x21a   :  { %v4852_v8 = vmax.f32 %v3282_v20, 0.0  ;;  %8290 = vmatmul.mubr.msk.bf16.gmra.mrb[8].mxu0 %vm1843_vm0, %v9277_v7  ;;  %v4327_v20 = vadd.f32 %v10644_v57, %v4326_v34 }
 0x21b   :  { %v4850_v30 = vmax.f32 %v3274_v25, 0.0  ;;  %8293 = vmatprep.mubr.msk.bf16.mxu0 %vm1843_vm0, %v9278_v22  ;;  %v5213_v22 = vld [vmem:[%s11722_s1 + $0x40] sm:$0xff]  ;;  %v5116_v31 = vmax.f32 %v4338_v21, 0.0 }
 0x21c   :  { %v8704_v28 = vpack.c.bf16 %v4852_v8, %v4851_v63  ;;  %8699 = vmatpush3.bf16.msra.mxu1 %v10519_v24  ;;  %v5112_v24 = vmax.f32 %v4322_v33, 0.0  ;;  %v4330_v63 = vadd.f32 %v10644_v57, %v4329_v14 }
 0x21d   :  { %v8700_v37 = vpack.c.bf16 %v4850_v30, %v4849_v26  ;;  %v8187_v43 = vpop.f32.mrb[160].mxu0  ;;  %v5115_v26 = vmax.f32 %v4335_v15, 0.0  ;;  %v5113_v30 = vmax.f32 %v4327_v20, 0.0 }
 0x21e   :  { %v3295_v18 = vadd.f32 %v10275_v27, %v8187_v43  ;;  %v3286_v49 = vpop.f32.mrb[161].mxu0  ;;  %v9280_v27 = vld [vmem:[%s11721_s0 + $0x440] sm:$0xff]   ;;  %v10652_v48 = vpack.c.bf16 %v5112_v24, %v5111_v50  ;;  %v5114_v33 = vmax.f32 %v4330_v63, 0.0  ;;  %v5216_v50 = vld [vmem:[%s11722_s1 + $0x58] sm:$0xff] }
 0x21f   :  { %v3287_v58 = vadd.f32 %v10644_v57, %v3286_v49  ;;  %v8188_v59 = vpop.f32.mrb[162].mxu0  ;;  %8701 = vmatprep.subr.bf16.mxu1 %v8700_v37  ;;  %v8451_v49 = vpop.f32.mrb[44].mxu1  ;;  %v9284_v63 = vld [vmem:[%s11721_s0 + $0x460] sm:$0xff]  }
 0x220   :  { %v3298_v61 = vadd.f32 %v10644_v57, %v8188_v59  ;;  %v3289_v1 = vpop.f32.mrb[163].mxu0  ;;  %8703 = vmatpush3.bf16.msra.mxu1 %v10548_v3  ;;  %v4855_v7 = vmax.f32 %v3295_v18, 0.0  ;;  %v10686_v18 = vpack.c.bf16 %v5116_v31, %v5115_v26  ;;  %v10692_v52 = vpack.c.bf16 %v5114_v33, %v5113_v30  ;;  %v4342_v24 = vpop.f32.mrb[45].mxu1 }
 0x221   :  { %v3290_v16 = vadd.f32 %v10644_v57, %v3289_v1  ;;  %8705 = vmatprep.subr.bf16.mxu1 %v8704_v28  ;;  %v4853_v51 = vmax.f32 %v3287_v58, 0.0  ;;  %v4343_v34 = vadd.f32 %v10644_v57, %v4342_v24 }
 0x222   :  { %v4856_v10 = vmax.f32 %v3298_v61, 0.0  ;;  %8294 = vmatmul.mubr.msk.bf16.gmra.mrb[12].mxu0 %vm1843_vm0, %v9279_v19 }
 0x223   :  { %v4854_v55 = vmax.f32 %v3290_v16, 0.0  ;;  %8297 = vmatprep.mubr.msk.bf16.mxu0 %vm1843_vm0, %v9280_v27  ;;  %v8452_v27 = vpop.f32.mrb[46].mxu1  ;;  %v4351_v16 = vadd.f32 %v10644_v57, %v8451_v49  ;;  %v5117_v20 = vmax.f32 %v4343_v34, 0.0 }
 0x224   :  { %v10659_v3 = vpack.c.bf16 %v4856_v10, %v4855_v7  ;;  %8707 = vmatpush3.bf16.msra.mxu1 %v10543_v62  ;;  %v4345_v1 = vpop.f32.mrb[47].mxu1  ;;  %v4354_v7 = vadd.f32 %v10644_v57, %v8452_v27 }
 0x225   :  { %v10668_v23 = vpack.c.bf16 %v4854_v55, %v4853_v51  ;;  %v8191_v25 = vpop.f32.mrb[164].mxu0  ;;  %v4346_v51 = vadd.f32 %v10644_v57, %v4345_v1  ;;  %v5119_v15 = vmax.f32 %v4351_v16, 0.0  ;;  %v8455_v30 = vpop.f32.mrb[48].mxu1  ;;  %v9285_v16 = vld [vmem:[%s11721_s0 + $0x468] sm:$0xff]  }
 0x226   :  { %v3311_v62 = vadd.f32 %v10644_v57, %v8191_v25  ;;  %v3302_v8 = vpop.f32.mrb[165].mxu0  ;;  %v5120_v21 = vmax.f32 %v4354_v7, 0.0 }
 0x227   :  { %v3303_v28 = vadd.f32 %v10644_v57, %v3302_v8  ;;  %v8192_v32 = vpop.f32.mrb[166].mxu0  ;;  %5634 = vmatmul.mubr.f32.vlgmr.msra.gmra.mrb[148].mxu1 %v5213_v22  ;;  %v9283_v22 = vld [vmem:[%s11721_s0 + $0x458] sm:$0xff]  }
 0x228   :  { %v3314_v37 = vadd.f32 %v10644_v57, %v8192_v32  ;;  %v3305_v43 = vpop.f32.mrb[167].mxu0  ;;  %5638 = vmatprep.mubr.f32.mxu1 %v5246_v29  ;;  %v4859_v58 = vmax.f32 %v3311_v62, 0.0  ;;  %v5118_v62 = vmax.f32 %v4346_v51, 0.0  ;;  %v10713_v26 = vpack.c.bf16 %v5120_v21, %v5119_v15  ;;  %v4358_v32 = vpop.f32.mrb[49].mxu1 }
 0x229   :  { %v3306_v19 = vadd.f32 %v10644_v57, %v3305_v43  ;;  %v4857_v60 = vmax.f32 %v3303_v28, 0.0  ;;  %v4359_v24 = vadd.f32 %v10644_v57, %v4358_v32 }
 0x22a   :  { %v4860_v59 = vmax.f32 %v3314_v37, 0.0  ;;  %8298 = vmatmul.mubr.msk.bf16.gmra.mrb[16].mxu0 %vm1843_vm0, %v9281_v0  ;;  %11729 = vst [vmem:[#allocation5_spill] sm:$0xff] %v10713_v26  ;;  %v10716_v28 = vpack.c.bf16 %v5118_v62, %v5117_v20  ;;  %v8456_v37 = vpop.f32.mrb[50].mxu1 }
 0x22b   :  { %v4858_v61 = vmax.f32 %v3306_v19, 0.0  ;;  %8301 = vmatprep.mubr.msk.bf16.mxu0 %vm1843_vm0, %v9282_v36  ;;  %5639 = vmatmul.mubr.f32.gmra.mrb[150].mxu1 %v5245_v56  ;;  %v4361_v49 = vpop.f32.mrb[51].mxu1  ;;  %v5121_v7 = vmax.f32 %v4359_v24, 0.0 }
 0x22c   :  { %v10696_v4 = vpack.c.bf16 %v4860_v59, %v4859_v58  ;;  %5708 = vmatprep.mubr.f32.mxu1 %v5216_v50  ;;  %v4367_v50 = vadd.f32 %v10644_v57, %v8455_v30  ;;  %v4370_v58 = vadd.f32 %v10644_v57, %v8456_v37 }
 0x22d   :  { %v10701_v10 = vpack.c.bf16 %v4858_v61, %v4857_v60  ;;  %v8195_v12 = vpop.f32.mrb[168].mxu0  ;;  %v4362_v60 = vadd.f32 %v10644_v57, %v4361_v49 }
 0x22e   :  { %v3327_v55 = vadd.f32 %v10644_v57, %v8195_v12  ;;  %v3318_v14 = vpop.f32.mrb[169].mxu0  ;;  %v5123_v34 = vmax.f32 %v4367_v50, 0.0  ;;  %v5124_v12 = vmax.f32 %v4370_v58, 0.0 }
 0x22f   :  { %v3319_v25 = vadd.f32 %v10644_v57, %v3318_v14  ;;  %v8196_v29 = vpop.f32.mrb[170].mxu0  ;;  %v9286_v14 = vld [vmem:[%s11721_s0 + $0x470] sm:$0xff]  }
 0x230   :  { %v3330_v8 = vadd.f32 %v10644_v57, %v8196_v29  ;;  %v3321_v0 = vpop.f32.mrb[171].mxu0  ;;  %v4863_v36 = vmax.f32 %v3327_v55, 0.0  ;;  %v10737_v21 = vpack.c.bf16 %v5124_v12, %v5123_v34  ;;  %v9288_v12 = vld [vmem:[%s11721_s0 + $0x480] sm:$0xff]  }
 0x231   :  { %v3322_v31 = vadd.f32 %v10644_v57, %v3321_v0  ;;  %v4861_v43 = vmax.f32 %v3319_v25, 0.0  ;;  %v8459_v25 = vpop.f32.mrb[52].mxu1 }
 0x232   :  { %v4864_v33 = vmax.f32 %v3330_v8, 0.0  ;;  %8302 = vmatmul.mubr.msk.bf16.gmra.mrb[20].mxu0 %vm1843_vm0, %v9283_v22  ;;  %v5122_v22 = vmax.f32 %v4362_v60, 0.0  ;;  %11730 = vst [vmem:[#allocation6_spill] sm:$0xff] %v10737_v21  ;;  %v4374_v62 = vpop.f32.mrb[53].mxu1  ;;  %v4383_v37 = vadd.f32 %v10644_v57, %v8459_v25  ;;  %v9287_v60 = vld [vmem:[%s11721_s0 + $0x478] sm:$0xff]  }
 0x233   :  { %v4862_v56 = vmax.f32 %v3322_v31, 0.0  ;;  %8305 = vmatprep.mubr.msk.bf16.mxu0 %vm1843_vm0, %v9284_v63  ;;  %v8460_v30 = vpop.f32.mrb[54].mxu1 }
 0x234   :  { %v10720_v19 = vpack.c.bf16 %v4864_v33, %v4863_v36  ;;  %v10740_v63 = vpack.c.bf16 %v5122_v22, %v5121_v7  ;;  %v4377_v36 = vpop.f32.mrb[55].mxu1 }
 0x235   :  { %v10725_v59 = vpack.c.bf16 %v4862_v56, %v4861_v43  ;;  %v8199_v27 = vpop.f32.mrb[172].mxu0  ;;  %v4375_v43 = vadd.f32 %v10644_v57, %v4374_v62  ;;  %v4386_v56 = vadd.f32 %v10644_v57, %v8460_v30  ;;  %v4378_v24 = vadd.f32 %v10644_v57, %v4377_v36 }
 0x236   :  { %v3343_v61 = vadd.f32 %v10644_v57, %v8199_v27  ;;  %v3334_v1 = vpop.f32.mrb[173].mxu0  ;;  %11731 = vst [vmem:[#allocation7_spill] sm:$0xff] %v10740_v63 }
 0x237   :  { %v3335_v51 = vadd.f32 %v10644_v57, %v3334_v1  ;;  %v8200_v55 = vpop.f32.mrb[174].mxu0  ;;  %v5125_v1 = vmax.f32 %v4375_v43, 0.0 }
 0x238   :  { %v3346_v15 = vadd.f32 %v10644_v57, %v8200_v55  ;;  %v3337_v20 = vpop.f32.mrb[175].mxu0  ;;  %v4867_v8 = vmax.f32 %v3343_v61, 0.0  ;;  %v5127_v61 = vmax.f32 %v4383_v37, 0.0 }
 0x239   :  { %v3338_v29 = vadd.f32 %v10644_v57, %v3337_v20  ;;  %v4865_v31 = vmax.f32 %v3335_v51, 0.0  ;;  %v5126_v51 = vmax.f32 %v4378_v24, 0.0 }
 0x23a   :  { %v4868_v0 = vmax.f32 %v3346_v15, 0.0  ;;  %8306 = vmatmul.mubr.msk.bf16.gmra.mrb[24].mxu0 %vm1843_vm0, %v9285_v16  ;;  %v5128_v16 = vmax.f32 %v4386_v56, 0.0  ;;  %v8463_v15 = vpop.f32.mrb[56].mxu1 }
 0x23b   :  { %v4866_v32 = vmax.f32 %v3338_v29, 0.0  ;;  %8309 = vmatprep.mubr.msk.bf16.mxu0 %vm1843_vm0, %v9286_v14  ;;  %v10764_v25 = vpack.c.bf16 %v5126_v51, %v5125_v1  ;;  %v4390_v29 = vpop.f32.mrb[57].mxu1  ;;  %v4399_v37 = vadd.f32 %v10644_v57, %v8463_v15  ;;  %v9290_v51 = vld [vmem:[%s11721_s0 + $0x490] sm:$0xff]  }
 0x23c   :  { %v10744_v33 = vpack.c.bf16 %v4868_v0, %v4867_v8  ;;  %v10761_v22 = vpack.c.bf16 %v5128_v16, %v5127_v61  ;;  %v8464_v0 = vpop.f32.mrb[58].mxu1  ;;  %v4391_v43 = vadd.f32 %v10644_v57, %v4390_v29  ;;  %v9289_v61 = vld [vmem:[%s11721_s0 + $0x488] sm:$0xff]  }
 0x23d   :  { %v10749_v49 = vpack.c.bf16 %v4866_v32, %v4865_v31  ;;  %v8203_v50 = vpop.f32.mrb[176].mxu0  ;;  %v4393_v32 = vpop.f32.mrb[59].mxu1  ;;  %v4402_v56 = vadd.f32 %v10644_v57, %v8464_v0  ;;  %v5131_v1 = vmax.f32 %v4399_v37, 0.0 }
 0x23e   :  { %v3359_v58 = vadd.f32 %v10644_v57, %v8203_v50  ;;  %v3350_v27 = vpop.f32.mrb[177].mxu0  ;;  %v5129_v16 = vmax.f32 %v4391_v43, 0.0  ;;  %v8467_v29 = vpop.f32.mrb[60].mxu1 }
 0x23f   :  { %v3351_v34 = vadd.f32 %v10644_v57, %v3350_v27  ;;  %v8204_v7 = vpop.f32.mrb[178].mxu0  ;;  %v4406_v0 = vpop.f32.mrb[61].mxu1 }
 0x240   :  { %v3362_v55 = vadd.f32 %v10644_v57, %v8204_v7  ;;  %v3353_v14 = vpop.f32.mrb[179].mxu0  ;;  %v4871_v62 = vmax.f32 %v3359_v58, 0.0  ;;  %v4394_v58 = vadd.f32 %v10644_v57, %v4393_v32  ;;  %v8468_v32 = vpop.f32.mrb[62].mxu1 }
 0x241   :  { %v3354_v20 = vadd.f32 %v10644_v57, %v3353_v14  ;;  %v4869_v30 = vmax.f32 %v3351_v34, 0.0  ;;  %v5132_v34 = vmax.f32 %v4402_v56, 0.0  ;;  %v4409_v56 = vpop.f32.mrb[63].mxu1 }
 0x242   :  { %v4872_v8 = vmax.f32 %v3362_v55, 0.0  ;;  %8310 = vmatmul.mubr.msk.bf16.gmra.mrb[28].mxu0 %vm1843_vm0, %v9287_v60  ;;  %v5130_v55 = vmax.f32 %v4394_v58, 0.0 }
 0x243   :  { %v4870_v31 = vmax.f32 %v3354_v20, 0.0  ;;  %8313 = vmatprep.mubr.msk.bf16.mxu0 %vm1843_vm0, %v9288_v12  ;;  %v10782_v20 = vpack.c.bf16 %v5132_v34, %v5131_v1 }
 0x244   :  { %v8712_v36 = vpack.c.bf16 %v4872_v8, %v4871_v62  ;;  %v10785_v8 = vpack.c.bf16 %v5130_v55, %v5129_v16  ;;  %v9291_v16 = vld [vmem:[%s11721_s0 + $0x498] sm:$0xff]   ;;  %v9292_v55 = vld [vmem:[%s11721_s0 + $0x4a0] sm:$0xff]  }
 0x245   :  { %v8708_v50 = vpack.c.bf16 %v4870_v31, %v4869_v30  ;;  %v8207_v24 = vpop.f32.mrb[180].mxu0 }
 0x246   :  { %v3375_v27 = vadd.f32 %v10644_v57, %v8207_v24  ;;  %v3366_v60 = vpop.f32.mrb[181].mxu0  ;;  %v4418_v24 = vadd.f32 %v10644_v57, %v8468_v32 }
 0x247   :  { %v3367_v7 = vadd.f32 %v10644_v57, %v3366_v60  ;;  %v8208_v12 = vpop.f32.mrb[182].mxu0  ;;  %8709 = vmatprep.subr.bf16.mxu1 %v8708_v50  ;;  %v4415_v50 = vadd.f32 %v10644_v57, %v8467_v29  ;;  %v4410_v60 = vadd.f32 %v10644_v57, %v4409_v56 }
 0x248   :  { %v3378_v14 = vadd.f32 %v10644_v57, %v8208_v12  ;;  %v3369_v15 = vpop.f32.mrb[183].mxu0  ;;  %8711 = vmatpush3.bf16.msra.mxu1 %v10668_v23  ;;  %v4875_v30 = vmax.f32 %v3375_v27, 0.0 }
 0x249   :  { %v3370_v62 = vadd.f32 %v10644_v57, %v3369_v15  ;;  %8713 = vmatprep.subr.bf16.mxu1 %v8712_v36  ;;  %v4873_v37 = vmax.f32 %v3367_v7, 0.0  ;;  %v4407_v36 = vadd.f32 %v10644_v57, %v4406_v0  ;;  %v5135_v34 = vmax.f32 %v4415_v50, 0.0  ;;  %v8471_v0 = vpop.f32.mrb[64].mxu1 }
 0x24a   :  { %v4876_v31 = vmax.f32 %v3378_v14, 0.0  ;;  %8314 = vmatmul.mubr.msk.bf16.gmra.mrb[32].mxu0 %vm1843_vm0, %v9289_v61  ;;  %v5134_v14 = vmax.f32 %v4410_v60, 0.0  ;;  %v4422_v32 = vpop.f32.mrb[65].mxu1 }
 0x24b   :  { %v4874_v43 = vmax.f32 %v3370_v62, 0.0  ;;  %8317 = vmatprep.mubr.msk.bf16.mxu0 %vm1843_vm0, %v9290_v51  ;;  %v5133_v7 = vmax.f32 %v4407_v36, 0.0  ;;  %v8472_v56 = vpop.f32.mrb[66].mxu1 }
 0x24c   :  { %v8720_v23 = vpack.c.bf16 %v4876_v31, %v4875_v30  ;;  %8715 = vmatpush3.bf16.msra.mxu1 %v10659_v3  ;;  %v5136_v3 = vmax.f32 %v4418_v24, 0.0  ;;  %v4425_v24 = vpop.f32.mrb[67].mxu1 }
 0x24d   :  { %v8716_v58 = vpack.c.bf16 %v4874_v43, %v4873_v37  ;;  %v8211_v27 = vpop.f32.mrb[184].mxu0  ;;  %v10807_v31 = vpack.c.bf16 %v5134_v14, %v5133_v7  ;;  %v9293_v7 = vld [vmem:[%s11721_s0 + $0x4a8] sm:$0xff]   ;;  %v9294_v14 = vld [vmem:[%s11721_s0 + $0x4b0] sm:$0xff]  }
 0x24e   :  { %v3391_v61 = vadd.f32 %v10644_v57, %v8211_v27  ;;  %v3382_v1 = vpop.f32.mrb[185].mxu0  ;;  %v10804_v62 = vpack.c.bf16 %v5136_v3, %v5135_v34  ;;  %v4434_v27 = vadd.f32 %v10644_v57, %v8472_v56 }
 0x24f   :  { %v3383_v12 = vadd.f32 %v10644_v57, %v3382_v1  ;;  %v8212_v51 = vpop.f32.mrb[186].mxu0  ;;  %8717 = vmatprep.subr.bf16.mxu1 %v8716_v58  ;;  %v4431_v58 = vadd.f32 %v10644_v57, %v8471_v0  ;;  %v4426_v1 = vadd.f32 %v10644_v57, %v4425_v24 }
 0x250   :  { %v3394_v15 = vadd.f32 %v10644_v57, %v8212_v51  ;;  %v3385_v29 = vpop.f32.mrb[187].mxu0  ;;  %8719 = vmatpush3.bf16.msra.mxu1 %v10701_v10  ;;  %v4879_v37 = vmax.f32 %v3391_v61, 0.0 }
 0x251   :  { %v3386_v30 = vadd.f32 %v10644_v57, %v3385_v29  ;;  %8721 = vmatprep.subr.bf16.mxu1 %v8720_v23  ;;  %v4877_v50 = vmax.f32 %v3383_v12, 0.0  ;;  %v4423_v23 = vadd.f32 %v10644_v57, %v4422_v32  ;;  %v5139_v3 = vmax.f32 %v4431_v58, 0.0  ;;  %v8475_v32 = vpop.f32.mrb[68].mxu1 }
 0x252   :  { %v4880_v43 = vmax.f32 %v3394_v15, 0.0  ;;  %8318 = vmatmul.mubr.msk.bf16.gmra.mrb[36].mxu0 %vm1843_vm0, %v9291_v16  ;;  %v5138_v15 = vmax.f32 %v4426_v1, 0.0  ;;  %v4438_v56 = vpop.f32.mrb[69].mxu1 }
 0x253   :  { %v4878_v36 = vmax.f32 %v3386_v30, 0.0  ;;  %8321 = vmatprep.mubr.msk.bf16.mxu0 %vm1843_vm0, %v9292_v55  ;;  %v5137_v12 = vmax.f32 %v4423_v23, 0.0  ;;  %v8476_v24 = vpop.f32.mrb[70].mxu1 }
 0x254   :  { %v8728_v10 = vpack.c.bf16 %v4880_v43, %v4879_v37  ;;  %8723 = vmatpush3.bf16.msra.mxu1 %v10696_v4  ;;  %v5140_v4 = vmax.f32 %v4434_v27, 0.0  ;;  %v4441_v27 = vpop.f32.mrb[71].mxu1 }
 0x255   :  { %v8724_v60 = vpack.c.bf16 %v4878_v36, %v4877_v50  ;;  %v8215_v61 = vpop.f32.mrb[188].mxu0  ;;  %v10829_v43 = vpack.c.bf16 %v5138_v15, %v5137_v12  ;;  %v9295_v12 = vld [vmem:[%s11721_s0 + $0x4b8] sm:$0xff]   ;;  %v9296_v15 = vld [vmem:[%s11721_s0 + $0x4c0] sm:$0xff]  }
 0x256   :  { %v3407_v16 = vadd.f32 %v10644_v57, %v8215_v61  ;;  %v3398_v34 = vpop.f32.mrb[189].mxu0  ;;  %v10826_v30 = vpack.c.bf16 %v5140_v4, %v5139_v3  ;;  %v4450_v61 = vadd.f32 %v10644_v57, %v8476_v24 }
 0x257   :  { %v3399_v51 = vadd.f32 %v10644_v57, %v3398_v34  ;;  %v8216_v55 = vpop.f32.mrb[190].mxu0  ;;  %8725 = vmatprep.subr.bf16.mxu1 %v8724_v60  ;;  %11733 = vst [vmem:[#allocation9_spill] sm:$0xff] %v10829_v43  ;;  %v4447_v60 = vadd.f32 %v10644_v57, %v8475_v32  ;;  %v4442_v34 = vadd.f32 %v10644_v57, %v4441_v27 }
 0x258   :  { %v3410_v29 = vadd.f32 %v10644_v57, %v8216_v55  ;;  %v3401_v0 = vpop.f32.mrb[191].mxu0  ;;  %8727 = vmatpush3.bf16.msra.mxu1 %v10725_v59  ;;  %11732 = vst [vmem:[#allocation8_spill] sm:$0xff] %v10826_v30  ;;  %v4883_v50 = vmax.f32 %v3407_v16, 0.0 }
 0x259   :  { %v3402_v37 = vadd.f32 %v10644_v57, %v3401_v0  ;;  %8729 = vmatprep.subr.bf16.mxu1 %v8728_v10  ;;  %v4881_v58 = vmax.f32 %v3399_v51, 0.0  ;;  %v4439_v10 = vadd.f32 %v10644_v57, %v4438_v56  ;;  %v5143_v4 = vmax.f32 %v4447_v60, 0.0  ;;  %v8479_v56 = vpop.f32.mrb[72].mxu1 }
 0x25a   :  { %v4884_v36 = vmax.f32 %v3410_v29, 0.0  ;;  %8322 = vmatmul.mubr.msk.bf16.gmra.mrb[40].mxu0 %vm1843_vm0, %v9293_v7  ;;  %v5142_v29 = vmax.f32 %v4442_v34, 0.0  ;;  %v4454_v24 = vpop.f32.mrb[73].mxu1 }
 0x25b   :  { %v4882_v23 = vmax.f32 %v3402_v37, 0.0  ;;  %8325 = vmatprep.mubr.msk.bf16.mxu0 %vm1843_vm0, %v9294_v14  ;;  %v5141_v51 = vmax.f32 %v4439_v10, 0.0  ;;  %v8480_v27 = vpop.f32.mrb[74].mxu1 }
 0x25c   :  { %v8736_v59 = vpack.c.bf16 %v4884_v36, %v4883_v50  ;;  %8731 = vmatpush3.bf16.msra.mxu1 %v10720_v19  ;;  %v5144_v19 = vmax.f32 %v4450_v61, 0.0  ;;  %v4457_v61 = vpop.f32.mrb[75].mxu1  ;;  %v4466_v34 = vadd.f32 %v10644_v57, %v8480_v27 }
 0x25d   :  { %v8732_v1 = vpack.c.bf16 %v4882_v23, %v4881_v58  ;;  %v8219_v16 = vpop.f32.mrb[192].mxu0  ;;  %v10851_v36 = vpack.c.bf16 %v5142_v29, %v5141_v51  ;;  %v8483_v27 = vpop.f32.mrb[76].mxu1 }
 0x25e   :  { %v3423_v7 = vadd.f32 %v10644_v57, %v8219_v16  ;;  %v3414_v3 = vpop.f32.mrb[193].mxu0  ;;  %v10848_v37 = vpack.c.bf16 %v5144_v19, %v5143_v4  ;;  %v4455_v16 = vadd.f32 %v10644_v57, %v4454_v24  ;;  %v4458_v4 = vadd.f32 %v10644_v57, %v4457_v61  ;;  %v9297_v19 = vld [vmem:[%s11721_s0 + $0x4c8] sm:$0xff]  }
 0x25f   :  { %v3415_v55 = vadd.f32 %v10644_v57, %v3414_v3  ;;  %v8220_v14 = vpop.f32.mrb[194].mxu0  ;;  %8733 = vmatprep.subr.bf16.mxu1 %v8732_v1  ;;  %11735 = vst [vmem:[#allocation11_spill] sm:$0xff] %v10851_v36  ;;  %v4463_v1 = vadd.f32 %v10644_v57, %v8479_v56 }
 0x260   :  { %v3426_v0 = vadd.f32 %v10644_v57, %v8220_v14  ;;  %v3417_v32 = vpop.f32.mrb[195].mxu0  ;;  %8735 = vmatpush3.bf16.msra.mxu1 %v10749_v49  ;;  %11734 = vst [vmem:[#allocation10_spill] sm:$0xff] %v10848_v37  ;;  %v4887_v58 = vmax.f32 %v3423_v7, 0.0  ;;  %v5145_v14 = vmax.f32 %v4455_v16, 0.0  ;;  %v5146_v56 = vmax.f32 %v4458_v4, 0.0 }
 0x261   :  { %v3418_v50 = vadd.f32 %v10644_v57, %v3417_v32  ;;  %8737 = vmatprep.subr.bf16.mxu1 %v8736_v59  ;;  %v4885_v60 = vmax.f32 %v3415_v55, 0.0  ;;  %v5215_v59 = vld [vmem:[%s11722_s1 + $0x50] sm:$0xff]  ;;  %v5147_v55 = vmax.f32 %v4463_v1, 0.0 }
 0x262   :  { %v4888_v23 = vmax.f32 %v3426_v0, 0.0  ;;  %8326 = vmatmul.mubr.msk.bf16.gmra.mrb[44].mxu0 %vm1843_vm0, %v9295_v12  ;;  %v5248_v12 = vld [vmem:[%s11722_s1 + $0x158] sm:$0xff]  ;;  %v9298_v32 = vld [vmem:[%s11721_s0 + $0x4d0] sm:$0xff]   ;;  %v10888_v61 = vpack.c.bf16 %v5146_v56, %v5145_v14 }
 0x263   :  { %v4886_v10 = vmax.f32 %v3418_v50, 0.0  ;;  %8329 = vmatprep.mubr.msk.bf16.mxu0 %vm1843_vm0, %v9296_v15  ;;  %v5148_v15 = vmax.f32 %v4466_v34, 0.0 }
 0x264   :  { %v10855_v49 = vpack.c.bf16 %v4888_v23, %v4887_v58  ;;  %8739 = vmatpush3.bf16.msra.mxu1 %v10744_v33  ;;  %v5247_v58 = vld [vmem:[%s11722_s1 + $0x150] sm:$0xff]  ;;  %11737 = vst [vmem:[#allocation13_spill] sm:$0xff] %v10888_v61 }
 0x265   :  { %v10864_v7 = vpack.c.bf16 %v4886_v10, %v4885_v60  ;;  %v8223_v3 = vpop.f32.mrb[196].mxu0  ;;  %v10882_v23 = vpack.c.bf16 %v5148_v15, %v5147_v55  ;;  %v5218_v10 = vld [vmem:[%s11722_s1 + $0x68] sm:$0xff]  ;;  %v4479_v55 = vadd.f32 %v10644_v57, %v8483_v27 }
 0x266   :  { %v3439_v33 = vadd.f32 %v10644_v57, %v8223_v3  ;;  %v3430_v51 = vpop.f32.mrb[197].mxu0 }
 0x267   :  { %v3431_v29 = vadd.f32 %v10644_v57, %v3430_v51  ;;  %v8224_v0 = vpop.f32.mrb[198].mxu0  ;;  %5709 = vmatmul.mubr.f32.vlgmr.msra.gmra.mrb[152].mxu1 %v5215_v59  ;;  %11736 = vst [vmem:[#allocation12_spill] sm:$0xff] %v10882_v23  ;;  %v4470_v59 = vpop.f32.mrb[77].mxu1 }
 0x268   :  { %v3442_v50 = vadd.f32 %v10644_v57, %v8224_v0  ;;  %v3433_v24 = vpop.f32.mrb[199].mxu0  ;;  %5713 = vmatprep.mubr.f32.mxu1 %v5248_v12  ;;  %v4891_v1 = vmax.f32 %v3439_v33, 0.0  ;;  %v8484_v34 = vpop.f32.mrb[78].mxu1  ;;  %v4471_v14 = vadd.f32 %v10644_v57, %v4470_v59 }
 0x269   :  { %v3434_v60 = vadd.f32 %v10644_v57, %v3433_v24  ;;  %v4889_v3 = vmax.f32 %v3431_v29, 0.0  ;;  %v4473_v4 = vpop.f32.mrb[79].mxu1  ;;  %v4482_v15 = vadd.f32 %v10644_v57, %v8484_v34 }
 0x26a   :  { %v4892_v16 = vmax.f32 %v3442_v50, 0.0  ;;  %8330 = vmatmul.mubr.msk.bf16.gmra.mrb[48].mxu0 %vm1843_vm0, %v9297_v19  ;;  %v4474_v19 = vadd.f32 %v10644_v57, %v4473_v4  ;;  %v5151_v50 = vmax.f32 %v4479_v55, 0.0  ;;  %v5149_v24 = vmax.f32 %v4471_v14, 0.0 }
 0x26b   :  { %v4890_v12 = vmax.f32 %v3434_v60, 0.0  ;;  %8333 = vmatprep.mubr.msk.bf16.mxu0 %vm1843_vm0, %v9298_v32  ;;  %5714 = vmatmul.mubr.f32.gmra.mrb[154].mxu1 %v5247_v58  ;;  %v9299_v32 = vld [vmem:[%s11721_s0 + $0x4d8] sm:$0xff]   ;;  %v5152_v58 = vmax.f32 %v4482_v15, 0.0 }
 0x26c   :  { %v10892_v51 = vpack.c.bf16 %v4892_v16, %v4891_v1  ;;  %5783 = vmatprep.mubr.f32.mxu1 %v5218_v10  ;;  %v9300_v10 = vld [vmem:[%s11721_s0 + $0x4e0] sm:$0xff]   ;;  %v5150_v59 = vmax.f32 %v4474_v19, 0.0 }
 0x26d   :  { %v10897_v33 = vpack.c.bf16 %v4890_v12, %v4889_v3  ;;  %v8227_v0 = vpop.f32.mrb[200].mxu0  ;;  %v10909_v34 = vpack.c.bf16 %v5152_v58, %v5151_v50  ;;  %v8487_v3 = vpop.f32.mrb[80].mxu1 }
 0x26e   :  { %v3455_v29 = vadd.f32 %v10644_v57, %v8227_v0  ;;  %v3446_v56 = vpop.f32.mrb[201].mxu0  ;;  %v10912_v4 = vpack.c.bf16 %v5150_v59, %v5149_v24  ;;  %v4486_v55 = vpop.f32.mrb[81].mxu1  ;;  %v4495_v50 = vadd.f32 %v10644_v57, %v8487_v3 }
 0x26f   :  { %v3447_v27 = vadd.f32 %v10644_v57, %v3446_v56  ;;  %v8228_v60 = vpop.f32.mrb[202].mxu0  ;;  %11738 = vst [vmem:[#allocation14_spill] sm:$0xff] %v10909_v34  ;;  %v8488_v0 = vpop.f32.mrb[82].mxu1  ;;  %v4487_v58 = vadd.f32 %v10644_v57, %v4486_v55 }
 0x270   :  { %v3458_v1 = vadd.f32 %v10644_v57, %v8228_v60  ;;  %v3449_v16 = vpop.f32.mrb[203].mxu0  ;;  %11739 = vst [vmem:[#allocation15_spill] sm:$0xff] %v10912_v4  ;;  %v4895_v14 = vmax.f32 %v3455_v29, 0.0  ;;  %v4489_v19 = vpop.f32.mrb[83].mxu1  ;;  %v4498_v24 = vadd.f32 %v10644_v57, %v8488_v0 }
 0x271   :  { %v3450_v12 = vadd.f32 %v10644_v57, %v3449_v16  ;;  %v4893_v56 = vmax.f32 %v3447_v27, 0.0  ;;  %v5155_v16 = vmax.f32 %v4495_v50, 0.0 }
 0x272   :  { %v4896_v15 = vmax.f32 %v3458_v1, 0.0  ;;  %8334 = vmatmul.mubr.msk.bf16.gmra.mrb[52].mxu0 %vm1843_vm0, %v9299_v32  ;;  %v4490_v1 = vadd.f32 %v10644_v57, %v4489_v19 }
 0x273   :  { %v4894_v23 = vmax.f32 %v3450_v12, 0.0  ;;  %8337 = vmatprep.mubr.msk.bf16.mxu0 %vm1843_vm0, %v9300_v10  ;;  %v9301_v10 = vld [vmem:[%s11721_s0 + $0x4e8] sm:$0xff]   ;;  %v5153_v12 = vmax.f32 %v4487_v58, 0.0 }
 0x274   :  { %v10916_v60 = vpack.c.bf16 %v4896_v15, %v4895_v14  ;;  %v5156_v14 = vmax.f32 %v4498_v24, 0.0  ;;  %v5154_v15 = vmax.f32 %v4490_v1, 0.0 }
 0x275   :  { %v10921_v59 = vpack.c.bf16 %v4894_v23, %v4893_v56  ;;  %v8231_v29 = vpop.f32.mrb[204].mxu0  ;;  %v9302_v23 = vld [vmem:[%s11721_s0 + $0x4f0] sm:$0xff]  }
 0x276   :  { %v3471_v32 = vadd.f32 %v10644_v57, %v8231_v29  ;;  %v3462_v27 = vpop.f32.mrb[205].mxu0  ;;  %v10933_v19 = vpack.c.bf16 %v5156_v14, %v5155_v16  ;;  %v8491_v29 = vpop.f32.mrb[84].mxu1  ;;  %v10936_v4 = vpack.c.bf16 %v5154_v15, %v5153_v12 }
 0x277   :  { %v3463_v3 = vadd.f32 %v10644_v57, %v3462_v27  ;;  %v8232_v55 = vpop.f32.mrb[206].mxu0  ;;  %v4502_v50 = vpop.f32.mrb[85].mxu1  ;;  %v4511_v16 = vadd.f32 %v10644_v57, %v8491_v29 }
 0x278   :  { %v3474_v0 = vadd.f32 %v10644_v57, %v8232_v55  ;;  %v3465_v56 = vpop.f32.mrb[207].mxu0  ;;  %11740 = vst [vmem:[#allocation16_spill] sm:$0xff] %v10933_v19  ;;  %11741 = vst [vmem:[#allocation17_spill] sm:$0xff] %v10936_v4  ;;  %v4899_v58 = vmax.f32 %v3471_v32, 0.0  ;;  %v8492_v27 = vpop.f32.mrb[86].mxu1  ;;  %v4503_v14 = vadd.f32 %v10644_v57, %v4502_v50 }
 0x279   :  { %v3466_v34 = vadd.f32 %v10644_v57, %v3465_v56  ;;  %v4897_v61 = vmax.f32 %v3463_v3, 0.0  ;;  %v4505_v1 = vpop.f32.mrb[87].mxu1  ;;  %v4514_v12 = vadd.f32 %v10644_v57, %v8492_v27 }
 0x27a   :  { %v4900_v24 = vmax.f32 %v3474_v0, 0.0  ;;  %8338 = vmatmul.mubr.msk.bf16.gmra.mrb[56].mxu0 %vm1843_vm0, %v9301_v10  ;;  %v4506_v0 = vadd.f32 %v10644_v57, %v4505_v1  ;;  %v5157_v56 = vmax.f32 %v4503_v14, 0.0 }
 0x27b   :  { %v4898_v37 = vmax.f32 %v3466_v34, 0.0  ;;  %8341 = vmatprep.mubr.msk.bf16.mxu0 %vm1843_vm0, %v9302_v23  ;;  %v9303_v34 = vld [vmem:[%s11721_s0 + $0x4f8] sm:$0xff]   ;;  %v5159_v23 = vmax.f32 %v4511_v16, 0.0 }
 0x27c   :  { %v10940_v55 = vpack.c.bf16 %v4900_v24, %v4899_v58  ;;  %v5160_v58 = vmax.f32 %v4514_v12, 0.0 }
 0x27d   :  { %v10945_v15 = vpack.c.bf16 %v4898_v37, %v4897_v61  ;;  %v8235_v32 = vpop.f32.mrb[208].mxu0  ;;  %v9304_v37 = vld [vmem:[%s11721_s0 + $0x500] sm:$0xff]   ;;  %v5158_v61 = vmax.f32 %v4506_v0, 0.0 }
 0x27e   :  { %v3487_v10 = vadd.f32 %v10644_v57, %v8235_v32  ;;  %v3478_v3 = vpop.f32.mrb[209].mxu0  ;;  %v10957_v1 = vpack.c.bf16 %v5160_v58, %v5159_v23  ;;  %v8495_v32 = vpop.f32.mrb[88].mxu1 }
 0x27f   :  { %v3479_v29 = vadd.f32 %v10644_v57, %v3478_v3  ;;  %v8236_v50 = vpop.f32.mrb[210].mxu0  ;;  %v10960_v4 = vpack.c.bf16 %v5158_v61, %v5157_v56  ;;  %v4518_v16 = vpop.f32.mrb[89].mxu1  ;;  %v4527_v23 = vadd.f32 %v10644_v57, %v8495_v32 }
 0x280   :  { %v3490_v24 = vadd.f32 %v10644_v57, %v8236_v50  ;;  %v3481_v27 = vpop.f32.mrb[211].mxu0  ;;  %11742 = vst [vmem:[#allocation18_spill] sm:$0xff] %v10957_v1  ;;  %v4903_v14 = vmax.f32 %v3487_v10, 0.0  ;;  %v8496_v3 = vpop.f32.mrb[90].mxu1  ;;  %v4519_v58 = vadd.f32 %v10644_v57, %v4518_v16 }
 0x281   :  { %v3482_v19 = vadd.f32 %v10644_v57, %v3481_v27  ;;  %11743 = vst [vmem:[#allocation19_spill] sm:$0xff] %v10960_v4  ;;  %v4901_v36 = vmax.f32 %v3479_v29, 0.0  ;;  %v4521_v0 = vpop.f32.mrb[91].mxu1  ;;  %v4530_v27 = vadd.f32 %v10644_v57, %v8496_v3  ;;  %v5163_v29 = vmax.f32 %v4527_v23, 0.0 }
 0x282   :  { %v4904_v12 = vmax.f32 %v3490_v24, 0.0  ;;  %8342 = vmatmul.mubr.msk.bf16.gmra.mrb[60].mxu0 %vm1843_vm0, %v9303_v34  ;;  %v4522_v10 = vadd.f32 %v10644_v57, %v4521_v0 }
 0x283   :  { %v4902_v21 = vmax.f32 %v3482_v19, 0.0  ;;  %8345 = vmatprep.mubr.msk.bf16.mxu0 %vm1843_vm0, %v9304_v37  ;;  %v9305_v19 = vld [vmem:[%s11721_s0 + $0x508] sm:$0xff]   ;;  %v5161_v37 = vmax.f32 %v4519_v58, 0.0 }
 0x284   :  { %v8744_v50 = vpack.c.bf16 %v4904_v12, %v4903_v14  ;;  %v5164_v14 = vmax.f32 %v4530_v27, 0.0 }
 0x285   :  { %v8740_v56 = vpack.c.bf16 %v4902_v21, %v4901_v36  ;;  %v8239_v61 = vpop.f32.mrb[212].mxu0  ;;  %v9306_v21 = vld [vmem:[%s11721_s0 + $0x510] sm:$0xff]   ;;  %v5162_v36 = vmax.f32 %v4522_v10, 0.0 }
 0x286   :  { %v3503_v24 = vadd.f32 %v10644_v57, %v8239_v61  ;;  %v3494_v34 = vpop.f32.mrb[213].mxu0  ;;  %v10978_v0 = vpack.c.bf16 %v5164_v14, %v5163_v29  ;;  %v8499_v61 = vpop.f32.mrb[92].mxu1 }
 0x287   :  { %v3495_v32 = vadd.f32 %v10644_v57, %v3494_v34  ;;  %v8240_v12 = vpop.f32.mrb[214].mxu0  ;;  %8741 = vmatprep.subr.bf16.mxu1 %v8740_v56  ;;  %v10981_v58 = vpack.c.bf16 %v5162_v36, %v5161_v37  ;;  %v4534_v27 = vpop.f32.mrb[93].mxu1  ;;  %v4543_v29 = vadd.f32 %v10644_v57, %v8499_v61 }
 0x288   :  { %v3506_v16 = vadd.f32 %v10644_v57, %v8240_v12  ;;  %v3497_v3 = vpop.f32.mrb[215].mxu0  ;;  %8743 = vmatpush3.bf16.msra.mxu1 %v10864_v7  ;;  %11744 = vst [vmem:[#allocation20_spill] sm:$0xff] %v10978_v0  ;;  %v4907_v56 = vmax.f32 %v3503_v24, 0.0  ;;  %v8500_v1 = vpop.f32.mrb[94].mxu1 }
 0x289   :  { %v3498_v23 = vadd.f32 %v10644_v57, %v3497_v3  ;;  %8745 = vmatprep.subr.bf16.mxu1 %v8744_v50  ;;  %11745 = vst [vmem:[#allocation21_spill] sm:$0xff] %v10981_v58  ;;  %v4905_v10 = vmax.f32 %v3495_v32, 0.0  ;;  %v4537_v12 = vpop.f32.mrb[95].mxu1  ;;  %v4535_v50 = vadd.f32 %v10644_v57, %v4534_v27  ;;  %v4546_v37 = vadd.f32 %v10644_v57, %v8500_v1 }
 0x28a   :  { %v4908_v34 = vmax.f32 %v3506_v16, 0.0  ;;  %8346 = vmatmul.mubr.msk.bf16.gmra.mrb[64].mxu0 %vm1843_vm0, %v9305_v19  ;;  %v4538_v36 = vadd.f32 %v10644_v57, %v4537_v12  ;;  %v5167_v16 = vmax.f32 %v4543_v29, 0.0 }
 0x28b   :  { %v4906_v4 = vmax.f32 %v3498_v23, 0.0  ;;  %8349 = vmatprep.mubr.msk.bf16.mxu0 %vm1843_vm0, %v9306_v21  ;;  %v9307_v21 = vld [vmem:[%s11721_s0 + $0x518] sm:$0xff]   ;;  %v5165_v3 = vmax.f32 %v4535_v50, 0.0 }
 0x28c   :  { %v8752_v7 = vpack.c.bf16 %v4908_v34, %v4907_v56  ;;  %8747 = vmatpush3.bf16.msra.mxu1 %v10855_v49  ;;  %v5168_v49 = vmax.f32 %v4546_v37, 0.0  ;;  %v5166_v1 = vmax.f32 %v4538_v36, 0.0 }
 0x28d   :  { %v8748_v14 = vpack.c.bf16 %v4906_v4, %v4905_v10  ;;  %v8243_v24 = vpop.f32.mrb[216].mxu0  ;;  %v9308_v4 = vld [vmem:[%s11721_s0 + $0x520] sm:$0xff]   ;;  %v8503_v10 = vpop.f32.mrb[96].mxu1 }
 0x28e   :  { %v3519_v19 = vadd.f32 %v10644_v57, %v8243_v24  ;;  %v3510_v32 = vpop.f32.mrb[217].mxu0  ;;  %v11000_v34 = vpack.c.bf16 %v5168_v49, %v5167_v16  ;;  %v11003_v29 = vpack.c.bf16 %v5166_v1, %v5165_v3  ;;  %v4550_v50 = vpop.f32.mrb[97].mxu1 }
 0x28f   :  { %v3511_v61 = vadd.f32 %v10644_v57, %v3510_v32  ;;  %v8244_v23 = vpop.f32.mrb[218].mxu0  ;;  %8749 = vmatprep.subr.bf16.mxu1 %v8748_v14  ;;  %v8504_v24 = vpop.f32.mrb[98].mxu1 }
 0x290   :  { %v3522_v27 = vadd.f32 %v10644_v57, %v8244_v23  ;;  %v3513_v56 = vpop.f32.mrb[219].mxu0  ;;  %8751 = vmatpush3.bf16.msra.mxu1 %v10897_v33  ;;  %11746 = vst [vmem:[#allocation22_spill] sm:$0xff] %v11000_v34  ;;  %11747 = vst [vmem:[#allocation23_spill] sm:$0xff] %v11003_v29  ;;  %v4911_v37 = vmax.f32 %v3519_v19, 0.0  ;;  %v4553_v23 = vpop.f32.mrb[99].mxu1 }
 0x291   :  { %v3514_v12 = vadd.f32 %v10644_v57, %v3513_v56  ;;  %8753 = vmatprep.subr.bf16.mxu1 %v8752_v7  ;;  %v4909_v36 = vmax.f32 %v3511_v61, 0.0  ;;  %v11011_v57 = vld [vmem:[%s11724_s3] ss:$0 sm:$0xff] }
 0x292   :  { %v4912_v14 = vmax.f32 %v3522_v27, 0.0  ;;  %8350 = vmatmul.mubr.msk.bf16.gmra.mrb[68].mxu0 %vm1843_vm0, %v9307_v21  ;;  %v4559_v7 = vadd.f32 %v11011_v57, %v8503_v10  ;;  %v4551_v19 = vadd.f32 %v11011_v57, %v4550_v50  ;;  %v4562_v21 = vadd.f32 %v11011_v57, %v8504_v24  ;;  %v9310_v50 = vld [vmem:[%s11721_s0 + $0x530] sm:$0xff]  }
 0x293   :  { %v4910_v32 = vmax.f32 %v3514_v12, 0.0  ;;  %8353 = vmatprep.mubr.msk.bf16.mxu0 %vm1843_vm0, %v9308_v4  ;;  %v4554_v49 = vadd.f32 %v11011_v57, %v4553_v23 }
 0x294   :  { %v8760_v33 = vpack.c.bf16 %v4912_v14, %v4911_v37  ;;  %8755 = vmatpush3.bf16.msra.mxu1 %v10892_v51  ;;  %v9309_v51 = vld [vmem:[%s11721_s0 + $0x528] sm:$0xff]   ;;  %v5171_v1 = vmax.f32 %v4559_v7, 0.0  ;;  %v5169_v27 = vmax.f32 %v4551_v19, 0.0  ;;  %v5172_v56 = vmax.f32 %v4562_v21, 0.0 }
 0x295   :  { %v8756_v16 = vpack.c.bf16 %v4910_v32, %v4909_v36  ;;  %v8247_v3 = vpop.f32.mrb[220].mxu0  ;;  %v5170_v37 = vmax.f32 %v4554_v49, 0.0  ;;  %v8507_v32 = vpop.f32.mrb[100].mxu1 }
 0x296   :  { %v3535_v61 = vadd.f32 %v11011_v57, %v8247_v3  ;;  %v3526_v4 = vpop.f32.mrb[221].mxu0  ;;  %v11027_v36 = vpack.c.bf16 %v5172_v56, %v5171_v1  ;;  %v4566_v19 = vpop.f32.mrb[101].mxu1  ;;  %v4575_v1 = vadd.f32 %v11011_v57, %v8507_v32 }
 0x297   :  { %v3527_v10 = vadd.f32 %v11011_v57, %v3526_v4  ;;  %v8248_v12 = vpop.f32.mrb[222].mxu0  ;;  %8757 = vmatprep.subr.bf16.mxu1 %v8756_v16  ;;  %v11030_v7 = vpack.c.bf16 %v5170_v37, %v5169_v27  ;;  %v8508_v3 = vpop.f32.mrb[102].mxu1 }
 0x298   :  { %v3538_v14 = vadd.f32 %v11011_v57, %v8248_v12  ;;  %v3529_v24 = vpop.f32.mrb[223].mxu0  ;;  %8759 = vmatpush3.bf16.msra.mxu1 %v10921_v59  ;;  %11748 = vst [vmem:[#allocation24_spill] sm:$0xff] %v11027_v36  ;;  %v4915_v21 = vmax.f32 %v3535_v61, 0.0  ;;  %v4569_v12 = vpop.f32.mrb[103].mxu1  ;;  %v4578_v27 = vadd.f32 %v11011_v57, %v8508_v3 }
 0x299   :  { %v3530_v23 = vadd.f32 %v11011_v57, %v3529_v24  ;;  %8761 = vmatprep.subr.bf16.mxu1 %v8760_v33  ;;  %11749 = vst [vmem:[#allocation25_spill] sm:$0xff] %v11030_v7  ;;  %v4913_v49 = vmax.f32 %v3527_v10, 0.0  ;;  %v4567_v33 = vadd.f32 %v11011_v57, %v4566_v19  ;;  %v4570_v37 = vadd.f32 %v11011_v57, %v4569_v12  ;;  %v9312_v19 = vld [vmem:[%s11721_s0 + $0x540] sm:$0xff]  }
 0x29a   :  { %v4916_v16 = vmax.f32 %v3538_v14, 0.0  ;;  %8354 = vmatmul.mubr.msk.bf16.gmra.mrb[72].mxu0 %vm1843_vm0, %v9309_v51  ;;  %v5175_v14 = vmax.f32 %v4575_v1, 0.0 }
 0x29b   :  { %v4914_v4 = vmax.f32 %v3530_v23, 0.0  ;;  %8357 = vmatprep.mubr.msk.bf16.mxu0 %vm1843_vm0, %v9310_v50  ;;  %v9311_v50 = vld [vmem:[%s11721_s0 + $0x538] sm:$0xff]   ;;  %v5173_v24 = vmax.f32 %v4567_v33, 0.0 }
 0x29c   :  { %v8768_v59 = vpack.c.bf16 %v4916_v16, %v4915_v21  ;;  %8763 = vmatpush3.bf16.msra.mxu1 %v10916_v60  ;;  %v5176_v60 = vmax.f32 %v4578_v27, 0.0  ;;  %v5174_v21 = vmax.f32 %v4570_v37, 0.0 }
 0x29d   :  { %v8764_v56 = vpack.c.bf16 %v4914_v4, %v4913_v49  ;;  %v8251_v61 = vpop.f32.mrb[224].mxu0  ;;  %v8511_v4 = vpop.f32.mrb[104].mxu1 }
 0x29e   :  { %v3551_v51 = vadd.f32 %v11011_v57, %v8251_v61  ;;  %v3542_v10 = vpop.f32.mrb[225].mxu0  ;;  %v11049_v49 = vpack.c.bf16 %v5176_v60, %v5175_v14  ;;  %v11052_v1 = vpack.c.bf16 %v5174_v21, %v5173_v24  ;;  %v4582_v33 = vpop.f32.mrb[105].mxu1  ;;  %v4591_v14 = vadd.f32 %v11011_v57, %v8511_v4 }
 0x29f   :  { %v3543_v32 = vadd.f32 %v11011_v57, %v3542_v10  ;;  %v8252_v23 = vpop.f32.mrb[226].mxu0  ;;  %8765 = vmatprep.subr.bf16.mxu1 %v8764_v56  ;;  %v8512_v61 = vpop.f32.mrb[106].mxu1 }
 0x2a0   :  { %v3554_v16 = vadd.f32 %v11011_v57, %v8252_v23  ;;  %v3545_v3 = vpop.f32.mrb[227].mxu0  ;;  %8767 = vmatpush3.bf16.msra.mxu1 %v10945_v15  ;;  %11750 = vst [vmem:[#allocation26_spill] sm:$0xff] %v11049_v49  ;;  %11751 = vst [vmem:[#allocation27_spill] sm:$0xff] %v11052_v1  ;;  %v4919_v27 = vmax.f32 %v3551_v51, 0.0  ;;  %v4585_v23 = vpop.f32.mrb[107].mxu1  ;;  %v4583_v51 = vadd.f32 %v11011_v57, %v4582_v33 }
 0x2a1   :  { %v3546_v12 = vadd.f32 %v11011_v57, %v3545_v3  ;;  %8769 = vmatprep.subr.bf16.mxu1 %v8768_v59  ;;  %v4917_v37 = vmax.f32 %v3543_v32, 0.0  ;;  %v5217_v59 = vld [vmem:[%s11722_s1 + $0x60] sm:$0xff]  ;;  %v5250_v32 = vld [vmem:[%s11722_s1 + $0x168] sm:$0xff]  ;;  %v5179_v3 = vmax.f32 %v4591_v14, 0.0 }
 0x2a2   :  { %v4920_v56 = vmax.f32 %v3554_v16, 0.0  ;;  %8358 = vmatmul.mubr.msk.bf16.gmra.mrb[76].mxu0 %vm1843_vm0, %v9311_v50  ;;  %v4594_v50 = vadd.f32 %v11011_v57, %v8512_v61  ;;  %v9313_v16 = vld [vmem:[%s11721_s0 + $0x548] sm:$0xff]   ;;  %v5177_v4 = vmax.f32 %v4583_v51, 0.0  ;;  %v8515_v51 = vpop.f32.mrb[108].mxu1 }
 0x2a3   :  { %v4918_v10 = vmax.f32 %v3546_v12, 0.0  ;;  %8361 = vmatprep.mubr.msk.bf16.mxu0 %vm1843_vm0, %v9312_v19  ;;  %v4586_v19 = vadd.f32 %v11011_v57, %v4585_v23  ;;  %v5249_v23 = vld [vmem:[%s11722_s1 + $0x160] sm:$0xff] }
 0x2a4   :  { %v11056_v15 = vpack.c.bf16 %v4920_v56, %v4919_v27  ;;  %8771 = vmatpush3.bf16.msra.mxu1 %v10940_v55  ;;  %v5180_v12 = vmax.f32 %v4594_v50, 0.0  ;;  %v9314_v56 = vld [vmem:[%s11721_s0 + $0x550] sm:$0xff]  }
 0x2a5   :  { %v11065_v24 = vpack.c.bf16 %v4918_v10, %v4917_v37  ;;  %v8255_v60 = vpop.f32.mrb[228].mxu0  ;;  %v5178_v61 = vmax.f32 %v4586_v19, 0.0  ;;  %v4598_v19 = vpop.f32.mrb[109].mxu1 }
 0x2a6   :  { %v3567_v55 = vadd.f32 %v11011_v57, %v8255_v60  ;;  %v3558_v21 = vpop.f32.mrb[229].mxu0  ;;  %v11083_v14 = vpack.c.bf16 %v5180_v12, %v5179_v3 }
 0x2a7   :  { %v3559_v33 = vadd.f32 %v11011_v57, %v3558_v21  ;;  %v8256_v27 = vpop.f32.mrb[230].mxu0  ;;  %5784 = vmatmul.mubr.f32.vlgmr.msra.gmra.mrb[156].mxu1 %v5217_v59  ;;  %v5220_v59 = vld [vmem:[%s11722_s1 + $0x78] sm:$0xff]  ;;  %v11089_v60 = vpack.c.bf16 %v5178_v61, %v5177_v4  ;;  %v4599_v4 = vadd.f32 %v11011_v57, %v4598_v19 }
 0x2a8   :  { %v3570_v37 = vadd.f32 %v11011_v57, %v8256_v27  ;;  %v3561_v10 = vpop.f32.mrb[231].mxu0  ;;  %5788 = vmatprep.mubr.f32.mxu1 %v5250_v32  ;;  %11752 = vst [vmem:[#allocation28_spill] sm:$0xff] %v11083_v14  ;;  %v4923_v21 = vmax.f32 %v3567_v55, 0.0  ;;  %v8516_v32 = vpop.f32.mrb[110].mxu1 }
 0x2a9   :  { %v3562_v50 = vadd.f32 %v11011_v57, %v3561_v10  ;;  %11753 = vst [vmem:[#allocation29_spill] sm:$0xff] %v11089_v60  ;;  %v4921_v49 = vmax.f32 %v3559_v33, 0.0  ;;  %v4601_v3 = vpop.f32.mrb[111].mxu1  ;;  %v4607_v10 = vadd.f32 %v11011_v57, %v8515_v51  ;;  %v4610_v61 = vadd.f32 %v11011_v57, %v8516_v32 }
 0x2aa   :  { %v4924_v27 = vmax.f32 %v3570_v37, 0.0  ;;  %8362 = vmatmul.mubr.msk.bf16.gmra.mrb[80].mxu0 %vm1843_vm0, %v9313_v16  ;;  %v4602_v16 = vadd.f32 %v11011_v57, %v4601_v3 }
 0x2ab   :  { %v4922_v1 = vmax.f32 %v3562_v50, 0.0  ;;  %5789 = vmatmul.mubr.f32.gmra.mrb[158].mxu1 %v5249_v23  ;;  %8365 = vmatprep.mubr.msk.bf16.mxu0 %vm1843_vm0, %v9314_v56  ;;  %v9315_v56 = vld [vmem:[%s11721_s0 + $0x558] sm:$0xff]   ;;  %v5183_v50 = vmax.f32 %v4607_v10, 0.0 }
 0x2ac   :  { %v11093_v12 = vpack.c.bf16 %v4924_v27, %v4923_v21  ;;  %5858 = vmatprep.mubr.f32.mxu1 %v5220_v59  ;;  %v5181_v59 = vmax.f32 %v4599_v4, 0.0  ;;  %v5184_v21 = vmax.f32 %v4610_v61, 0.0 }
 0x2ad   :  { %v11098_v55 = vpack.c.bf16 %v4922_v1, %v4921_v49  ;;  %v8259_v37 = vpop.f32.mrb[232].mxu0  ;;  %v9316_v49 = vld [vmem:[%s11721_s0 + $0x560] sm:$0xff]   ;;  %v5182_v1 = vmax.f32 %v4602_v16, 0.0 }
 0x2ae   :  { %v3583_v33 = vadd.f32 %v11011_v57, %v8259_v37  ;;  %v3574_v23 = vpop.f32.mrb[233].mxu0  ;;  %v11110_v3 = vpack.c.bf16 %v5184_v21, %v5183_v50  ;;  %v8519_v37 = vpop.f32.mrb[112].mxu1 }
 0x2af   :  { %v3575_v51 = vadd.f32 %v11011_v57, %v3574_v23  ;;  %v8260_v19 = vpop.f32.mrb[234].mxu0  ;;  %v11113_v60 = vpack.c.bf16 %v5182_v1, %v5181_v59  ;;  %v4614_v10 = vpop.f32.mrb[113].mxu1  ;;  %v4623_v50 = vadd.f32 %v11011_v57, %v8519_v37 }
 0x2b0   :  { %v3586_v27 = vadd.f32 %v11011_v57, %v8260_v19  ;;  %v3577_v32 = vpop.f32.mrb[235].mxu0  ;;  %11754 = vst [vmem:[#allocation30_spill] sm:$0xff] %v11110_v3  ;;  %v4927_v4 = vmax.f32 %v3583_v33, 0.0  ;;  %v8520_v23 = vpop.f32.mrb[114].mxu1  ;;  %v4615_v21 = vadd.f32 %v11011_v57, %v4614_v10 }
 0x2b1   :  { %v3578_v14 = vadd.f32 %v11011_v57, %v3577_v32  ;;  %11755 = vst [vmem:[#allocation31_spill] sm:$0xff] %v11113_v60  ;;  %v4925_v36 = vmax.f32 %v3575_v51, 0.0  ;;  %v4617_v16 = vpop.f32.mrb[115].mxu1  ;;  %v4626_v59 = vadd.f32 %v11011_v57, %v8520_v23 }
 0x2b2   :  { %v4928_v61 = vmax.f32 %v3586_v27, 0.0  ;;  %8366 = vmatmul.mubr.msk.bf16.gmra.mrb[84].mxu0 %vm1843_vm0, %v9315_v56  ;;  %v4618_v27 = vadd.f32 %v11011_v57, %v4617_v16  ;;  %v5185_v32 = vmax.f32 %v4615_v21, 0.0 }
 0x2b3   :  { %v4926_v7 = vmax.f32 %v3578_v14, 0.0  ;;  %8369 = vmatprep.mubr.msk.bf16.mxu0 %vm1843_vm0, %v9316_v49  ;;  %v9317_v14 = vld [vmem:[%s11721_s0 + $0x568] sm:$0xff]   ;;  %v5187_v49 = vmax.f32 %v4623_v50, 0.0 }
 0x2b4   :  { %v11117_v19 = vpack.c.bf16 %v4928_v61, %v4927_v4  ;;  %v5188_v4 = vmax.f32 %v4626_v59, 0.0 }
 0x2b5   :  { %v11122_v1 = vpack.c.bf16 %v4926_v7, %v4925_v36  ;;  %v8263_v33 = vpop.f32.mrb[236].mxu0  ;;  %v9318_v36 = vld [vmem:[%s11721_s0 + $0x570] sm:$0xff]   ;;  %v5186_v7 = vmax.f32 %v4618_v27, 0.0 }
 0x2b6   :  { %v3599_v56 = vadd.f32 %v11011_v57, %v8263_v33  ;;  %v3590_v51 = vpop.f32.mrb[237].mxu0  ;;  %v11134_v16 = vpack.c.bf16 %v5188_v4, %v5187_v49  ;;  %v8523_v33 = vpop.f32.mrb[116].mxu1 }
 0x2b7   :  { %v3591_v37 = vadd.f32 %v11011_v57, %v3590_v51  ;;  %v8264_v10 = vpop.f32.mrb[238].mxu0  ;;  %v11137_v60 = vpack.c.bf16 %v5186_v7, %v5185_v32  ;;  %v4630_v50 = vpop.f32.mrb[117].mxu1  ;;  %v4639_v49 = vadd.f32 %v11011_v57, %v8523_v33 }
 0x2b8   :  { %v3602_v61 = vadd.f32 %v11011_v57, %v8264_v10  ;;  %v3593_v23 = vpop.f32.mrb[239].mxu0  ;;  %11756 = vst [vmem:[#allocation32_spill] sm:$0xff] %v11134_v16  ;;  %v4931_v21 = vmax.f32 %v3599_v56, 0.0  ;;  %v8524_v51 = vpop.f32.mrb[118].mxu1  ;;  %v4631_v4 = vadd.f32 %v11011_v57, %v4630_v50 }
 0x2b9   :  { %v3594_v3 = vadd.f32 %v11011_v57, %v3593_v23  ;;  %11757 = vst [vmem:[#allocation33_spill] sm:$0xff] %v11137_v60  ;;  %v4929_v34 = vmax.f32 %v3591_v37, 0.0  ;;  %v4633_v27 = vpop.f32.mrb[119].mxu1  ;;  %v4642_v32 = vadd.f32 %v11011_v57, %v8524_v51 }
 0x2ba   :  { %v4932_v59 = vmax.f32 %v3602_v61, 0.0  ;;  %8370 = vmatmul.mubr.msk.bf16.gmra.mrb[88].mxu0 %vm1843_vm0, %v9317_v14  ;;  %v4634_v61 = vadd.f32 %v11011_v57, %v4633_v27  ;;  %v5189_v23 = vmax.f32 %v4631_v4, 0.0 }
 0x2bb   :  { %v4930_v29 = vmax.f32 %v3594_v3, 0.0  ;;  %8373 = vmatprep.mubr.msk.bf16.mxu0 %vm1843_vm0, %v9318_v36  ;;  %v9319_v3 = vld [vmem:[%s11721_s0 + $0x578] sm:$0xff]   ;;  %v5191_v36 = vmax.f32 %v4639_v49, 0.0 }
 0x2bc   :  { %v11141_v10 = vpack.c.bf16 %v4932_v59, %v4931_v21  ;;  %v5192_v21 = vmax.f32 %v4642_v32, 0.0 }
 0x2bd   :  { %v11146_v7 = vpack.c.bf16 %v4930_v29, %v4929_v34  ;;  %v8267_v56 = vpop.f32.mrb[240].mxu0  ;;  %v9320_v34 = vld [vmem:[%s11721_s0 + $0x580] sm:$0xff]   ;;  %v5190_v29 = vmax.f32 %v4634_v61, 0.0 }
 0x2be   :  { %v3615_v14 = vadd.f32 %v11011_v57, %v8267_v56  ;;  %v3606_v37 = vpop.f32.mrb[241].mxu0  ;;  %v11158_v27 = vpack.c.bf16 %v5192_v21, %v5191_v36  ;;  %v8527_v56 = vpop.f32.mrb[120].mxu1 }
 0x2bf   :  { %v3607_v33 = vadd.f32 %v11011_v57, %v3606_v37  ;;  %v8268_v50 = vpop.f32.mrb[242].mxu0  ;;  %v11161_v60 = vpack.c.bf16 %v5190_v29, %v5189_v23  ;;  %v4646_v49 = vpop.f32.mrb[121].mxu1  ;;  %v4655_v36 = vadd.f32 %v11011_v57, %v8527_v56 }
 0x2c0   :  { %v3618_v59 = vadd.f32 %v11011_v57, %v8268_v50  ;;  %v3609_v51 = vpop.f32.mrb[243].mxu0  ;;  %11758 = vst [vmem:[#allocation34_spill] sm:$0xff] %v11158_v27  ;;  %v4935_v4 = vmax.f32 %v3615_v14, 0.0  ;;  %v8528_v37 = vpop.f32.mrb[122].mxu1  ;;  %v4647_v21 = vadd.f32 %v11011_v57, %v4646_v49 }
 0x2c1   :  { %v3610_v16 = vadd.f32 %v11011_v57, %v3609_v51  ;;  %11759 = vst [vmem:[#allocation35_spill] sm:$0xff] %v11161_v60  ;;  %v4933_v0 = vmax.f32 %v3607_v33, 0.0  ;;  %v4649_v61 = vpop.f32.mrb[123].mxu1  ;;  %v4658_v51 = vadd.f32 %v11011_v57, %v8528_v37  ;;  %v5195_v33 = vmax.f32 %v4655_v36, 0.0 }
 0x2c2   :  { %v4936_v32 = vmax.f32 %v3618_v59, 0.0  ;;  %8374 = vmatmul.mubr.msk.bf16.gmra.mrb[92].mxu0 %vm1843_vm0, %v9319_v3  ;;  %v4650_v14 = vadd.f32 %v11011_v57, %v4649_v61 }
 0x2c3   :  { %v4934_v58 = vmax.f32 %v3610_v16, 0.0  ;;  %8377 = vmatprep.mubr.msk.bf16.mxu0 %vm1843_vm0, %v9320_v34  ;;  %v9321_v16 = vld [vmem:[%s11721_s0 + $0x588] sm:$0xff]   ;;  %v5193_v34 = vmax.f32 %v4647_v21, 0.0 }
 0x2c4   :  { %v8776_v50 = vpack.c.bf16 %v4936_v32, %v4935_v4  ;;  %v5196_v4 = vmax.f32 %v4658_v51, 0.0  ;;  %v8531_v32 = vpop.f32.mrb[124].mxu1 }
 0x2c5   :  { %v8772_v23 = vpack.c.bf16 %v4934_v58, %v4933_v0  ;;  %v8271_v29 = vpop.f32.mrb[244].mxu0  ;;  %v9322_v0 = vld [vmem:[%s11721_s0 + $0x590] sm:$0xff]   ;;  %v5194_v58 = vmax.f32 %v4650_v14, 0.0  ;;  %v4662_v37 = vpop.f32.mrb[125].mxu1 }
 0x2c6   :  { %v3631_v59 = vadd.f32 %v11011_v57, %v8271_v29  ;;  %v3622_v3 = vpop.f32.mrb[245].mxu0  ;;  %v11179_v27 = vpack.c.bf16 %v5196_v4, %v5195_v33  ;;  %v8532_v36 = vpop.f32.mrb[126].mxu1 }
 0x2c7   :  { %v3623_v56 = vadd.f32 %v11011_v57, %v3622_v3  ;;  %v8272_v49 = vpop.f32.mrb[246].mxu0  ;;  %8773 = vmatprep.subr.bf16.mxu1 %v8772_v23  ;;  %v11182_v51 = vpack.c.bf16 %v5194_v58, %v5193_v34  ;;  %v4671_v23 = vadd.f32 %v11011_v57, %v8531_v32  ;;  %v4665_v3 = vpop.f32.mrb[127].mxu1  ;;  %v4674_v34 = vadd.f32 %v11011_v57, %v8532_v36 }
 0x2c8   :  { %v3634_v61 = vadd.f32 %v11011_v57, %v8272_v49  ;;  %v3625_v29 = vpop.f32.mrb[247].mxu0  ;;  %8775 = vmatpush3.bf16.msra.mxu1 %v11065_v24  ;;  %11760 = vst [vmem:[#allocation36_spill] sm:$0xff] %v11179_v27  ;;  %v4939_v60 = vmax.f32 %v3631_v59, 0.0  ;;  %v8535_v14 = vpop.f32.mrb[128].mxu1  ;;  %v4666_v32 = vadd.f32 %v11011_v57, %v4665_v3 }
 0x2c9   :  { %v3626_v21 = vadd.f32 %v11011_v57, %v3625_v29  ;;  %8777 = vmatprep.subr.bf16.mxu1 %v8776_v50  ;;  %11761 = vst [vmem:[#allocation37_spill] sm:$0xff] %v11182_v51  ;;  %v4937_v49 = vmax.f32 %v3623_v56, 0.0  ;;  %v5199_v24 = vmax.f32 %v4671_v23, 0.0  ;;  %v4678_v33 = vpop.f32.mrb[129].mxu1  ;;  %v4663_v50 = vadd.f32 %v11011_v57, %v4662_v37 }
 0x2ca   :  { %v4940_v30 = vmax.f32 %v3634_v61, 0.0  ;;  %8378 = vmatmul.mubr.msk.bf16.gmra.mrb[96].mxu0 %vm1843_vm0, %v9321_v16  ;;  %v8536_v59 = vpop.f32.mrb[130].mxu1  ;;  %v4687_v16 = vadd.f32 %v11011_v57, %v8535_v14  ;;  %v4679_v56 = vadd.f32 %v11011_v57, %v4678_v33  ;;  %v5200_v36 = vmax.f32 %v4674_v34, 0.0  ;;  %v9324_v14 = vld [vmem:[%s11721_s0 + $0x5a0] sm:$0xff]  }
 0x2cb   :  { %v4938_v63 = vmax.f32 %v3626_v21, 0.0  ;;  %8381 = vmatprep.mubr.msk.bf16.mxu0 %vm1843_vm0, %v9322_v0  ;;  %v4690_v0 = vadd.f32 %v11011_v57, %v8536_v59  ;;  %v4681_v29 = vpop.f32.mrb[131].mxu1  ;;  %v5197_v37 = vmax.f32 %v4663_v50, 0.0  ;;  %v5198_v21 = vmax.f32 %v4666_v32, 0.0 }
 0x2cc   :  { %v8784_v4 = vpack.c.bf16 %v4940_v30, %v4939_v60  ;;  %8779 = vmatpush3.bf16.msra.mxu1 %v11056_v15  ;;  %v9323_v15 = vld [vmem:[%s11721_s0 + $0x598] sm:$0xff]   ;;  %v7439_v23 = vpop.f32.mrb[132].mxu1  ;;  %v11204_v50 = vpack.c.bf16 %v5200_v36, %v5199_v24 }
 0x2cd   :  { %v8780_v58 = vpack.c.bf16 %v4938_v63, %v4937_v49  ;;  %v8275_v61 = vpop.f32.mrb[248].mxu0  ;;  %v5203_v49 = vmax.f32 %v4687_v16, 0.0  ;;  %v5204_v33 = vmax.f32 %v4690_v0, 0.0  ;;  %v7440_v59 = vpop.f32.mrb[133].mxu1  ;;  %v11206_v34 = vpack.c.bf16 %v5198_v21, %v5197_v37 }
 0x2ce   :  { %v3647_v30 = vadd.f32 %v11011_v57, %v8275_v61  ;;  %v3638_v60 = vpop.f32.mrb[249].mxu0  ;;  %v7442_v32 = vpop.f32.mrb[134].mxu1  ;;  %v4682_v16 = vadd.f32 %v11011_v57, %v4681_v29 }
 0x2cf   :  { %v3639_v63 = vadd.f32 %v11011_v57, %v3638_v60  ;;  %v8276_v3 = vpop.f32.mrb[250].mxu0  ;;  %8781 = vmatprep.subr.bf16.mxu1 %v8780_v58  ;;  %v5201_v58 = vmax.f32 %v4679_v56, 0.0  ;;  %v11209_v51 = vpack.c.bf16 %v5204_v33, %v5203_v49  ;;  %v7443_v0 = vpop.f32.mrb[135].mxu1 }
 0x2d0   :  { %v3650_v61 = vadd.f32 %v11011_v57, %v8276_v3  ;;  %v3641_v27 = vpop.f32.mrb[251].mxu0  ;;  %8783 = vmatpush3.bf16.msra.mxu1 %v11098_v55  ;;  %v4943_v43 = vmax.f32 %v3647_v30, 0.0  ;;  %v7477_v3 = vpop.f32.mrb[136].mxu1  ;;  %v5202_v37 = vmax.f32 %v4682_v16, 0.0  ;;  %v7444_v30 = vadd.f32 %v7443_v0, %v7442_v32 }
 0x2d1   :  { %v3642_v60 = vadd.f32 %v11011_v57, %v3641_v27  ;;  %8785 = vmatprep.subr.bf16.mxu1 %v8784_v4  ;;  %v4941_v55 = vmax.f32 %v3639_v63, 0.0  ;;  %v7478_v36 = vpop.f32.mrb[137].mxu1  ;;  %v7441_v27 = vadd.f32 %v7440_v59, %v7439_v23 }
 0x2d2   :  { %v4944_v26 = vmax.f32 %v3650_v61, 0.0  ;;  %8382 = vmatmul.mubr.msk.bf16.gmra.mrb[100].mxu0 %vm1843_vm0, %v9323_v15  ;;  %v7480_v4 = vpop.f32.mrb[138].mxu1  ;;  %v11215_v29 = vpack.c.bf16 %v5202_v37, %v5201_v58  ;;  %v7479_v33 = vadd.f32 %v7478_v36, %v7477_v3 }
 0x2d3   :  { %v4942_v24 = vmax.f32 %v3642_v60, 0.0  ;;  %8385 = vmatprep.mubr.msk.bf16.mxu0 %vm1843_vm0, %v9324_v14  ;;  %v7481_v61 = vpop.f32.mrb[139].mxu1  ;;  %v9325_v14 = vld [vmem:[%s11721_s0 + $0x5a8] sm:$0xff]  }
 0x2d4   :  { %v8792_v21 = vpack.c.bf16 %v4944_v26, %v4943_v43  ;;  %8787 = vmatpush3.bf16.msra.mxu1 %v11093_v12  ;;  %v7515_v60 = vpop.f32.mrb[140].mxu1  ;;  %v9326_v12 = vld [vmem:[%s11721_s0 + $0x5b0] sm:$0xff]   ;;  %v5411_v23 = vadd.f32 %v7479_v33, %v7441_v27  ;;  %v7482_v16 = vadd.f32 %v7481_v61, %v7480_v4 }
 0x2d5   :  { %v8788_v56 = vpack.c.bf16 %v4942_v24, %v4941_v55  ;;  %v8279_v49 = vpop.f32.mrb[252].mxu0  ;;  %v7516_v59 = vpop.f32.mrb[141].mxu1 }
 0x2d6   :  { %v3663_v15 = vadd.f32 %v11011_v57, %v8279_v49  ;;  %v3654_v63 = vpop.f32.mrb[253].mxu0  ;;  %v7518_v0 = vpop.f32.mrb[142].mxu1  ;;  %v5416_v36 = vadd.f32 %v7482_v16, %v7444_v30  ;;  %v9327_v30 = vld [vmem:[%s11721_s0 + $0x5b8] sm:$0xff]  }
 0x2d7   :  { %v3655_v26 = vadd.f32 %v11011_v57, %v3654_v63  ;;  %v8280_v43 = vpop.f32.mrb[254].mxu0  ;;  %8789 = vmatprep.subr.bf16.mxu1 %v8788_v56  ;;  %v7519_v55 = vpop.f32.mrb[143].mxu1 }
 0x2d8   :  { %v3666_v32 = vadd.f32 %v11011_v57, %v8280_v43  ;;  %v3657_v58 = vpop.f32.mrb[255].mxu0  ;;  %8791 = vmatpush3.bf16.msra.mxu1 %v11122_v1  ;;  %v4947_v24 = vmax.f32 %v3663_v15, 0.0  ;;  %v7553_v56 = vpop.f32.mrb[144].mxu1  ;;  %v7517_v1 = vadd.f32 %v7516_v59, %v7515_v60 }
 0x2d9   :  { %v3658_v3 = vadd.f32 %v11011_v57, %v3657_v58  ;;  %8793 = vmatprep.subr.bf16.mxu1 %v8792_v21  ;;  %v4945_v49 = vmax.f32 %v3655_v26, 0.0  ;;  %v7554_v33 = vpop.f32.mrb[145].mxu1  ;;  %v7520_v21 = vadd.f32 %v7519_v55, %v7518_v0 }
 0x2da   :  { %v4948_v37 = vmax.f32 %v3666_v32, 0.0  ;;  %8386 = vmatmul.mubr.msk.bf16.gmra.mrb[104].mxu0 %vm1843_vm0, %v9325_v14  ;;  %v7556_v4 = vpop.f32.mrb[146].mxu1  ;;  %v7555_v58 = vadd.f32 %v7554_v33, %v7553_v56  ;;  %v5486_v26 = vadd.f32 %v7517_v1, %v5411_v23  ;;  %v5252_v1 = vld [vmem:[%s11722_s1 + $0x178] sm:$0xff] }
 0x2db   :  { %v4946_v27 = vmax.f32 %v3658_v3, 0.0  ;;  %8389 = vmatprep.mubr.msk.bf16.mxu0 %vm1843_vm0, %v9326_v12  ;;  %v7557_v15 = vpop.f32.mrb[147].mxu1  ;;  %v5491_v60 = vadd.f32 %v7520_v21, %v5416_v36 }
 0x2dc   :  { %v8800_v63 = vpack.c.bf16 %v4948_v37, %v4947_v24  ;;  %8795 = vmatpush3.bf16.msra.mxu1 %v11117_v19  ;;  %v9328_v19 = vld [vmem:[%s11721_s0 + $0x5c0] sm:$0xff]   ;;  %v11241_v3 = vadd.f32 %v7555_v58, %v5486_v26  ;;  %v7558_v55 = vadd.f32 %v7557_v15, %v7556_v4  ;;  %v9330_v58 = vld [vmem:[%s11721_s0 + $0x5d0] sm:$0xff]   ;;  %v5222_v26 = vld [vmem:[%s11722_s1 + $0x88] sm:$0xff] }
 0x2dd   :  { %v8796_v61 = vpack.c.bf16 %v4946_v27, %v4945_v49  ;;  %v8283_v43 = vpop.f32.mrb[0].mxu0 }
 0x2de   :  { %v3679_v32 = vadd.f32 %v11011_v57, %v8283_v43  ;;  %v3670_v14 = vpop.f32.mrb[1].mxu0  ;;  %v11245_v56 = vadd.f32 %v7558_v55, %v5491_v60  ;;  %v9329_v43 = vld [vmem:[%s11721_s0 + $0x5c8] sm:$0xff]  }
 0x2df   :  { %v3671_v12 = vadd.f32 %v11011_v57, %v3670_v14  ;;  %v8284_v16 = vpop.f32.mrb[2].mxu0  ;;  %8797 = vmatprep.subr.bf16.mxu1 %v8796_v61  ;;  %v5251_v14 = vld [vmem:[%s11722_s1 + $0x170] sm:$0xff] }
 0x2e0   :  { %v3682_v59 = vadd.f32 %v11011_v57, %v8284_v16  ;;  %v3673_v0 = vpop.f32.mrb[3].mxu0  ;;  %8799 = vmatpush3.bf16.msra.mxu1 %v11146_v7  ;;  %v4951_v23 = vmax.f32 %v3679_v32, 0.0  ;;  %v5219_v7 = vld [vmem:[%s11722_s1 + $0x70] sm:$0xff] }
 0x2e1   :  { %v3674_v24 = vadd.f32 %v11011_v57, %v3673_v0  ;;  %8801 = vmatprep.subr.bf16.mxu1 %v8800_v63  ;;  %v4949_v49 = vmax.f32 %v3671_v12, 0.0 }
 0x2e2   :  { %v4952_v37 = vmax.f32 %v3682_v59, 0.0  ;;  %8390 = vmatmul.mubr.msk.bf16.gmra.mrb[108].mxu0 %vm1843_vm0, %v9327_v30 }
 0x2e3   :  { %v4950_v27 = vmax.f32 %v3674_v24, 0.0  ;;  %8393 = vmatprep.mubr.msk.bf16.mxu0 %vm1843_vm0, %v9328_v19 }
 0x2e4   :  { %v11248_v36 = vpack.c.bf16 %v4952_v37, %v4951_v23  ;;  %8803 = vmatpush3.bf16.msra.mxu1 %v11141_v10  ;;  %v9331_v37 = vld [vmem:[%s11721_s0 + $0x5d8] sm:$0xff]  }
 0x2e5   :  { %v11254_v33 = vpack.c.bf16 %v4950_v27, %v4949_v49  ;;  %v8287_v63 = vpop.f32.mrb[4].mxu0 }
 0x2e6   :  { %v3695_v4 = vadd.f32 %v11011_v57, %v8287_v63  ;;  %v3686_v61 = vpop.f32.mrb[5].mxu0 }
 0x2e7   :  { %v3687_v10 = vadd.f32 %v11011_v57, %v3686_v61  ;;  %v8288_v21 = vpop.f32.mrb[6].mxu0  ;;  %5859 = vmatmul.mubr.f32.vlgmr.msra.gmra.mrb[160].mxu1 %v5219_v7  ;;  %v9332_v7 = vld [vmem:[%s11721_s0 + $0x5e0] sm:$0xff]  }
 0x2e8   :  { %v3698_v15 = vadd.f32 %v11011_v57, %v8288_v21  ;;  %v3689_v32 = vpop.f32.mrb[7].mxu0  ;;  %5863 = vmatprep.mubr.f32.mxu1 %v5252_v1  ;;  %v4955_v12 = vmax.f32 %v3695_v4, 0.0 }
 0x2e9   :  { %v3690_v30 = vadd.f32 %v11011_v57, %v3689_v32  ;;  %v4953_v19 = vmax.f32 %v3687_v10, 0.0 }
 0x2ea   :  { %v4956_v16 = vmax.f32 %v3698_v15, 0.0  ;;  %8394 = vmatmul.mubr.msk.bf16.gmra.mrb[112].mxu0 %vm1843_vm0, %v9329_v43 }
 0x2eb   :  { %v4954_v60 = vmax.f32 %v3690_v30, 0.0  ;;  %5864 = vmatmul.mubr.f32.gmra.mrb[162].mxu1 %v5251_v14  ;;  %8397 = vmatprep.mubr.msk.bf16.mxu0 %vm1843_vm0, %v9330_v58 }
 0x2ec   :  { %v11277_v59 = vpack.c.bf16 %v4956_v16, %v4955_v12  ;;  %5933 = vmatprep.mubr.f32.mxu1 %v5222_v26  ;;  %v9333_v26 = vld [vmem:[%s11721_s0 + $0x5e8] sm:$0xff]   ;;  %s9346_s0 = scalar_lea.vmem %s6624_s13, 16 }
 0x2ed   :  { %v11279_v0 = vpack.c.bf16 %v4954_v60, %v4953_v19  ;;  %v8291_v55 = vpop.f32.mrb[8].mxu0  ;;  %p9347_p0 = scmp.ne.s32.totalorder %s6624_s13, %s9346_s0  ;;  %p9352_p2 = scmp.lt.s32.totalorder %s9350_s14, %s9346_s0 }
 0x2ee   :  { %v3711_v24 = vadd.f32 %v11011_v57, %v8291_v55  ;;  %v3702_v23 = vpop.f32.mrb[9].mxu0 }
 0x2ef   :  { %v3703_v49 = vadd.f32 %v11011_v57, %v3702_v23  ;;  %v8292_v27 = vpop.f32.mrb[10].mxu0  ;;  %p9353_p3 = por %p9352_p2, %p9351_p1 }
 0x2f0   :  { %v3714_v63 = vadd.f32 %v11011_v57, %v8292_v27  ;;  %v3705_v1 = vpop.f32.mrb[11].mxu0  ;;  %v4959_v61 = vmax.f32 %v3711_v24, 0.0 }
 0x2f1   :  { %v3706_v4 = vadd.f32 %v11011_v57, %v3705_v1  ;;  %v4957_v10 = vmax.f32 %v3703_v49, 0.0  ;;  %p9354_p4 = pnand %p9353_p3, %p9347_p0 }
 0x2f2   :  { %v4960_v43 = vmax.f32 %v3714_v63, 0.0  ;;  %8398 = vmatmul.mubr.msk.bf16.gmra.mrb[116].mxu0 %vm1843_vm0, %v9331_v37 }
 0x2f3   :  { %v4958_v21 = vmax.f32 %v3706_v4, 0.0  ;;  %8401 = vmatprep.mubr.msk.bf16.mxu0 %vm1843_vm0, %v9332_v7 }
 0x2f4   :  { %v11293_v58 = vpack.c.bf16 %v4960_v43, %v4959_v61 }
 0x2f5   :  { %v11295_v15 = vpack.c.bf16 %v4958_v21, %v4957_v10  ;;  %v8295_v32 = vpop.f32.mrb[12].mxu0 }
 0x2f6   :  { %v3727_v14 = vadd.f32 %v11011_v57, %v8295_v32  ;;  %v3718_v30 = vpop.f32.mrb[13].mxu0 }
 0x2f7   :  { %v3719_v12 = vadd.f32 %v11011_v57, %v3718_v30  ;;  %v8296_v16 = vpop.f32.mrb[14].mxu0 }
 0x2f8   :  { %v3730_v19 = vadd.f32 %v11011_v57, %v8296_v16  ;;  %v3721_v60 = vpop.f32.mrb[15].mxu0  ;;  %v4963_v24 = vmax.f32 %v3727_v14, 0.0 }
 0x2f9   :  { %v3722_v55 = vadd.f32 %v11011_v57, %v3721_v60  ;;  %v4961_v49 = vmax.f32 %v3719_v12, 0.0 }
 0x2fa   :  { %v4964_v23 = vmax.f32 %v3730_v19, 0.0  ;;  %8402 = vmatmul.mubr.msk.bf16.gmra.mrb[120].mxu0 %vm1843_vm0, %v9333_v26  ;;  %v7591_v37 = vpop.f32.mrb[148].mxu1 }
 0x2fb   :  { %v4962_v27 = vmax.f32 %v3722_v55, 0.0  ;;  %v7592_v7 = vpop.f32.mrb[149].mxu1 }
 0x2fc   :  { %v11305_v63 = vpack.c.bf16 %v4964_v23, %v4963_v24  ;;  %v7593_v1 = vadd.f32 %v7592_v7, %v7591_v37 }
 0x2fd   :  { %v11307_v4 = vpack.c.bf16 %v4962_v27, %v4961_v49  ;;  %v8299_v61 = vpop.f32.mrb[16].mxu0 }
 0x2fe   :  { %v3743_v43 = vadd.f32 %v11011_v57, %v8299_v61  ;;  %v3734_v10 = vpop.f32.mrb[17].mxu0  ;;  %v11311_v21 = vadd.f32 %v7593_v1, %v11241_v3  ;;  %v7594_v32 = vpop.f32.mrb[150].mxu1 }
 0x2ff   :  { %v3735_v14 = vadd.f32 %v11011_v57, %v3734_v10  ;;  %v8300_v30 = vpop.f32.mrb[18].mxu0  ;;  %v7595_v26 = vpop.f32.mrb[151].mxu1 }
 0x300   :  { %v3746_v12 = vadd.f32 %v11011_v57, %v8300_v30  ;;  %v3737_v16 = vpop.f32.mrb[19].mxu0  ;;  %v7596_v19 = vadd.f32 %v7595_v26, %v7594_v32  ;;  %v4967_v55 = vmax.f32 %v3743_v43, 0.0 }
 0x301   :  { %v3738_v60 = vadd.f32 %v11011_v57, %v3737_v16  ;;  %v4965_v37 = vmax.f32 %v3735_v14, 0.0 }
 0x302   :  { %v4968_v24 = vmax.f32 %v3746_v12, 0.0  ;;  %v11317_v23 = vadd.f32 %v7596_v19, %v11245_v56 }
 0x303   :  { %v4966_v49 = vmax.f32 %v3738_v60, 0.0 }
 0x304   :  { %v8808_v3 = vpack.c.bf16 %v4968_v24, %v4967_v55 }
 0x305   :  { %v8804_v27 = vpack.c.bf16 %v4966_v49, %v4965_v37  ;;  %v8303_v7 = vpop.f32.mrb[20].mxu0 }
 0x306   :  { %v3759_v1 = vadd.f32 %v11011_v57, %v8303_v7  ;;  %v3750_v61 = vpop.f32.mrb[21].mxu0 }
 0x307   :  { %v3751_v10 = vadd.f32 %v11011_v57, %v3750_v61  ;;  %v8304_v30 = vpop.f32.mrb[22].mxu0  ;;  %8805 = vmatprep.subr.bf16.mxu1 %v8804_v27 }
 0x308   :  { %v3762_v32 = vadd.f32 %v11011_v57, %v8304_v30  ;;  %v3753_v26 = vpop.f32.mrb[23].mxu0  ;;  %8807 = vmatpush3.bf16.msra.mxu1 %v11254_v33  ;;  %v4971_v43 = vmax.f32 %v3759_v1, 0.0 }
 0x309   :  { %v3754_v56 = vadd.f32 %v11011_v57, %v3753_v26  ;;  %8809 = vmatprep.subr.bf16.mxu1 %v8808_v3  ;;  %v4969_v12 = vmax.f32 %v3751_v10, 0.0 }
 0x30a   :  { %v4972_v14 = vmax.f32 %v3762_v32, 0.0 }
 0x30b   :  { %v4970_v16 = vmax.f32 %v3754_v56, 0.0 }
 0x30c   :  { %v8816_v19 = vpack.c.bf16 %v4972_v14, %v4971_v43  ;;  %8811 = vmatpush3.bf16.msra.mxu1 %v11248_v36 }
 0x30d   :  { %v8812_v60 = vpack.c.bf16 %v4970_v16, %v4969_v12  ;;  %v8307_v55 = vpop.f32.mrb[24].mxu0 }
 0x30e   :  { %v3775_v24 = vadd.f32 %v11011_v57, %v8307_v55  ;;  %v3766_v37 = vpop.f32.mrb[25].mxu0 }
 0x30f   :  { %v3767_v49 = vadd.f32 %v11011_v57, %v3766_v37  ;;  %v8308_v27 = vpop.f32.mrb[26].mxu0  ;;  %8813 = vmatprep.subr.bf16.mxu1 %v8812_v60 }
 0x310   :  { %v3778_v33 = vadd.f32 %v11011_v57, %v8308_v27  ;;  %v3769_v7 = vpop.f32.mrb[27].mxu0  ;;  %8815 = vmatpush3.bf16.msra.mxu1 %v11279_v0  ;;  %v4975_v1 = vmax.f32 %v3775_v24, 0.0 }
 0x311   :  { %v3770_v3 = vadd.f32 %v11011_v57, %v3769_v7  ;;  %8817 = vmatprep.subr.bf16.mxu1 %v8816_v19  ;;  %v4973_v36 = vmax.f32 %v3767_v49, 0.0 }
 0x312   :  { %v4976_v61 = vmax.f32 %v3778_v33, 0.0 }
 0x313   :  { %v4974_v10 = vmax.f32 %v3770_v3, 0.0 }
 0x314   :  { %v8824_v30 = vpack.c.bf16 %v4976_v61, %v4975_v1  ;;  %8819 = vmatpush3.bf16.msra.mxu1 %v11277_v59 }
 0x315   :  { %v8820_v32 = vpack.c.bf16 %v4974_v10, %v4973_v36  ;;  %v8311_v26 = vpop.f32.mrb[28].mxu0 }
 0x316   :  { %v3791_v56 = vadd.f32 %v11011_v57, %v8311_v26  ;;  %v3782_v43 = vpop.f32.mrb[29].mxu0 }
 0x317   :  { %v3783_v14 = vadd.f32 %v11011_v57, %v3782_v43  ;;  %v8312_v12 = vpop.f32.mrb[30].mxu0  ;;  %8821 = vmatprep.subr.bf16.mxu1 %v8820_v32 }
 0x318   :  { %v3794_v0 = vadd.f32 %v11011_v57, %v8312_v12  ;;  %v3785_v16 = vpop.f32.mrb[31].mxu0  ;;  %8823 = vmatpush3.bf16.msra.mxu1 %v11295_v15  ;;  %v4979_v60 = vmax.f32 %v3791_v56, 0.0  ;;  %v5221_v56 = vld [vmem:[%s11722_s1 + $0x80] sm:$0xff] }
 0x319   :  { %v3786_v19 = vadd.f32 %v11011_v57, %v3785_v16  ;;  %8825 = vmatprep.subr.bf16.mxu1 %v8824_v30  ;;  %v4977_v59 = vmax.f32 %v3783_v14, 0.0 }
 0x31a   :  { %v4980_v55 = vmax.f32 %v3794_v0, 0.0 }
 0x31b   :  { %v4978_v24 = vmax.f32 %v3786_v19, 0.0 }
 0x31c   :  { %v8832_v37 = vpack.c.bf16 %v4980_v55, %v4979_v60  ;;  %8827 = vmatpush3.bf16.msra.mxu1 %v11293_v58  ;;  %v5253_v55 = vld [vmem:[%s11722_s1 + $0x180] sm:$0xff] }
 0x31d   :  { %v8828_v49 = vpack.c.bf16 %v4978_v24, %v4977_v59  ;;  %v8315_v27 = vpop.f32.mrb[32].mxu0  ;;  %v5224_v24 = vld [vmem:[%s11722_s1 + $0x98] sm:$0xff] }
 0x31e   :  { %v3807_v33 = vadd.f32 %v11011_v57, %v8315_v27  ;;  %v3798_v7 = vpop.f32.mrb[33].mxu0 }
 0x31f   :  { %v3799_v3 = vadd.f32 %v11011_v57, %v3798_v7  ;;  %v8316_v1 = vpop.f32.mrb[34].mxu0  ;;  %8829 = vmatprep.subr.bf16.mxu1 %v8828_v49 }
 0x320   :  { %v3810_v15 = vadd.f32 %v11011_v57, %v8316_v1  ;;  %v3801_v61 = vpop.f32.mrb[35].mxu0  ;;  %8831 = vmatpush3.bf16.msra.mxu1 %v11307_v4  ;;  %v4983_v10 = vmax.f32 %v3807_v33, 0.0  ;;  %v11356_v4 = vld [vmem:[%s11724_s3] ss:$0 sm:$0xff] }
 0x321   :  { %v3802_v36 = vadd.f32 %v11011_v57, %v3801_v61  ;;  %8833 = vmatprep.subr.bf16.mxu1 %v8832_v37  ;;  %v4981_v58 = vmax.f32 %v3799_v3, 0.0  ;;  %v5254_v57 = vld [vmem:[%s11722_s1 + $0x188] sm:$0xff] }
 0x322   :  { %v4984_v30 = vmax.f32 %v3810_v15, 0.0 }
 0x323   :  { %v4982_v32 = vmax.f32 %v3802_v36, 0.0 }
 0x324   :  { %v11342_v26 = vpack.c.bf16 %v4984_v30, %v4983_v10  ;;  %8835 = vmatpush3.bf16.msra.mxu1 %v11305_v63 }
 0x325   :  { %v11348_v43 = vpack.c.bf16 %v4982_v32, %v4981_v58  ;;  %v8319_v14 = vpop.f32.mrb[36].mxu0 }
 0x326   :  { %v3823_v12 = vadd.f32 %v11356_v4, %v8319_v14  ;;  %v3814_v0 = vpop.f32.mrb[37].mxu0 }
 0x327   :  { %v3815_v63 = vadd.f32 %v11356_v4, %v3814_v0  ;;  %v8320_v16 = vpop.f32.mrb[38].mxu0  ;;  %5934 = vmatmul.mubr.f32.vlgmr.msra.gmra.mrb[164].mxu1 %v5221_v56 }
 0x328   :  { %v3826_v19 = vadd.f32 %v11356_v4, %v8320_v16  ;;  %v3817_v60 = vpop.f32.mrb[39].mxu0  ;;  %5938 = vmatprep.mubr.f32.mxu1 %v5254_v57  ;;  %v4987_v37 = vmax.f32 %v3823_v12, 0.0 }
 0x329   :  { %v3818_v59 = vadd.f32 %v11356_v4, %v3817_v60  ;;  %v4985_v27 = vmax.f32 %v3815_v63, 0.0 }
 0x32a   :  { %v4988_v49 = vmax.f32 %v3826_v19, 0.0 }
 0x32b   :  { %v4986_v33 = vmax.f32 %v3818_v59, 0.0  ;;  %5939 = vmatmul.mubr.f32.gmra.mrb[166].mxu1 %v5253_v55 }
 0x32c   :  { %v11368_v7 = vpack.c.bf16 %v4988_v49, %v4987_v37  ;;  %6008 = vmatprep.mubr.f32.mxu1 %v5224_v24 }
 0x32d   :  { %v11370_v3 = vpack.c.bf16 %v4986_v33, %v4985_v27  ;;  %v8323_v1 = vpop.f32.mrb[40].mxu0 }
 0x32e   :  { %v3839_v15 = vadd.f32 %v11356_v4, %v8323_v1  ;;  %v3830_v61 = vpop.f32.mrb[41].mxu0 }
 0x32f   :  { %v3831_v36 = vadd.f32 %v11356_v4, %v3830_v61  ;;  %v8324_v10 = vpop.f32.mrb[42].mxu0 }
 0x330   :  { %v3842_v30 = vadd.f32 %v11356_v4, %v8324_v10  ;;  %v3833_v58 = vpop.f32.mrb[43].mxu0  ;;  %v4991_v56 = vmax.f32 %v3839_v15, 0.0 }
 0x331   :  { %v3834_v32 = vadd.f32 %v11356_v4, %v3833_v58  ;;  %v4989_v57 = vmax.f32 %v3831_v36, 0.0 }
 0x332   :  { %v4992_v14 = vmax.f32 %v3842_v30, 0.0 }
 0x333   :  { %v4990_v12 = vmax.f32 %v3834_v32, 0.0 }
 0x334   :  { %v11376_v0 = vpack.c.bf16 %v4992_v14, %v4991_v56 }
 0x335   :  { %v11378_v63 = vpack.c.bf16 %v4990_v12, %v4989_v57  ;;  %v8327_v16 = vpop.f32.mrb[44].mxu0 }
 0x336   :  { %v3855_v19 = vadd.f32 %v11356_v4, %v8327_v16  ;;  %v3846_v60 = vpop.f32.mrb[45].mxu0 }
 0x337   :  { %v3847_v55 = vadd.f32 %v11356_v4, %v3846_v60  ;;  %v8328_v59 = vpop.f32.mrb[46].mxu0 }
 0x338   :  { %v3858_v24 = vadd.f32 %v11356_v4, %v8328_v59  ;;  %v3849_v37 = vpop.f32.mrb[47].mxu0  ;;  %v4995_v27 = vmax.f32 %v3855_v19, 0.0 }
 0x339   :  { %v3850_v49 = vadd.f32 %v11356_v4, %v3849_v37  ;;  %v4993_v15 = vmax.f32 %v3847_v55, 0.0 }
 0x33a   :  { %v4996_v33 = vmax.f32 %v3858_v24, 0.0  ;;  %v7629_v1 = vpop.f32.mrb[152].mxu1 }
 0x33b   :  { %v4994_v61 = vmax.f32 %v3850_v49, 0.0  ;;  %v7630_v36 = vpop.f32.mrb[153].mxu1 }
 0x33c   :  { %v11384_v10 = vpack.c.bf16 %v4996_v33, %v4995_v27  ;;  %v7631_v30 = vadd.f32 %v7630_v36, %v7629_v1 }
 0x33d   :  { %v11386_v58 = vpack.c.bf16 %v4994_v61, %v4993_v15  ;;  %v8331_v32 = vpop.f32.mrb[48].mxu0 }
 0x33e   :  { %v3871_v56 = vadd.f32 %v11356_v4, %v8331_v32  ;;  %v3862_v14 = vpop.f32.mrb[49].mxu0  ;;  %v11390_v57 = vadd.f32 %v7631_v30, %v11311_v21  ;;  %v7632_v12 = vpop.f32.mrb[154].mxu1 }
 0x33f   :  { %v3863_v16 = vadd.f32 %v11356_v4, %v3862_v14  ;;  %v8332_v19 = vpop.f32.mrb[50].mxu0  ;;  %v7633_v60 = vpop.f32.mrb[155].mxu1 }
 0x340   :  { %v3874_v55 = vadd.f32 %v11356_v4, %v8332_v19  ;;  %v3865_v59 = vpop.f32.mrb[51].mxu0  ;;  %v7634_v24 = vadd.f32 %v7633_v60, %v7632_v12  ;;  %v4999_v49 = vmax.f32 %v3871_v56, 0.0 }
 0x341   :  { %v3866_v37 = vadd.f32 %v11356_v4, %v3865_v59  ;;  %v4997_v1 = vmax.f32 %v3863_v16, 0.0 }
 0x342   :  { %v5000_v27 = vmax.f32 %v3874_v55, 0.0  ;;  %v11396_v33 = vadd.f32 %v7634_v24, %v11317_v23 }
 0x343   :  { %v4998_v15 = vmax.f32 %v3866_v37, 0.0 }
 0x344   :  { %v8840_v21 = vpack.c.bf16 %v5000_v27, %v4999_v49 }
 0x345   :  { %v8836_v61 = vpack.c.bf16 %v4998_v15, %v4997_v1  ;;  %v8335_v36 = vpop.f32.mrb[52].mxu0 }
 0x346   :  { %v3887_v30 = vadd.f32 %v11356_v4, %v8335_v36  ;;  %v3878_v32 = vpop.f32.mrb[53].mxu0 }
 0x347   :  { %v3879_v14 = vadd.f32 %v11356_v4, %v3878_v32  ;;  %v8336_v19 = vpop.f32.mrb[54].mxu0  ;;  %8837 = vmatprep.subr.bf16.mxu1 %v8836_v61 }
 0x348   :  { %v3890_v12 = vadd.f32 %v11356_v4, %v8336_v19  ;;  %v3881_v60 = vpop.f32.mrb[55].mxu0  ;;  %8839 = vmatpush3.bf16.msra.mxu1 %v11348_v43  ;;  %v5003_v56 = vmax.f32 %v3887_v30, 0.0 }
 0x349   :  { %v3882_v23 = vadd.f32 %v11356_v4, %v3881_v60  ;;  %8841 = vmatprep.subr.bf16.mxu1 %v8840_v21  ;;  %v5001_v55 = vmax.f32 %v3879_v14, 0.0 }
 0x34a   :  { %v5004_v16 = vmax.f32 %v3890_v12, 0.0 }
 0x34b   :  { %v5002_v59 = vmax.f32 %v3882_v23, 0.0 }
 0x34c   :  { %v8848_v24 = vpack.c.bf16 %v5004_v16, %v5003_v56  ;;  %8843 = vmatpush3.bf16.msra.mxu1 %v11342_v26 }
 0x34d   :  { %v8844_v37 = vpack.c.bf16 %v5002_v59, %v5001_v55  ;;  %v8339_v49 = vpop.f32.mrb[56].mxu0 }
 0x34e   :  { %v3903_v27 = vadd.f32 %v11356_v4, %v8339_v49  ;;  %v3894_v1 = vpop.f32.mrb[57].mxu0 }
 0x34f   :  { %v3895_v15 = vadd.f32 %v11356_v4, %v3894_v1  ;;  %v8340_v61 = vpop.f32.mrb[58].mxu0  ;;  %8845 = vmatprep.subr.bf16.mxu1 %v8844_v37 }
 0x350   :  { %v3906_v43 = vadd.f32 %v11356_v4, %v8340_v61  ;;  %v3897_v36 = vpop.f32.mrb[59].mxu0  ;;  %8847 = vmatpush3.bf16.msra.mxu1 %v11370_v3  ;;  %v5007_v30 = vmax.f32 %v3903_v27, 0.0 }
 0x351   :  { %v3898_v21 = vadd.f32 %v11356_v4, %v3897_v36  ;;  %8849 = vmatprep.subr.bf16.mxu1 %v8848_v24  ;;  %v5005_v26 = vmax.f32 %v3895_v15, 0.0 }
 0x352   :  { %v5008_v32 = vmax.f32 %v3906_v43, 0.0 }
 0x353   :  { %v5006_v14 = vmax.f32 %v3898_v21, 0.0 }
 0x354   :  { %v8856_v19 = vpack.c.bf16 %v5008_v32, %v5007_v30  ;;  %8851 = vmatpush3.bf16.msra.mxu1 %v11368_v7 }
 0x355   :  { %v8852_v12 = vpack.c.bf16 %v5006_v14, %v5005_v26  ;;  %v8343_v60 = vpop.f32.mrb[60].mxu0 }
 0x356   :  { %v3919_v23 = vadd.f32 %v11356_v4, %v8343_v60  ;;  %v3910_v56 = vpop.f32.mrb[61].mxu0 }
 0x357   :  { %v3911_v16 = vadd.f32 %v11356_v4, %v3910_v56  ;;  %v8344_v55 = vpop.f32.mrb[62].mxu0  ;;  %8853 = vmatprep.subr.bf16.mxu1 %v8852_v12 }
 0x358   :  { %v3922_v3 = vadd.f32 %v11356_v4, %v8344_v55  ;;  %v3913_v59 = vpop.f32.mrb[63].mxu0  ;;  %8855 = vmatpush3.bf16.msra.mxu1 %v11378_v63  ;;  %v5011_v37 = vmax.f32 %v3919_v23, 0.0  ;;  %v5223_v23 = vld [vmem:[%s11722_s1 + $0x90] sm:$0xff] }
 0x359   :  { %v3914_v24 = vadd.f32 %v11356_v4, %v3913_v59  ;;  %8857 = vmatprep.subr.bf16.mxu1 %v8856_v19  ;;  %v5009_v7 = vmax.f32 %v3911_v16, 0.0 }
 0x35a   :  { %v5012_v49 = vmax.f32 %v3922_v3, 0.0 }
 0x35b   :  { %v5010_v27 = vmax.f32 %v3914_v24, 0.0 }
 0x35c   :  { %v8864_v1 = vpack.c.bf16 %v5012_v49, %v5011_v37  ;;  %8859 = vmatpush3.bf16.msra.mxu1 %v11376_v0  ;;  %v5255_v49 = vld [vmem:[%s11722_s1 + $0x190] sm:$0xff] }
 0x35d   :  { %v8860_v15 = vpack.c.bf16 %v5010_v27, %v5009_v7  ;;  %v8347_v61 = vpop.f32.mrb[64].mxu0  ;;  %v5226_v27 = vld [vmem:[%s11722_s1 + $0xa8] sm:$0xff] }
 0x35e   :  { %v3935_v43 = vadd.f32 %v11356_v4, %v8347_v61  ;;  %v3926_v36 = vpop.f32.mrb[65].mxu0 }
 0x35f   :  { %v3927_v21 = vadd.f32 %v11356_v4, %v3926_v36  ;;  %v8348_v30 = vpop.f32.mrb[66].mxu0  ;;  %8861 = vmatprep.subr.bf16.mxu1 %v8860_v15 }
 0x360   :  { %v3938_v63 = vadd.f32 %v11356_v4, %v8348_v30  ;;  %v3929_v32 = vpop.f32.mrb[67].mxu0  ;;  %8863 = vmatpush3.bf16.msra.mxu1 %v11386_v58  ;;  %v5015_v14 = vmax.f32 %v3935_v43, 0.0  ;;  %v5256_v58 = vld [vmem:[%s11722_s1 + $0x198] sm:$0xff] }
 0x361   :  { %v3930_v26 = vadd.f32 %v11356_v4, %v3929_v32  ;;  %8865 = vmatprep.subr.bf16.mxu1 %v8864_v1  ;;  %v5013_v0 = vmax.f32 %v3927_v21, 0.0 }
 0x362   :  { %v5016_v19 = vmax.f32 %v3938_v63, 0.0 }
 0x363   :  { %v5014_v12 = vmax.f32 %v3930_v26, 0.0 }
 0x364   :  { %v11421_v60 = vpack.c.bf16 %v5016_v19, %v5015_v14  ;;  %8867 = vmatpush3.bf16.msra.mxu1 %v11384_v10 }
 0x365   :  { %v11427_v56 = vpack.c.bf16 %v5014_v12, %v5013_v0  ;;  %v8351_v16 = vpop.f32.mrb[68].mxu0 }
 0x366   :  { %v3951_v55 = vadd.f32 %v11356_v4, %v8351_v16  ;;  %v3942_v3 = vpop.f32.mrb[69].mxu0 }
 0x367   :  { %v3943_v59 = vadd.f32 %v11356_v4, %v3942_v3  ;;  %v8352_v24 = vpop.f32.mrb[70].mxu0  ;;  %6009 = vmatmul.mubr.f32.vlgmr.msra.gmra.mrb[168].mxu1 %v5223_v23 }
 0x368   :  { %v3954_v10 = vadd.f32 %v11356_v4, %v8352_v24  ;;  %v3945_v37 = vpop.f32.mrb[71].mxu0  ;;  %6013 = vmatprep.mubr.f32.mxu1 %v5256_v58  ;;  %v5019_v1 = vmax.f32 %v3951_v55, 0.0 }
 0x369   :  { %v3946_v7 = vadd.f32 %v11356_v4, %v3945_v37  ;;  %v5017_v61 = vmax.f32 %v3943_v59, 0.0 }
 0x36a   :  { %v5020_v15 = vmax.f32 %v3954_v10, 0.0 }
 0x36b   :  { %v5018_v43 = vmax.f32 %v3946_v7, 0.0  ;;  %6014 = vmatmul.mubr.f32.gmra.mrb[170].mxu1 %v5255_v49 }
 0x36c   :  { %v11442_v36 = vpack.c.bf16 %v5020_v15, %v5019_v1  ;;  %6083 = vmatprep.mubr.f32.mxu1 %v5226_v27 }
 0x36d   :  { %v11444_v21 = vpack.c.bf16 %v5018_v43, %v5017_v61  ;;  %v8355_v30 = vpop.f32.mrb[72].mxu0 }
 0x36e   :  { %v3967_v63 = vadd.f32 %v11356_v4, %v8355_v30  ;;  %v3958_v32 = vpop.f32.mrb[73].mxu0 }
 0x36f   :  { %v3959_v26 = vadd.f32 %v11356_v4, %v3958_v32  ;;  %v8356_v14 = vpop.f32.mrb[74].mxu0 }
 0x370   :  { %v3970_v19 = vadd.f32 %v11356_v4, %v8356_v14  ;;  %v3961_v0 = vpop.f32.mrb[75].mxu0  ;;  %v5023_v23 = vmax.f32 %v3967_v63, 0.0 }
 0x371   :  { %v3962_v12 = vadd.f32 %v11356_v4, %v3961_v0  ;;  %v5021_v58 = vmax.f32 %v3959_v26, 0.0 }
 0x372   :  { %v5024_v16 = vmax.f32 %v3970_v19, 0.0 }
 0x373   :  { %v5022_v55 = vmax.f32 %v3962_v12, 0.0 }
 0x374   :  { %v11450_v3 = vpack.c.bf16 %v5024_v16, %v5023_v23 }
 0x375   :  { %v11452_v59 = vpack.c.bf16 %v5022_v55, %v5021_v58  ;;  %v8359_v24 = vpop.f32.mrb[76].mxu0 }
 0x376   :  { %v3983_v10 = vadd.f32 %v11356_v4, %v8359_v24  ;;  %v3974_v37 = vpop.f32.mrb[77].mxu0 }
 0x377   :  { %v3975_v49 = vadd.f32 %v11356_v4, %v3974_v37  ;;  %v8360_v7 = vpop.f32.mrb[78].mxu0 }
 0x378   :  { %v3986_v27 = vadd.f32 %v11356_v4, %v8360_v7  ;;  %v3977_v1 = vpop.f32.mrb[79].mxu0  ;;  %v5027_v61 = vmax.f32 %v3983_v10, 0.0 }
 0x379   :  { %v3978_v15 = vadd.f32 %v11356_v4, %v3977_v1  ;;  %v5025_v63 = vmax.f32 %v3975_v49, 0.0 }
 0x37a   :  { %v5028_v43 = vmax.f32 %v3986_v27, 0.0  ;;  %v7667_v30 = vpop.f32.mrb[156].mxu1 }
 0x37b   :  { %v5026_v32 = vmax.f32 %v3978_v15, 0.0  ;;  %v7668_v26 = vpop.f32.mrb[157].mxu1 }
 0x37c   :  { %v11458_v14 = vpack.c.bf16 %v5028_v43, %v5027_v61  ;;  %v7669_v19 = vadd.f32 %v7668_v26, %v7667_v30 }
 0x37d   :  { %v11460_v0 = vpack.c.bf16 %v5026_v32, %v5025_v63  ;;  %v8363_v12 = vpop.f32.mrb[80].mxu0 }
 0x37e   :  { %v11463_v23 = vadd.f32 %v7669_v19, %v11390_v57  ;;  %v3999_v16 = vadd.f32 %v11356_v4, %v8363_v12  ;;  %v3990_v58 = vpop.f32.mrb[81].mxu0  ;;  %v7670_v55 = vpop.f32.mrb[158].mxu1 }
 0x37f   :  { %v3991_v24 = vadd.f32 %v11356_v4, %v3990_v58  ;;  %v8364_v10 = vpop.f32.mrb[82].mxu0  ;;  %v7671_v37 = vpop.f32.mrb[159].mxu1 }
 0x380   :  { %v4002_v49 = vadd.f32 %v11356_v4, %v8364_v10  ;;  %v3993_v7 = vpop.f32.mrb[83].mxu0  ;;  %v7672_v27 = vadd.f32 %v7671_v37, %v7670_v55  ;;  %v5031_v15 = vmax.f32 %v3999_v16, 0.0 }
 0x381   :  { %v3994_v1 = vadd.f32 %v11356_v4, %v3993_v7  ;;  %v5029_v57 = vmax.f32 %v3991_v24, 0.0 }
 0x382   :  { %v5032_v61 = vmax.f32 %v4002_v49, 0.0  ;;  %v11470_v43 = vadd.f32 %v7672_v27, %v11396_v33 }
 0x383   :  { %v5030_v30 = vmax.f32 %v3994_v1, 0.0 }
 0x384   :  { %v8872_v63 = vpack.c.bf16 %v5032_v61, %v5031_v15 }
 0x385   :  { %v8868_v32 = vpack.c.bf16 %v5030_v30, %v5029_v57  ;;  %v8367_v26 = vpop.f32.mrb[84].mxu0 }
 0x386   :  { %v4015_v19 = vadd.f32 %v11356_v4, %v8367_v26  ;;  %v4006_v12 = vpop.f32.mrb[85].mxu0 }
 0x387   :  { %v4007_v58 = vadd.f32 %v11356_v4, %v4006_v12  ;;  %v8368_v10 = vpop.f32.mrb[86].mxu0  ;;  %8869 = vmatprep.subr.bf16.mxu1 %v8868_v32 }
 0x388   :  { %v4018_v55 = vadd.f32 %v11356_v4, %v8368_v10  ;;  %v4009_v37 = vpop.f32.mrb[87].mxu0  ;;  %8871 = vmatpush3.bf16.msra.mxu1 %v11427_v56  ;;  %v5035_v16 = vmax.f32 %v4015_v19, 0.0 }
 0x389   :  { %v4010_v33 = vadd.f32 %v11356_v4, %v4009_v37  ;;  %8873 = vmatprep.subr.bf16.mxu1 %v8872_v63  ;;  %v5033_v49 = vmax.f32 %v4007_v58, 0.0 }
 0x38a   :  { %v5036_v24 = vmax.f32 %v4018_v55, 0.0 }
 0x38b   :  { %v5034_v7 = vmax.f32 %v4010_v33, 0.0 }
 0x38c   :  { %v8880_v27 = vpack.c.bf16 %v5036_v24, %v5035_v16  ;;  %8875 = vmatpush3.bf16.msra.mxu1 %v11421_v60 }
 0x38d   :  { %v8876_v1 = vpack.c.bf16 %v5034_v7, %v5033_v49  ;;  %v8371_v15 = vpop.f32.mrb[88].mxu0 }
 0x38e   :  { %v4031_v61 = vadd.f32 %v11356_v4, %v8371_v15  ;;  %v4022_v57 = vpop.f32.mrb[89].mxu0 }
 0x38f   :  { %v4023_v30 = vadd.f32 %v11356_v4, %v4022_v57  ;;  %v8372_v32 = vpop.f32.mrb[90].mxu0  ;;  %8877 = vmatprep.subr.bf16.mxu1 %v8876_v1 }
 0x390   :  { %v4034_v56 = vadd.f32 %v11356_v4, %v8372_v32  ;;  %v4025_v26 = vpop.f32.mrb[91].mxu0  ;;  %8879 = vmatpush3.bf16.msra.mxu1 %v11444_v21  ;;  %v5039_v19 = vmax.f32 %v4031_v61, 0.0 }
 0x391   :  { %v4026_v63 = vadd.f32 %v11356_v4, %v4025_v26  ;;  %8881 = vmatprep.subr.bf16.mxu1 %v8880_v27  ;;  %v5037_v60 = vmax.f32 %v4023_v30, 0.0 }
 0x392   :  { %v5040_v12 = vmax.f32 %v4034_v56, 0.0 }
 0x393   :  { %v5038_v58 = vmax.f32 %v4026_v63, 0.0 }
 0x394   :  { %v8888_v10 = vpack.c.bf16 %v5040_v12, %v5039_v19  ;;  %8883 = vmatpush3.bf16.msra.mxu1 %v11442_v36 }
 0x395   :  { %v8884_v55 = vpack.c.bf16 %v5038_v58, %v5037_v60  ;;  %v8375_v37 = vpop.f32.mrb[92].mxu0 }
 0x396   :  { %v4047_v33 = vadd.f32 %v11356_v4, %v8375_v37  ;;  %v4038_v16 = vpop.f32.mrb[93].mxu0 }
 0x397   :  { %v4039_v24 = vadd.f32 %v11356_v4, %v4038_v16  ;;  %v8376_v49 = vpop.f32.mrb[94].mxu0  ;;  %8885 = vmatprep.subr.bf16.mxu1 %v8884_v55 }
 0x398   :  { %v4050_v21 = vadd.f32 %v11356_v4, %v8376_v49  ;;  %v4041_v7 = vpop.f32.mrb[95].mxu0  ;;  %8887 = vmatpush3.bf16.msra.mxu1 %v11452_v59  ;;  %v5043_v1 = vmax.f32 %v4047_v33, 0.0  ;;  %v5225_v33 = vld [vmem:[%s11722_s1 + $0xa0] sm:$0xff] }
 0x399   :  { %v4042_v27 = vadd.f32 %v11356_v4, %v4041_v7  ;;  %8889 = vmatprep.subr.bf16.mxu1 %v8888_v10  ;;  %v5041_v36 = vmax.f32 %v4039_v24, 0.0 }
 0x39a   :  { %v5044_v15 = vmax.f32 %v4050_v21, 0.0 }
 0x39b   :  { %v5042_v61 = vmax.f32 %v4042_v27, 0.0 }
 0x39c   :  { %v8896_v57 = vpack.c.bf16 %v5044_v15, %v5043_v1  ;;  %8891 = vmatpush3.bf16.msra.mxu1 %v11450_v3  ;;  %v5257_v15 = vld [vmem:[%s11722_s1 + $0x1a0] sm:$0xff] }
 0x39d   :  { %v8892_v30 = vpack.c.bf16 %v5042_v61, %v5041_v36  ;;  %v8379_v32 = vpop.f32.mrb[96].mxu0  ;;  %v5228_v61 = vld [vmem:[%s11722_s1 + $0xb8] sm:$0xff] }
 0x39e   :  { %v4063_v56 = vadd.f32 %v11356_v4, %v8379_v32  ;;  %v4054_v26 = vpop.f32.mrb[97].mxu0 }
 0x39f   :  { %v4055_v63 = vadd.f32 %v11356_v4, %v4054_v26  ;;  %v8380_v19 = vpop.f32.mrb[98].mxu0  ;;  %8893 = vmatprep.subr.bf16.mxu1 %v8892_v30 }
 0x3a0   :  { %v4066_v59 = vadd.f32 %v11356_v4, %v8380_v19  ;;  %v4057_v12 = vpop.f32.mrb[99].mxu0  ;;  %8895 = vmatpush3.bf16.msra.mxu1 %v11460_v0  ;;  %v5047_v58 = vmax.f32 %v4063_v56, 0.0  ;;  %v5258_v0 = vld [vmem:[%s11722_s1 + $0x1a8] sm:$0xff] }
 0x3a1   :  { %v4058_v60 = vadd.f32 %v11356_v4, %v4057_v12  ;;  %8897 = vmatprep.subr.bf16.mxu1 %v8896_v57  ;;  %v5045_v3 = vmax.f32 %v4055_v63, 0.0 }
 0x3a2   :  { %v5048_v10 = vmax.f32 %v4066_v59, 0.0 }
 0x3a3   :  { %v5046_v55 = vmax.f32 %v4058_v60, 0.0 }
 0x3a4   :  { %v11495_v37 = vpack.c.bf16 %v5048_v10, %v5047_v58  ;;  %8899 = vmatpush3.bf16.msra.mxu1 %v11458_v14 }
 0x3a5   :  { %v11501_v16 = vpack.c.bf16 %v5046_v55, %v5045_v3  ;;  %v8383_v24 = vpop.f32.mrb[100].mxu0 }
 0x3a6   :  { %v4079_v49 = vadd.f32 %v11356_v4, %v8383_v24  ;;  %v4070_v21 = vpop.f32.mrb[101].mxu0 }
 0x3a7   :  { %v4071_v7 = vadd.f32 %v11356_v4, %v4070_v21  ;;  %v8384_v27 = vpop.f32.mrb[102].mxu0  ;;  %6084 = vmatmul.mubr.f32.vlgmr.msra.gmra.mrb[172].mxu1 %v5225_v33 }
 0x3a8   :  { %v4082_v14 = vadd.f32 %v11356_v4, %v8384_v27  ;;  %v4073_v1 = vpop.f32.mrb[103].mxu0  ;;  %6088 = vmatprep.mubr.f32.mxu1 %v5258_v0  ;;  %v5051_v57 = vmax.f32 %v4079_v49, 0.0 }
 0x3a9   :  { %v4074_v36 = vadd.f32 %v11356_v4, %v4073_v1  ;;  %v5049_v32 = vmax.f32 %v4071_v7, 0.0 }
 0x3aa   :  { %v5052_v30 = vmax.f32 %v4082_v14, 0.0 }
 0x3ab   :  { %v5050_v56 = vmax.f32 %v4074_v36, 0.0  ;;  %6089 = vmatmul.mubr.f32.gmra.mrb[174].mxu1 %v5257_v15 }
 0x3ac   :  { %v11516_v26 = vpack.c.bf16 %v5052_v30, %v5051_v57  ;;  %6158 = vmatprep.mubr.f32.mxu1 %v5228_v61 }
 0x3ad   :  { %v11518_v63 = vpack.c.bf16 %v5050_v56, %v5049_v32  ;;  %v8387_v19 = vpop.f32.mrb[104].mxu0 }
 0x3ae   :  { %v4095_v59 = vadd.f32 %v11356_v4, %v8387_v19  ;;  %v4086_v12 = vpop.f32.mrb[105].mxu0 }
 0x3af   :  { %v4087_v60 = vadd.f32 %v11356_v4, %v4086_v12  ;;  %v8388_v58 = vpop.f32.mrb[106].mxu0 }
 0x3b0   :  { %v4098_v10 = vadd.f32 %v11356_v4, %v8388_v58  ;;  %v4089_v3 = vpop.f32.mrb[107].mxu0  ;;  %v5055_v33 = vmax.f32 %v4095_v59, 0.0 }
 0x3b1   :  { %v4090_v55 = vadd.f32 %v11356_v4, %v4089_v3  ;;  %v5053_v0 = vmax.f32 %v4087_v60, 0.0 }
 0x3b2   :  { %v5056_v24 = vmax.f32 %v4098_v10, 0.0 }
 0x3b3   :  { %v5054_v49 = vmax.f32 %v4090_v55, 0.0 }
 0x3b4   :  { %v11524_v21 = vpack.c.bf16 %v5056_v24, %v5055_v33 }
 0x3b5   :  { %v11526_v7 = vpack.c.bf16 %v5054_v49, %v5053_v0  ;;  %v8391_v27 = vpop.f32.mrb[108].mxu0 }
 0x3b6   :  { %v4111_v14 = vadd.f32 %v11356_v4, %v8391_v27  ;;  %v4102_v1 = vpop.f32.mrb[109].mxu0 }
 0x3b7   :  { %v4103_v15 = vadd.f32 %v11356_v4, %v4102_v1  ;;  %v8392_v36 = vpop.f32.mrb[110].mxu0 }
 0x3b8   :  { %v4114_v61 = vadd.f32 %v11356_v4, %v8392_v36  ;;  %v4105_v57 = vpop.f32.mrb[111].mxu0  ;;  %v5059_v32 = vmax.f32 %v4111_v14, 0.0 }
 0x3b9   :  { %v4106_v30 = vadd.f32 %v11356_v4, %v4105_v57  ;;  %v5057_v59 = vmax.f32 %v4103_v15, 0.0 }
 0x3ba   :  { %v5060_v56 = vmax.f32 %v4114_v61, 0.0  ;;  %v7705_v19 = vpop.f32.mrb[160].mxu1 }
 0x3bb   :  { %v5058_v12 = vmax.f32 %v4106_v30, 0.0  ;;  %v7706_v60 = vpop.f32.mrb[161].mxu1 }
 0x3bc   :  { %v11532_v58 = vpack.c.bf16 %v5060_v56, %v5059_v32  ;;  %v7707_v10 = vadd.f32 %v7706_v60, %v7705_v19 }
 0x3bd   :  { %v8926_v3 = vpack.c.bf16 %v5058_v12, %v5057_v59  ;;  %v8395_v55 = vpop.f32.mrb[112].mxu0 }
 0x3be   :  { %v11535_v33 = vadd.f32 %v7707_v10, %v11463_v23  ;;  %v4127_v24 = vadd.f32 %v11356_v4, %v8395_v55  ;;  %v4118_v0 = vpop.f32.mrb[113].mxu0  ;;  %v7708_v49 = vpop.f32.mrb[162].mxu1 }
 0x3bf   :  { %v4119_v27 = vadd.f32 %v11356_v4, %v4118_v0  ;;  %v8396_v14 = vpop.f32.mrb[114].mxu0  ;;  %v7709_v1 = vpop.f32.mrb[163].mxu1 }
 0x3c0   :  { %v4130_v15 = vadd.f32 %v11356_v4, %v8396_v14  ;;  %v7710_v36 = vadd.f32 %v7709_v1, %v7708_v49  ;;  %v4121_v61 = vpop.f32.mrb[115].mxu0  ;;  %v5063_v30 = vmax.f32 %v4127_v24, 0.0 }
 0x3c1   :  { %v4122_v57 = vadd.f32 %v11356_v4, %v4121_v61  ;;  %v5061_v23 = vmax.f32 %v4119_v27, 0.0 }
 0x3c2   :  { %v5064_v32 = vmax.f32 %v4130_v15, 0.0  ;;  %v11542_v56 = vadd.f32 %v7710_v36, %v11470_v43 }
 0x3c3   :  { %v5062_v19 = vmax.f32 %v4122_v57, 0.0 }
 0x3c4   :  { %v8904_v59 = vpack.c.bf16 %v5064_v32, %v5063_v30 }
 0x3c5   :  { %v8900_v12 = vpack.c.bf16 %v5062_v19, %v5061_v23  ;;  %v8399_v60 = vpop.f32.mrb[116].mxu0 }
 0x3c6   :  { %v4143_v10 = vadd.f32 %v11356_v4, %v8399_v60  ;;  %v4134_v55 = vpop.f32.mrb[117].mxu0 }
 0x3c7   :  { %v4135_v0 = vadd.f32 %v11356_v4, %v4134_v55  ;;  %v8400_v14 = vpop.f32.mrb[118].mxu0  ;;  %8901 = vmatprep.subr.bf16.mxu1 %v8900_v12 }
 0x3c8   :  { %v4146_v49 = vadd.f32 %v11356_v4, %v8400_v14  ;;  %v4137_v1 = vpop.f32.mrb[119].mxu0  ;;  %8903 = vmatpush3.bf16.msra.mxu1 %v11501_v16  ;;  %v5067_v24 = vmax.f32 %v4143_v10, 0.0 }
 0x3c9   :  { %v4138_v43 = vadd.f32 %v11356_v4, %v4137_v1  ;;  %8905 = vmatprep.subr.bf16.mxu1 %v8904_v59  ;;  %v5065_v15 = vmax.f32 %v4135_v0, 0.0 }
 0x3ca   :  { %v5068_v27 = vmax.f32 %v4146_v49, 0.0 }
 0x3cb   :  { %v5066_v36 = vmax.f32 %v4138_v43, 0.0  ;;  %v11778_v43 = vld [vmem:[#allocation14_spill] sm:$0xff] }
 0x3cc   :  { %v8912_v61 = vpack.c.bf16 %v5068_v27, %v5067_v24  ;;  %8907 = vmatpush3.bf16.msra.mxu1 %v11495_v37  ;;  %v11779_v24 = vld [vmem:[#allocation25_spill] sm:$0xff] }
 0x3cd   :  { %v8908_v57 = vpack.c.bf16 %v5066_v36, %v5065_v15  ;;  %v8403_v30 = vpop.f32.mrb[120].mxu0 }
 0x3ce   :  { %v4159_v32 = vadd.f32 %v11356_v4, %v8403_v30  ;;  %v4150_v23 = vpop.f32.mrb[121].mxu0  ;;  %v11781_v30 = vld [vmem:[#allocation24_spill] sm:$0xff] }
 0x3cf   :  { %v4151_v19 = vadd.f32 %v11356_v4, %v4150_v23  ;;  %v8404_v12 = vpop.f32.mrb[122].mxu0  ;;  %8909 = vmatprep.subr.bf16.mxu1 %v8908_v57  ;;  %v11780_v57 = vld [vmem:[#allocation17_spill] sm:$0xff]  ;;  %v11782_v23 = vld [vmem:[#allocation16_spill] sm:$0xff] }
 0x3d0   :  { %v4162_v16 = vadd.f32 %v11356_v4, %v8404_v12  ;;  %v4153_v60 = vpop.f32.mrb[123].mxu0  ;;  %8911 = vmatpush3.bf16.msra.mxu1 %v11518_v63  ;;  %v5071_v10 = vmax.f32 %v4159_v32, 0.0  ;;  %v11773_v63 = vld [vmem:[#allocation20_spill] sm:$0xff]  ;;  %v11783_v12 = vld [vmem:[#allocation35_spill] sm:$0xff] }
 0x3d1   :  { %v4154_v59 = vadd.f32 %v11356_v4, %v4153_v60  ;;  %8913 = vmatprep.subr.bf16.mxu1 %v8912_v61  ;;  %v5069_v37 = vmax.f32 %v4151_v19, 0.0  ;;  %v5227_v4 = vld [vmem:[%s11722_s1 + $0xb0] sm:$0xff]  ;;  %v5233_v19 = vld [vmem:[%s11722_s1 + $0xe0] sm:$0xff] }
 0x3d2   :  { %v5072_v55 = vmax.f32 %v4162_v16, 0.0  ;;  %v5266_v16 = vld [vmem:[%s11722_s1 + $0x1e8] sm:$0xff]  ;;  %v11784_v60 = vld [vmem:[#allocation27_spill] sm:$0xff] }
 0x3d3   :  { %v5070_v0 = vmax.f32 %v4154_v59, 0.0  ;;  %v5265_v59 = vld [vmem:[%s11722_s1 + $0x1e0] sm:$0xff] }
 0x3d4   :  { %v8920_v14 = vpack.c.bf16 %v5072_v55, %v5071_v10  ;;  %8915 = vmatpush3.bf16.msra.mxu1 %v11516_v26  ;;  %v5260_v26 = vld [vmem:[%s11722_s1 + $0x1b8] sm:$0xff]  ;;  %v11785_v10 = vld [vmem:[#allocation34_spill] sm:$0xff] }
 0x3d5   :  { %v8916_v49 = vpack.c.bf16 %v5070_v0, %v5069_v37  ;;  %v5236_v55 = vld [vmem:[%s11722_s1 + $0xf8] sm:$0xff]  ;;  %v11786_v37 = vld [vmem:[#allocation26_spill] sm:$0xff]  ;;  %v11787_v0 = vld [vmem:[#allocation37_spill] sm:$0xff] }
 0x3d7   :  { %8917 = vmatprep.subr.bf16.mxu1 %v8916_v49  ;;  %v11789_v49 = vld [vmem:[#allocation36_spill] sm:$0xff] }
 0x3d8   :  { %8919 = vmatpush3.bf16.msra.mxu1 %v11526_v7  ;;  %v11775_v7 = vld [vmem:[#allocation23_spill] sm:$0xff] }
 0x3d9   :  { %8921 = vmatprep.subr.bf16.mxu1 %v8920_v14  ;;  %v11788_v14 = vld [vmem:[#allocation29_spill] sm:$0xff] }
 0x3dc   :  { %8923 = vmatpush3.bf16.msra.mxu1 %v11524_v21  ;;  %v11774_v21 = vld [vmem:[#allocation12_spill] sm:$0xff] }
 0x3dd   :  { %8925 = vmatprep.subr.bf16.mxu1 %v10432_v42  ;;  %v5230_v42 = vld [vmem:[%s11722_s1 + $0xc8] sm:$0xff] }
 0x3e0   :  { %8927 = vmatpush3.bf16.msra.mxu1 %v8926_v3  ;;  %v11777_v3 = vld [vmem:[#allocation22_spill] sm:$0xff] }
 0x3e1   :  { %8929 = vmatprep.subr.bf16.mxu1 %v10429_v39  ;;  %v5259_v39 = vld [vmem:[%s11722_s1 + $0x1b0] sm:$0xff] }
 0x3e4   :  { %8931 = vmatpush3.bf16.msra.mxu1 %v11532_v58  ;;  %v11776_v58 = vld [vmem:[#allocation15_spill] sm:$0xff] }
 0x3e5   :  { %8933 = vmatprep.subr.bf16.mxu1 %v10563_v2 }
 0x3e7   :  { %6159 = vmatmul.mubr.f32.vlgmr.msra.gmra.mrb[176].mxu1 %v5227_v4  ;;  %v11790_v4 = vld [vmem:[#allocation28_spill] sm:$0xff] }
 0x3e8   :  { %8935 = vmatpush3.bf16.msra.mxu1 %v10454_v9  ;;  %6163 = vmatprep.mubr.f32.mxu1 %v5260_v26  ;;  %v11791_v26 = vld [vmem:[#allocation31_spill] sm:$0xff] }
 0x3e9   :  { %8937 = vmatprep.subr.bf16.mxu1 %v10560_v53 }
 0x3eb   :  { %6164 = vmatmul.mubr.f32.gmra.mrb[178].mxu1 %v5259_v39  ;;  %v11792_v39 = vld [vmem:[#allocation30_spill] sm:$0xff] }
 0x3ec   :  { %8939 = vmatpush3.bf16.msra.mxu1 %v10451_v6  ;;  %6233 = vmatprep.mubr.f32.mxu1 %v5230_v42  ;;  %v11793_v42 = vld [vmem:[#allocation33_spill] sm:$0xff] }
 0x3ed   :  { %8941 = vmatprep.subr.bf16.mxu1 %v10584_v38 }
 0x3f0   :  { %8943 = vmatpush3.bf16.msra.mxu1 %v10491_v44 }
 0x3f1   :  { %8945 = vmatprep.subr.bf16.mxu1 %v10581_v46 }
 0x3f4   :  { %8947 = vmatpush3.bf16.msra.mxu1 %v10485_v40 }
 0x3f5   :  { %8949 = vmatprep.subr.bf16.mxu1 %v10606_v45  ;;  %v11763_v45 = vld [vmem:[#allocation9_spill] sm:$0xff] }
 0x3f8   :  { %8951 = vmatpush3.bf16.msra.mxu1 %v10515_v13  ;;  %v5229_v13 = vld [vmem:[%s11722_s1 + $0xc0] sm:$0xff] }
 0x3f9   :  { %8953 = vmatprep.subr.bf16.mxu1 %v10603_v41  ;;  %v11762_v41 = vld [vmem:[#allocation5_spill] sm:$0xff] }
 0x3fa   :  { %v7743_v9 = vpop.f32.mrb[164].mxu1 }
 0x3fb   :  { %v7744_v53 = vpop.f32.mrb[165].mxu1 }
 0x3fc   :  { %v7745_v2 = vadd.f32 %v7744_v53, %v7743_v9  ;;  %8955 = vmatpush3.bf16.msra.mxu1 %v10512_v11  ;;  %v5262_v11 = vld [vmem:[%s11722_s1 + $0x1c8] sm:$0xff]  ;;  %v11794_v9 = vld [vmem:[#allocation32_spill] sm:$0xff]  ;;  %v5235_v53 = vld [vmem:[%s11722_s1 + $0xf0] sm:$0xff] }
 0x3fd   :  { %8957 = vmatprep.subr.bf16.mxu1 %v10628_v54  ;;  %v11765_v54 = vld [vmem:[#allocation8_spill] sm:$0xff] }
 0x3fe   :  { %v5936_v6 = vadd.f32 %v7745_v2, %v11535_v33  ;;  %v7746_v44 = vpop.f32.mrb[166].mxu1 }
 0x3ff   :  { %v7747_v38 = vpop.f32.mrb[167].mxu1 }
 0x400   :  { %v7748_v46 = vadd.f32 %v7747_v38, %v7746_v44  ;;  %8959 = vmatpush3.bf16.msra.mxu1 %v10539_v35  ;;  %v5261_v35 = vld [vmem:[%s11722_s1 + $0x1c0] sm:$0xff] }
 0x401   :  { %8961 = vmatprep.subr.bf16.mxu1 %v10625_v17  ;;  %v11764_v17 = vld [vmem:[#allocation7_spill] sm:$0xff] }
 0x402   :  { %v5941_v40 = vadd.f32 %v7748_v46, %v11542_v56 }
 0x404   :  { %8963 = vmatpush3.bf16.msra.mxu1 %v10536_v47  ;;  %v5232_v47 = vld [vmem:[%s11722_s1 + $0xd8] sm:$0xff] }
 0x405   :  { %8965 = vmatprep.subr.bf16.mxu1 %v10764_v25  ;;  %v11769_v25 = vld [vmem:[#allocation18_spill] sm:$0xff] }
 0x407   :  { %6234 = vmatmul.mubr.f32.vlgmr.msra.gmra.mrb[180].mxu1 %v5229_v13  ;;  %v6469_v13 = vld [vmem:[%s11725_s4] sm:$0xff] }
 0x408   :  { %8967 = vmatpush3.bf16.msra.mxu1 %v10655_v5  ;;  %6238 = vmatprep.mubr.f32.mxu1 %v5262_v11  ;;  %v5231_v5 = vld [vmem:[%s11722_s1 + $0xd0] sm:$0xff]  ;;  %v6470_v11 = vld [vmem:[%s11725_s4 + $0x8] sm:$0xff] }
 0x409   :  { %8969 = vmatprep.subr.bf16.mxu1 %v10761_v22  ;;  %v5263_v22 = vld [vmem:[%s11722_s1 + $0x1d0] sm:$0xff] }
 0x40b   :  { %6239 = vmatmul.mubr.f32.gmra.mrb[182].mxu1 %v5261_v35 }
 0x40c   :  { %8971 = vmatpush3.bf16.msra.mxu1 %v10652_v48  ;;  %6308 = vmatprep.mubr.f32.mxu1 %v5232_v47  ;;  %v11766_v48 = vld [vmem:[#allocation6_spill] sm:$0xff]  ;;  %v9060_v47 = vpack.c.bf16 %v6470_v11, %v6469_v13  ;;  %v6561_v13 = vld [vmem:[%s11727_s6] sm:$0xff] }
 0x40d   :  { %8973 = vmatprep.subr.bf16.mxu1 %v10785_v8  ;;  %v11770_v8 = vld [vmem:[#allocation10_spill] sm:$0xff] }
 0x410   :  { %8975 = vmatpush3.bf16.msra.mxu1 %v10692_v52  ;;  %v5264_v52 = vld [vmem:[%s11722_s1 + $0x1d8] sm:$0xff] }
 0x411   :  { %8977 = vmatprep.subr.bf16.mxu1 %v10782_v20  ;;  %v5234_v20 = vld [vmem:[%s11722_s1 + $0xe8] sm:$0xff] }
 0x414   :  { %8979 = vmatpush3.bf16.msra.mxu1 %v10686_v18  ;;  %v11767_v18 = vld [vmem:[#allocation19_spill] sm:$0xff] }
 0x415   :  { %8981 = vmatprep.subr.bf16.mxu1 %v10807_v31  ;;  %v11772_v31 = vld [vmem:[#allocation13_spill] sm:$0xff] }
 0x418   :  { %8983 = vmatpush3.bf16.msra.mxu1 %v10716_v28  ;;  %v11768_v28 = vld [vmem:[#allocation11_spill] sm:$0xff] }
 0x419   :  { %8985 = vmatprep.subr.bf16.mxu1 %v10804_v62  ;;  %v11771_v62 = vld [vmem:[#allocation21_spill] sm:$0xff] }
 0x41c   :  { %8987 = vmatpush3.bf16.msra.mxu1 %v11762_v41 }
 0x41d   :  { %8989 = vmatprep.subr.bf16.mxu1 %v11763_v45 }
 0x420   :  { %8991 = vmatpush3.bf16.msra.mxu1 %v11764_v17  ;;  %v6471_v17 = vld [vmem:[%s11725_s4 + $0x10] sm:$0xff] }
 0x421   :  { %8993 = vmatprep.subr.bf16.mxu1 %v11765_v54  ;;  %v6472_v54 = vld [vmem:[%s11725_s4 + $0x18] sm:$0xff] }
 0x424   :  { %8995 = vmatpush3.bf16.msra.mxu1 %v11766_v48 }
 0x425   :  { %8997 = vmatprep.subr.bf16.mxu1 %v11767_v18  ;;  %v9064_v18 = vpack.c.bf16 %v6472_v54, %v6471_v17 }
 0x427   :  { %6309 = vmatmul.mubr.f32.vlgmr.msra.gmra.mrb[184].mxu1 %v5231_v5 }
 0x428   :  { %8999 = vmatpush3.bf16.msra.mxu1 %v11768_v28  ;;  %6313 = vmatprep.mubr.f32.mxu1 %v5264_v52 }
 0x429   :  { %9001 = vmatprep.subr.bf16.mxu1 %v11769_v25 }
 0x42b   :  { %6314 = vmatmul.mubr.f32.gmra.mrb[186].mxu1 %v5263_v22 }
 0x42c   :  { %9003 = vmatpush3.bf16.msra.mxu1 %v11770_v8  ;;  %6383 = vmatprep.mubr.f32.mxu1 %v5234_v20 }
 0x42d   :  { %9005 = vmatprep.subr.bf16.mxu1 %v11771_v62 }
 0x430   :  { %9007 = vmatpush3.bf16.msra.mxu1 %v11772_v31 }
 0x431   :  { %9009 = vmatprep.subr.bf16.mxu1 %v11773_v63 }
 0x434   :  { %9011 = vmatpush3.bf16.msra.mxu1 %v11774_v21 }
 0x435   :  { %9013 = vmatprep.subr.bf16.mxu1 %v11775_v7 }
 0x438   :  { %9015 = vmatpush3.bf16.msra.mxu1 %v11776_v58 }
 0x439   :  { %9017 = vmatprep.subr.bf16.mxu1 %v11777_v3 }
 0x43a   :  { %v7781_v33 = vpop.f32.mrb[168].mxu1 }
 0x43b   :  { %v7782_v56 = vpop.f32.mrb[169].mxu1 }
 0x43c   :  { %v7783_v1 = vadd.f32 %v7782_v56, %v7781_v33  ;;  %9019 = vmatpush3.bf16.msra.mxu1 %v11778_v43 }
 0x43d   :  { %9021 = vmatprep.subr.bf16.mxu1 %v11779_v24 }
 0x43e   :  { %v6011_v27 = vadd.f32 %v7783_v1, %v5936_v6  ;;  %v7784_v15 = vpop.f32.mrb[170].mxu1 }
 0x43f   :  { %v7785_v36 = vpop.f32.mrb[171].mxu1 }
 0x440   :  { %v7786_v61 = vadd.f32 %v7785_v36, %v7784_v15  ;;  %9023 = vmatpush3.bf16.msra.mxu1 %v11780_v57 }
 0x441   :  { %9025 = vmatprep.subr.bf16.mxu1 %v11781_v30 }
 0x442   :  { %v6016_v32 = vadd.f32 %v7786_v61, %v5941_v40 }
 0x444   :  { %9027 = vmatpush3.bf16.msra.mxu1 %v11782_v23 }
 0x445   :  { %9029 = vmatprep.subr.bf16.mxu1 %v11783_v12 }
 0x447   :  { %6384 = vmatmul.mubr.f32.vlgmr.msra.gmra.mrb[188].mxu1 %v5233_v19 }
 0x448   :  { %9031 = vmatpush3.bf16.msra.mxu1 %v11784_v60  ;;  %6388 = vmatprep.mubr.f32.mxu1 %v5266_v16 }
 0x449   :  { %9033 = vmatprep.subr.bf16.mxu1 %v11785_v10 }
 0x44b   :  { %6389 = vmatmul.mubr.f32.gmra.mrb[190].mxu1 %v5265_v59 }
 0x44c   :  { %9035 = vmatpush3.bf16.msra.mxu1 %v11786_v37  ;;  %6458 = vmatprep.mubr.f32.mxu1 %v5236_v55 }
 0x44d   :  { %9037 = vmatprep.subr.bf16.mxu1 %v11787_v0 }
 0x450   :  { %9039 = vmatpush3.bf16.msra.mxu1 %v11788_v14  ;;  %v7146_v14 = vld [vmem:[%s11726_s5] ss:$0 sm:$0xff] }
 0x451   :  { %9041 = vmatprep.subr.bf16.mxu1 %v11789_v49 }
 0x454   :  { %9043 = vmatpush3.bf16.msra.mxu1 %v11790_v4 }
 0x455   :  { %9045 = vmatprep.subr.bf16.mxu1 %v11206_v34  ;;  %v5268_v34 = vld [vmem:[%s11722_s1 + $0x1f8] sm:$0xff] }
 0x458   :  { %9047 = vmatpush3.bf16.msra.mxu1 %v11791_v26 }
 0x459   :  { %9049 = vmatprep.subr.bf16.mxu1 %v11204_v50  ;;  %v5267_v50 = vld [vmem:[%s11722_s1 + $0x1f0] sm:$0xff] }
 0x45c   :  { %9051 = vmatpush3.bf16.msra.mxu1 %v11792_v39 }
 0x45d   :  { %9053 = vmatprep.subr.bf16.mxu1 %v11215_v29 }
 0x460   :  { %9055 = vmatpush3.bf16.msra.mxu1 %v11793_v42 }
 0x461   :  { %9057 = vmatprep.subr.bf16.mxu1 %v11209_v51 }
 0x464   :  { %9059 = vmatpush3.bf16.msra.mxu1 %v11794_v9 }
 0x465   :  { %9061 = vmatprep.subr.bf16.mxu1 %v9060_v47 }
 0x467   :  { %6459 = vmatmul.mubr.f32.vlgmr.msra.gmra.mrb[192].mxu1 %v5235_v53 }
 0x468   :  { %6463 = vmatprep.mubr.f32.mxu1 %v5268_v34  ;;  %9063 = vmatpush3.bf16.msra.mxu1 %v9060_v47 }
 0x469   :  { %9065 = vmatprep.subr.bf16.mxu1 %v9064_v18 }
 0x46b   :  { %6464 = vmatmul.mubr.f32.gmra.mrb[194].mxu1 %v5267_v50 }
 0x46c   :  { %9067 = vmatpush3.bf16.msra.mxu1 %v9064_v18 }
 0x47a   :  { %v7819_v29 = vpop.f32.mrb[172].mxu1 }
 0x47b   :  { %v7820_v2 = vpop.f32.mrb[173].mxu1 }
 0x47c   :  { %v7821_v51 = vadd.f32 %v7820_v2, %v7819_v29 }
 0x47e   :  { %v6086_v6 = vadd.f32 %v7821_v51, %v6011_v27  ;;  %v7822_v44 = vpop.f32.mrb[174].mxu1 }
 0x47f   :  { %v7823_v38 = vpop.f32.mrb[175].mxu1 }
 0x480   :  { %v7824_v46 = vadd.f32 %v7823_v38, %v7822_v44 }
 0x482   :  { %v6091_v40 = vadd.f32 %v7824_v46, %v6016_v32 }
 0x4ba   :  { %v7857_v35 = vpop.f32.mrb[176].mxu1 }
 0x4bb   :  { %v7858_v41 = vpop.f32.mrb[177].mxu1 }
 0x4bc   :  { %v7859_v45 = vadd.f32 %v7858_v41, %v7857_v35 }
 0x4be   :  { %v6161_v48 = vadd.f32 %v7859_v45, %v6086_v6  ;;  %v7860_v5 = vpop.f32.mrb[178].mxu1 }
 0x4bf   :  { %v7861_v52 = vpop.f32.mrb[179].mxu1 }
 0x4c0   :  { %v7862_v28 = vadd.f32 %v7861_v52, %v7860_v5 }
 0x4c2   :  { %v6166_v22 = vadd.f32 %v7862_v28, %v6091_v40  ;;  %v6562_v40 = vld [vmem:[%s11727_s6 + $0x8] sm:$0xff] }
 0x4da   :  { %v7895_v25 = vpop.f32.mrb[180].mxu1 }
 0x4db   :  { %v7896_v20 = vpop.f32.mrb[181].mxu1 }
 0x4dc   :  { %v7897_v8 = vadd.f32 %v7896_v20, %v7895_v25 }
 0x4de   :  { %v6236_v62 = vadd.f32 %v7897_v8, %v6161_v48  ;;  %v7898_v31 = vpop.f32.mrb[182].mxu1 }
 0x4df   :  { %v7899_v63 = vpop.f32.mrb[183].mxu1 }
 0x4e0   :  { %v7900_v21 = vadd.f32 %v7899_v63, %v7898_v31 }
 0x4e2   :  { %v6241_v7 = vadd.f32 %v7900_v21, %v6166_v22 }
 0x4fa   :  { %v7933_v58 = vpop.f32.mrb[184].mxu1 }
 0x4fb   :  { %v7934_v3 = vpop.f32.mrb[185].mxu1 }
 0x4fc   :  { %v7935_v33 = vadd.f32 %v7934_v3, %v7933_v58 }
 0x4fe   :  { %v6311_v56 = vadd.f32 %v7935_v33, %v6236_v62  ;;  %v7936_v1 = vpop.f32.mrb[186].mxu1  ;;  %v9370_v33 = vmov 0.0  }
 0x4ff   :  { %v7937_v43 = vpop.f32.mrb[187].mxu1  ;;  %6598 = vst.msk [vmem:[#allocation2] sm:$0x1] %vm6597_vm4, %v9370_v33 }
 0x500   :  { %v7938_v24 = vadd.f32 %v7937_v43, %v7936_v1 }
 0x502   :  { %v6316_v27 = vadd.f32 %v7938_v24, %v6241_v7 }
 0x51a   :  { %v7971_v15 = vpop.f32.mrb[188].mxu1 }
 0x51b   :  { %v7972_v36 = vpop.f32.mrb[189].mxu1 }
 0x51c   :  { %v7973_v61 = vadd.f32 %v7972_v36, %v7971_v15 }
 0x51e   :  { %v6386_v57 = vadd.f32 %v7973_v61, %v6311_v56  ;;  %v7974_v30 = vpop.f32.mrb[190].mxu1  ;;  %v6599_v61 = vld [vmem:[#allocation2] sm:$0x1] }
 0x51f   :  { %v7975_v32 = vpop.f32.mrb[191].mxu1 }
 0x520   :  { %v7976_v23 = vadd.f32 %v7975_v32, %v7974_v30 }
 0x522   :  { %v6391_v19 = vadd.f32 %v7976_v23, %v6316_v27 }
 0x53a   :  { %v8009_v12 = vpop.f32.mrb[192].mxu1 }
 0x53b   :  { %v8010_v16 = vpop.f32.mrb[193].mxu1 }
 0x53c   :  { %v8011_v60 = vadd.f32 %v8010_v16, %v8009_v12 }
 0x53e   :  { %v6461_v59 = vadd.f32 %v8011_v60, %v6386_v57  ;;  %v8012_v10 = vpop.f32.mrb[194].mxu1 }
 0x53f   :  { %v8013_v55 = vpop.f32.mrb[195].mxu1 }
 0x540   :  { %v8014_v37 = vadd.f32 %v8013_v55, %v8012_v10  ;;  %8545 = vmatprep.mubr.msk.f32.mxu1 %vm1843_vm0, %v6461_v59 }
 0x542   :  { %v6466_v0 = vadd.f32 %v8014_v37, %v6391_v19 }
 0x544   :  { %8546 = vmatmul.mubr.msk.f32.vlgmr.msra.gmra.mrb[196].mxu1 %vm1843_vm0, %v6466_v0 }
 0x617   :  { %v8547_v49 = vpop.f32.mrb[196].mxu1 }
 0x618   :  { %v6558_v4 = vadd.f32 %v8547_v49, %v7146_v14  ;;  %v6552_v26 = vpop.f32.mrb[197].mxu1 }
 0x619   :  { %v6553_v39 = vadd.f32 %v7146_v14, %v6552_v26 }
 0x61a   :  { %v6570_v42 = vand.u32 2147483647, %v6558_v4  ;;  %v6564_v35 = vmax.f32 %v6558_v4, 0.0  ;;  %v6566_v47 = vmul.f32 %v6562_v40, %v6558_v4 }
 0x61b   :  { %v6569_v9 = vand.u32 2147483647, %v6553_v39  ;;  %v6563_v17 = vmax.f32 %v6553_v39, 0.0  ;;  %v6565_v54 = vmul.f32 %v6561_v13, %v6553_v39 }
 0x61c   :  { %v6572_v53 = vsub.f32 0.0, %v6570_v42  ;;  %v6568_v22 = vsub.f32 %v6564_v35, %v6566_v47 }
 0x61d   :  { %v6571_v34 = vsub.f32 0.0, %v6569_v9  ;;  %v6567_v8 = vsub.f32 %v6563_v17, %v6565_v54 }
 0x61e   :  { %v6575_v50 = vmul.f32 1.442695, %v6572_v53 }
 0x61f   :  { %v6573_v29 = vmul.f32 1.442695, %v6571_v34 }
 0x620   :  { %9334 = vpow2.f32 %v6575_v50 }
 0x621   :  { %9336 = vpow2.f32 %v6573_v29 }
 0x62a   :  { %v9335_v2 = vpop.eup %9334 }
 0x62b   :  { %v9337_v51 = vpop.eup %9336  ;;  %v6586_v6 = vadd.f32 1.0, %v9335_v2  ;;  %v6589_v38 = vmul.f32 -0.5, %v9335_v2  ;;  %v6592_v45 = vand.u32 2147483647, %v9335_v2 }
 0x62c   :  { %v6577_v44 = vadd.f32 1.0, %v9337_v51  ;;  %v6580_v46 = vmul.f32 -0.5, %v9337_v51  ;;  %v6583_v48 = vand.u32 2147483647, %v9337_v51 }
 0x62d   :  { %9338 = vlog2.f32 %v6586_v6  ;;  %v6590_v11 = vadd.f32 1.0, %v6589_v38  ;;  %vm6593_vm1 = vcmp.lt.f32.partialorder %v6592_v45, 0.0004427343 }
 0x62e   :  { %9340 = vlog2.f32 %v6577_v44  ;;  %v6581_v41 = vadd.f32 1.0, %v6580_v46  ;;  %vm6584_vm2 = vcmp.lt.f32.partialorder %v6583_v48, 0.0004427343 }
 0x62f   :  { %v6591_v28 = vmul.f32 %v9335_v2, %v6590_v11 }
 0x630   :  { %v6582_v20 = vmul.f32 %v9337_v51, %v6581_v41 }
 0x637   :  { %v9339_v5 = vpop.eup %9338 }
 0x638   :  { %v9341_v18 = vpop.eup %9340  ;;  %v6588_v52 = vmul.f32 0.6931472, %v9339_v5 }
 0x639   :  { %v6579_v25 = vmul.f32 0.6931472, %v9341_v18 }
 0x63a   :  { %v6594_v62 = vsel %vm6593_vm1, %v6591_v28, %v6588_v52 }
 0x63b   :  { %v6585_v31 = vsel %vm6584_vm2, %v6582_v20, %v6579_v25  ;;  %v6596_v63 = vadd.f32 %v6594_v62, %v6568_v22 }
 0x63c   :  { %v6595_v21 = vadd.f32 %v6585_v31, %v6567_v8 }
 0x63d   :  { %v6602_v7 = vsel %vm6600_vm3, %v6596_v63, 0.0 }
 0x63e   :  { %v6601_v58 = vsel %vm6600_vm3, %v6595_v21, 0.0 }
 0x63f   :  { %v6603_v3 = vadd.f32 %v6602_v7, %v6601_v58 }
 0x641   :  { %6604 = vadd.xlane.f32.xlu0 %v6603_v3 }
 0x6ce   :  { %v6605_v56 = vpop.xlane.xlu0 %6604 }
 0x6cf   :  { %v6606_v1 = vrot.slane %v6605_v56, 4 }
 0x6d1   :  { %v6607_v43 = vadd.f32 %v6606_v1, %v6605_v56 }
 0x6d3   :  { %v6608_v24 = vrot.slane %v6607_v43, 2 }
 0x6d5   :  { %v6609_v27 = vadd.f32 %v6608_v24, %v6607_v43 }
 0x6d7   :  { %v6610_v15 = vrot.slane %v6609_v27, 1 }
 0x6d9   :  { %v6611_v36 = vadd.f32 %v6610_v15, %v6609_v27 }
 0x6db   :  { %9072 = vpush %v6611_v36 }
 0x70c   :  { %s9073_s6 = spop %9072 }
 0x70d   :  { %s6613_s11 = smul.f32 0.0625, %s9073_s6 }
 0x70f   :  { %v6614_v57 = vstv %s6613_s11 }
 0x710   :  { %v6615_v30 = vadd.f32 %v6614_v57, %v6599_v61 }
 0x712   :  { %6616 = vst.msk [vmem:[#allocation2] sm:$0x1] %vm6597_vm4, %v6615_v30 }
 0x713   :  { %9357 = shalt.err (!%p9354_p4)
}
 0x714   :  { %s9358_s17 = scalar_lea.hbm %s11728_s7, 16 }
 0x715   :  { %p9359_p5 = scmp.ne.s32.totalorder %s11728_s7, %s9358_s17  ;;  %p9362_p6 = scmp.lt.u32.totalorder %s9358_s17, %s11728_s7 }
 0x717   :  { %p9364_p7 = pnand %p9362_p6, %p9359_p5 }
 0x719   :  { %9367 = shalt.err (!%p9364_p7)
}
 0x71a   :  { %6626 = dma.vmem_to_hbm [thread:$0]  %s6624_s13, 16, %s11728_s7, [#allocation3]  }
 0x71b   :  { %9368 = dma.done.wait [#allocation3], 16  }
 0x71c   :  { %9369 = vsyncadd [#allocation3], 4294967280 }
 0x71d   :  { %6630 = vsyncpa [#allocation3], 1 }

</bundles_post_ra>
